<compile_context>
chip_gen: v6e
topology: v6e:2x2x1
jax: 0.10.0
libtpu: 0.0.40
codegen_flags: <defaults>
</compile_context>

<pallas_src>
import functools

import jax
import jax.numpy as jnp
from jax.experimental import pallas as pl
from jax.experimental.pallas import tpu as pltpu

D = 768
NUM_CLASSES = 6
N_PAD = 128          # lane-dense padded output width
BN_EPS = 1e-5


def hubert_head_kernel(h_ref, scale_ref, shift_ref, w_ref, b_ref, o_ref,
                       sum_ref, cnt_ref, *, tail_t):
    t = pl.program_id(1)
    last_t = pl.num_programs(1) - 1

    # --- init accumulators at the first T tile of each batch block ---
    @pl.when(t == 0)
    def _():
        sum_ref[...] = jnp.zeros_like(sum_ref)
        cnt_ref[...] = jnp.zeros_like(cnt_ref)

    def accumulate_full():
        # Fold the cast into the sum and do the zero-compare on the packed
        # bf16 values so no (tB, tT, D) f32 temp stays live across both
        # reductions (avoids spilling the whole block back to VMEM).
        sum_ref[...] += jnp.sum(h_ref[...].astype(jnp.float32), axis=1)
        cnt_ref[...] += jnp.sum((h_ref[...] != 0).astype(jnp.float32), axis=1)

    if tail_t == 0:
        # T divides evenly: every tile takes the unmasked fast path.
        accumulate_full()
    else:
        @pl.when(t != last_t)
        def _():
            accumulate_full()

        @pl.when(t == last_t)
        def _():
            # Ragged tail tile: mask out-of-range T rows.  Contents of a
            # partial Pallas block are undefined (NOT zero) and would corrupt
            # both the sum and the nonzero count.
            h = h_ref[...]
            valid = jax.lax.broadcasted_iota(jnp.int32, h.shape, 1) < tail_t
            h = jnp.where(valid, h, jnp.zeros_like(h))
            sum_ref[...] += jnp.sum(h.astype(jnp.float32), axis=1)
            cnt_ref[...] += jnp.sum((h != 0).astype(jnp.float32), axis=1)

    # --- finalize on the last T tile: masked mean -> BN -> ReLU -> Linear ---
    @pl.when(t == last_t)
    def _():
        s = sum_ref[...]
        cnt = cnt_ref[...]
        # If an entire channel is zero, its sum is also zero -> pooled = 0
        # (avoids the inf/NaN the raw divide would produce for padded rows).
        pooled = s / jnp.maximum(cnt, 1.0)                     # (tB, D)

        # BatchNorm1d(768) eval mode, pre-folded into scale/shift, then ReLU.
        x = jnp.maximum(pooled * scale_ref[...] + shift_ref[...], 0.0)

        # Dropout(0.4): identity in eval mode.
        # TODO(synk): train-mode dropout / batch-stat batchnorm not modeled.

        # Linear(768 -> 6), zero-padded to 128 output lanes, then final ReLU.
        y = jnp.dot(x, w_ref[...], preferred_element_type=jnp.float32)
        o_ref[...] = jnp.maximum(y + b_ref[...], 0.0)          # (tB, 128)


def hubert_classification_head(hidden, gamma, beta, running_mean, running_var,
                               w, b, *, block_b=16, block_t=256):
    """hidden: (B, T, 768) activations (any float dtype, bf16 recommended)."""
    B, T, Dh = hidden.shape
    assert Dh == D

    # Fold BatchNorm1d (eval mode, running stats) into a single affine.
    scale = gamma.astype(jnp.float32) * jax.lax.rsqrt(
        running_var.astype(jnp.float32) + BN_EPS)
    shift = beta.astype(jnp.float32) - running_mean.astype(jnp.float32) * scale
    scale = scale.reshape(1, D)
    shift = shift.reshape(1, D)

    # Lane-dense padded linear layer (columns 6..127 are zeros).
    w_pad = jnp.zeros((D, N_PAD), jnp.float32).at[:, :NUM_CLASSES].set(
        w.astype(jnp.float32))
    b_pad = jnp.zeros((1, N_PAD), jnp.float32).at[0, :NUM_CLASSES].set(
        b.astype(jnp.float32))

    # Tile sizes.  block_t is a multiple of 16 (bf16 sublane packing);
    # block_b is a multiple of 8 and is shrunk so that B > 8 yields at least
    # two batch blocks (both v7x TensorCores get work).  No padding of the
    # activations: ragged tail T tile is masked in-kernel, ragged tail B rows
    # produce garbage that is sliced off below.
    block_t = int(max(16, min(block_t, pl.cdiv(T, 16) * 16)))
    block_b = int(max(8, min(block_b, 8 * pl.cdiv(B, 16))))

    grid_b = pl.cdiv(B, block_b)
    grid_t = pl.cdiv(T, block_t)
    B_out = grid_b * block_b          # tiny padded output; sliced at the end
    tail_t = T % block_t

    kernel = functools.partial(hubert_head_kernel, tail_t=tail_t)

    out = pl.pallas_call(
        kernel,
        out_shape=jax.ShapeDtypeStruct((B_out, N_PAD), jnp.float32),
        grid_spec=pltpu.PrefetchScalarGridSpec(
            num_scalar_prefetch=0,
            grid=(grid_b, grid_t),
            in_specs=[
                pl.BlockSpec((block_b, block_t, D), lambda bi, ti: (bi, ti, 0)),
                pl.BlockSpec((1, D), lambda bi, ti: (0, 0)),        # scale
                pl.BlockSpec((1, D), lambda bi, ti: (0, 0)),        # shift
                pl.BlockSpec((D, N_PAD), lambda bi, ti: (0, 0)),    # W (padded)
                pl.BlockSpec((1, N_PAD), lambda bi, ti: (0, 0)),    # b (padded)
            ],
            out_specs=pl.BlockSpec((block_b, N_PAD), lambda bi, ti: (bi, 0)),
            scratch_shapes=[
                pltpu.VMEM((block_b, D), jnp.float32),   # time-axis sum
                pltpu.VMEM((block_b, D), jnp.float32),   # nonzero count
            ],
        ),
        compiler_params=pltpu.CompilerParams(
            dimension_semantics=("parallel", "arbitrary"),
            vmem_limit_bytes=40 * 1024 * 1024),
    )(hidden, scale, shift, w_pad, b_pad)

    return out[:B, :NUM_CLASSES]


if __name__ == "__main__":
    key = jax.random.PRNGKey(0)
    k_h, k_mask, k_g, k_b, k_m, k_v, k_w, k_bias = jax.random.split(key, 8)

    # Deliberately ragged shapes: B=12 vs block_b=8 (2 batch blocks, last one
    # partial) and T=50 vs block_t=16 (4 T tiles, tail of 2) so the test
    # exercises the multi-step accumulation AND the in-kernel tail masking.
    B, T = 12, 50

    # Synthetic `last_hidden_state` from the (stubbed) HuBERT backbone.
    hidden = jax.random.normal(k_h, (B, T, D), dtype=jnp.float32)
    # sprinkle exact zeros so the (output != 0) count differs from T
    zero_mask = jax.random.bernoulli(k_mask, p=0.1, shape=(B, T, D))
    hidden = jnp.where(zero_mask, 0.0, hidden)
    # Stream the activations as bf16 (halves HBM traffic); kernel accumulates
    # in f32.  Exact zeros stay exact zeros under the cast.
    hidden_bf16 = hidden.astype(jnp.bfloat16)

    # Deterministic head parameters (shapes from the module __init__).
    gamma = 1.0 + 0.1 * jax.random.normal(k_g, (D,), dtype=jnp.float32)
    beta = 0.1 * jax.random.normal(k_b, (D,), dtype=jnp.float32)
    running_mean = 0.05 * jax.random.normal(k_m, (D,), dtype=jnp.float32)
    running_var = 1.0 + 0.1 * jax.random.uniform(k_v, (D,), dtype=jnp.float32)
    w = jax.random.normal(k_w, (D, NUM_CLASSES), dtype=jnp.float32) / jnp.sqrt(D)
    b = 0.01 * jax.random.normal(k_bias, (NUM_CLASSES,), dtype=jnp.float32)

    out = hubert_classification_head(hidden_bf16, gamma, beta, running_mean,
                                     running_var, w, b,
                                     block_b=8, block_t=16)
    out = jax.block_until_ready(out)
    assert out.shape == (B, NUM_CLASSES)

    # plain-JAX reference for correctness (same bf16-quantized activations)
    hf = hidden_bf16.astype(jnp.float32)
    pooled = hf.sum(axis=1) / (hf != 0).sum(axis=1)
    ref = (pooled - running_mean) * jax.lax.rsqrt(running_var + BN_EPS) * gamma + beta
    ref = jnp.maximum(ref, 0.0)
    ref = jnp.maximum(ref @ w + b, 0.0)
    assert jnp.allclose(out, ref, atol=1e-3, rtol=1e-3), "mismatch vs reference"

    print("KERNEL_OK")
</pallas_src>

<mosaic_0001>
module attributes {stable_mosaic.version = 11 : i64} {
  func.func @hubert_head_kernel(%arg0: i32, %arg1: i32, %arg2: memref<8x16x768xbf16, #tpu.memory_space<vmem>>, %arg3: memref<1x768xf32, #tpu.memory_space<vmem>>, %arg4: memref<1x768xf32, #tpu.memory_space<vmem>>, %arg5: memref<768x128xf32, #tpu.memory_space<vmem>>, %arg6: memref<1x128xf32, #tpu.memory_space<vmem>>, %arg7: memref<8x128xf32, #tpu.memory_space<vmem>>, %arg8: memref<8x768xf32, #tpu.memory_space<vmem>>, %arg9: memref<8x768xf32, #tpu.memory_space<vmem>>) attributes {dimension_semantics = [#tpu.dimension_semantics<parallel>, #tpu.dimension_semantics<arbitrary>], iteration_bounds = array<i64: 2, 4>, scalar_prefetch = 0 : i64, scratch_operands = 2 : i64, tpu.core_type = #tpu.core_type<tc>, window_params = [{transform_indices = @transform_0, window_bounds = array<i64: 8, 16, 768>}, {pipeline_mode = #tpu.pipeline_mode<synchronous>, transform_indices = @transform_1, window_bounds = array<i64: 1, 768>}, {pipeline_mode = #tpu.pipeline_mode<synchronous>, transform_indices = @transform_2, window_bounds = array<i64: 1, 768>}, {pipeline_mode = #tpu.pipeline_mode<synchronous>, transform_indices = @transform_3, window_bounds = array<i64: 768, 128>}, {pipeline_mode = #tpu.pipeline_mode<synchronous>, transform_indices = @transform_4, window_bounds = array<i64: 1, 128>}, {transform_indices = @transform_5, window_bounds = array<i64: 8, 128>}]} {
    %c0_i32 = arith.constant 0 : i32
    %0 = arith.cmpi eq, %arg1, %c0_i32 : i32
    %1 = arith.extui %0 : i1 to i32
    %c0_i32_0 = arith.constant 0 : i32
    %2 = arith.cmpi ne, %1, %c0_i32_0 : i32
    scf.if %2 {
      %cst = arith.constant 0.000000e+00 : f32
      %12 = vector.broadcast %cst : f32 to vector<8x768xf32>
      %c0 = arith.constant 0 : index
      %c0_6 = arith.constant 0 : index
      %13 = vector.load %arg8[%c0, %c0_6] : memref<8x768xf32, #tpu.memory_space<vmem>>, vector<8x768xf32>
      tpu.vector_store %arg8[%c0, %c0_6], %12 {strides = array<i32>} : memref<8x768xf32, #tpu.memory_space<vmem>>, vector<8x768xf32>,
      %cst_7 = arith.constant 0.000000e+00 : f32
      %14 = vector.broadcast %cst_7 : f32 to vector<8x768xf32>
      %c0_8 = arith.constant 0 : index
      %c0_9 = arith.constant 0 : index
      %15 = vector.load %arg9[%c0_8, %c0_9] : memref<8x768xf32, #tpu.memory_space<vmem>>, vector<8x768xf32>
      tpu.vector_store %arg9[%c0_8, %c0_9], %14 {strides = array<i32>} : memref<8x768xf32, #tpu.memory_space<vmem>>, vector<8x768xf32>,
    } else {
    }
    %c3_i32 = arith.constant 3 : i32
    %3 = arith.cmpi ne, %arg1, %c3_i32 : i32
    %4 = arith.extui %3 : i1 to i32
    %c0_i32_1 = arith.constant 0 : i32
    %5 = arith.cmpi ne, %4, %c0_i32_1 : i32
    scf.if %5 {
      %c0 = arith.constant 0 : index
      %c0_6 = arith.constant 0 : index
      %12 = vector.load %arg8[%c0, %c0_6] : memref<8x768xf32, #tpu.memory_space<vmem>>, vector<8x768xf32>
      %c0_7 = arith.constant 0 : index
      %c0_8 = arith.constant 0 : index
      %c0_9 = arith.constant 0 : index
      %13 = vector.load %arg2[%c0_7, %c0_8, %c0_9] : memref<8x16x768xbf16, #tpu.memory_space<vmem>>, vector<8x16x768xbf16>
      %14 = arith.extf %13 : vector<8x16x768xbf16> to vector<8x16x768xf32>
      %cst = arith.constant dense<0.000000e+00> : vector<8x768xf32>
      %15 = vector.multi_reduction <add>, %14, %cst [1] : vector<8x16x768xf32> to vector<8x768xf32>
      %16 = arith.addf %12, %15 : vector<8x768xf32>
      %c0_10 = arith.constant 0 : index
      %c0_11 = arith.constant 0 : index
      %17 = vector.load %arg8[%c0_10, %c0_11] : memref<8x768xf32, #tpu.memory_space<vmem>>, vector<8x768xf32>
      tpu.vector_store %arg8[%c0_10, %c0_11], %16 {strides = array<i32>} : memref<8x768xf32, #tpu.memory_space<vmem>>, vector<8x768xf32>,
      %c0_12 = arith.constant 0 : index
      %c0_13 = arith.constant 0 : index
      %18 = vector.load %arg9[%c0_12, %c0_13] : memref<8x768xf32, #tpu.memory_space<vmem>>, vector<8x768xf32>
      %c0_14 = arith.constant 0 : index
      %c0_15 = arith.constant 0 : index
      %c0_16 = arith.constant 0 : index
      %19 = vector.load %arg2[%c0_14, %c0_15, %c0_16] : memref<8x16x768xbf16, #tpu.memory_space<vmem>>, vector<8x16x768xbf16>
      %cst_17 = arith.constant 0.000000e+00 : bf16
      %20 = vector.broadcast %cst_17 : bf16 to vector<8x16x768xbf16>
      %21 = arith.cmpf one, %19, %20 : vector<8x16x768xbf16>
      %22 = arith.extui %21 : vector<8x16x768xi1> to vector<8x16x768xi32>
      %23 = arith.sitofp %22 : vector<8x16x768xi32> to vector<8x16x768xf32>
      %cst_18 = arith.constant dense<0.000000e+00> : vector<8x768xf32>
      %24 = vector.multi_reduction <add>, %23, %cst_18 [1] : vector<8x16x768xf32> to vector<8x768xf32>
      %25 = arith.addf %18, %24 : vector<8x768xf32>
      %c0_19 = arith.constant 0 : index
      %c0_20 = arith.constant 0 : index
      %26 = vector.load %arg9[%c0_19, %c0_20] : memref<8x768xf32, #tpu.memory_space<vmem>>, vector<8x768xf32>
      tpu.vector_store %arg9[%c0_19, %c0_20], %25 {strides = array<i32>} : memref<8x768xf32, #tpu.memory_space<vmem>>, vector<8x768xf32>,
    } else {
    }
    %c3_i32_2 = arith.constant 3 : i32
    %6 = arith.cmpi eq, %arg1, %c3_i32_2 : i32
    %7 = arith.extui %6 : i1 to i32
    %c0_i32_3 = arith.constant 0 : i32
    %8 = arith.cmpi ne, %7, %c0_i32_3 : i32
    scf.if %8 {
      %c0 = arith.constant 0 : index
      %c0_6 = arith.constant 0 : index
      %c0_7 = arith.constant 0 : index
      %12 = vector.load %arg2[%c0, %c0_6, %c0_7] : memref<8x16x768xbf16, #tpu.memory_space<vmem>>, vector<8x16x768xbf16>
      %13 = tpu.iota {dimensions = array<i32: 1>} : vector<8x16x768xi32>
      %c2_i32 = arith.constant 2 : i32
      %14 = vector.broadcast %c2_i32 : i32 to vector<8x16x768xi32>
      %15 = arith.cmpi slt, %13, %14 : vector<8x16x768xi32>
      %cst = arith.constant 0.000000e+00 : bf16
      %16 = vector.broadcast %cst : bf16 to vector<8x16x768xbf16>
      %17 = arith.select %15, %12, %16 : vector<8x16x768xi1>, vector<8x16x768xbf16>
      %c0_8 = arith.constant 0 : index
      %c0_9 = arith.constant 0 : index
      %18 = vector.load %arg8[%c0_8, %c0_9] : memref<8x768xf32, #tpu.memory_space<vmem>>, vector<8x768xf32>
      %19 = arith.extf %17 : vector<8x16x768xbf16> to vector<8x16x768xf32>
      %cst_10 = arith.constant dense<0.000000e+00> : vector<8x768xf32>
      %20 = vector.multi_reduction <add>, %19, %cst_10 [1] : vector<8x16x768xf32> to vector<8x768xf32>
      %21 = arith.addf %18, %20 : vector<8x768xf32>
      %c0_11 = arith.constant 0 : index
      %c0_12 = arith.constant 0 : index
      %22 = vector.load %arg8[%c0_11, %c0_12] : memref<8x768xf32, #tpu.memory_space<vmem>>, vector<8x768xf32>
      tpu.vector_store %arg8[%c0_11, %c0_12], %21 {strides = array<i32>} : memref<8x768xf32, #tpu.memory_space<vmem>>, vector<8x768xf32>,
      %c0_13 = arith.constant 0 : index
      %c0_14 = arith.constant 0 : index
      %23 = vector.load %arg9[%c0_13, %c0_14] : memref<8x768xf32, #tpu.memory_space<vmem>>, vector<8x768xf32>
      %cst_15 = arith.constant 0.000000e+00 : bf16
      %24 = vector.broadcast %cst_15 : bf16 to vector<8x16x768xbf16>
      %25 = arith.cmpf one, %17, %24 : vector<8x16x768xbf16>
      %26 = arith.extui %25 : vector<8x16x768xi1> to vector<8x16x768xi32>
      %27 = arith.sitofp %26 : vector<8x16x768xi32> to vector<8x16x768xf32>
      %cst_16 = arith.constant dense<0.000000e+00> : vector<8x768xf32>
      %28 = vector.multi_reduction <add>, %27, %cst_16 [1] : vector<8x16x768xf32> to vector<8x768xf32>
      %29 = arith.addf %23, %28 : vector<8x768xf32>
      %c0_17 = arith.constant 0 : index
      %c0_18 = arith.constant 0 : index
      %30 = vector.load %arg9[%c0_17, %c0_18] : memref<8x768xf32, #tpu.memory_space<vmem>>, vector<8x768xf32>
      tpu.vector_store %arg9[%c0_17, %c0_18], %29 {strides = array<i32>} : memref<8x768xf32, #tpu.memory_space<vmem>>, vector<8x768xf32>,
    } else {
    }
    %c3_i32_4 = arith.constant 3 : i32
    %9 = arith.cmpi eq, %arg1, %c3_i32_4 : i32
    %10 = arith.extui %9 : i1 to i32
    %c0_i32_5 = arith.constant 0 : i32
    %11 = arith.cmpi ne, %10, %c0_i32_5 : i32
    scf.if %11 {
      %c0 = arith.constant 0 : index
      %c0_6 = arith.constant 0 : index
      %12 = vector.load %arg8[%c0, %c0_6] : memref<8x768xf32, #tpu.memory_space<vmem>>, vector<8x768xf32>
      %c0_7 = arith.constant 0 : index
      %c0_8 = arith.constant 0 : index
      %13 = vector.load %arg9[%c0_7, %c0_8] : memref<8x768xf32, #tpu.memory_space<vmem>>, vector<8x768xf32>
      %cst = arith.constant 1.000000e+00 : f32
      %14 = vector.broadcast %cst : f32 to vector<8x768xf32>
      %15 = arith.maximumf %13, %14 : vector<8x768xf32>
      %16 = arith.divf %12, %15 : vector<8x768xf32>
      %c0_9 = arith.constant 0 : index
      %c0_10 = arith.constant 0 : index
      %17 = vector.load %arg3[%c0_9, %c0_10] : memref<1x768xf32, #tpu.memory_space<vmem>>, vector<1x768xf32>
      %18 = vector.broadcast %17 : vector<1x768xf32> to vector<8x768xf32>
      %19 = arith.mulf %16, %18 : vector<8x768xf32>
      %c0_11 = arith.constant 0 : index
      %c0_12 = arith.constant 0 : index
      %20 = vector.load %arg4[%c0_11, %c0_12] : memref<1x768xf32, #tpu.memory_space<vmem>>, vector<1x768xf32>
      %21 = vector.broadcast %20 : vector<1x768xf32> to vector<8x768xf32>
      %22 = arith.addf %19, %21 : vector<8x768xf32>
      %cst_13 = arith.constant 0.000000e+00 : f32
      %23 = vector.broadcast %cst_13 : f32 to vector<8x768xf32>
      %24 = arith.maximumf %22, %23 : vector<8x768xf32>
      %c0_14 = arith.constant 0 : index
      %c0_15 = arith.constant 0 : index
      %25 = vector.load %arg5[%c0_14, %c0_15] : memref<768x128xf32, #tpu.memory_space<vmem>>, vector<768x128xf32>
      %cst_16 = arith.constant dense<0.000000e+00> : vector<8x128xf32>
      %26 = tpu.matmul %24, %25, %cst_16 {dimension_numbers = #tpu.dot_dimension_numbers<[1], [0], [0], [1], [0, 0, 1, 1], [], []>} : vector<8x768xf32>, vector<768x128xf32>, vector<8x128xf32> -> vector<8x128xf32>
      %c0_17 = arith.constant 0 : index
      %c0_18 = arith.constant 0 : index
      %27 = vector.load %arg6[%c0_17, %c0_18] : memref<1x128xf32, #tpu.memory_space<vmem>>, vector<1x128xf32>
      %28 = vector.broadcast %27 : vector<1x128xf32> to vector<8x128xf32>
      %29 = arith.addf %26, %28 : vector<8x128xf32>
      %cst_19 = arith.constant 0.000000e+00 : f32
      %30 = vector.broadcast %cst_19 : f32 to vector<8x128xf32>
      %31 = arith.maximumf %29, %30 : vector<8x128xf32>
      %c0_20 = arith.constant 0 : index
      %c0_21 = arith.constant 0 : index
      %32 = vector.load %arg7[%c0_20, %c0_21] : memref<8x128xf32, #tpu.memory_space<vmem>>, vector<8x128xf32>
      tpu.vector_store %arg7[%c0_20, %c0_21], %31 {strides = array<i32>} : memref<8x128xf32, #tpu.memory_space<vmem>>, vector<8x128xf32>,
    } else {
    }
    return
  }
  func.func @transform_0(%arg0: i32, %arg1: i32) -> (i32, i32, i32) {
    %c0_i32 = arith.constant 0 : i32
    %c0_i32_0 = arith.constant 0 : i32
    return %arg0, %arg1, %c0_i32 : i32, i32, i32
  }
  func.func @transform_1(%arg0: i32, %arg1: i32) -> (i32, i32) {
    %c0_i32 = arith.constant 0 : i32
    %c0_i32_0 = arith.constant 0 : i32
    %c0_i32_1 = arith.constant 0 : i32
    return %c0_i32, %c0_i32_0 : i32, i32
  }
  func.func @transform_2(%arg0: i32, %arg1: i32) -> (i32, i32) {
    %c0_i32 = arith.constant 0 : i32
    %c0_i32_0 = arith.constant 0 : i32
    %c0_i32_1 = arith.constant 0 : i32
    return %c0_i32, %c0_i32_0 : i32, i32
  }
  func.func @transform_3(%arg0: i32, %arg1: i32) -> (i32, i32) {
    %c0_i32 = arith.constant 0 : i32
    %c0_i32_0 = arith.constant 0 : i32
    %c0_i32_1 = arith.constant 0 : i32
    return %c0_i32, %c0_i32_0 : i32, i32
  }
  func.func @transform_4(%arg0: i32, %arg1: i32) -> (i32, i32) {
    %c0_i32 = arith.constant 0 : i32
    %c0_i32_0 = arith.constant 0 : i32
    %c0_i32_1 = arith.constant 0 : i32
    return %c0_i32, %c0_i32_0 : i32, i32
  }
  func.func @transform_5(%arg0: i32, %arg1: i32) -> (i32, i32) {
    %c0_i32 = arith.constant 0 : i32
    %c0_i32_0 = arith.constant 0 : i32
    return %arg0, %c0_i32 : i32, i32
  }
}

</mosaic_0001>

<bundles_post_ra>
// kernel: tpu_custom_call.1
= control target key start
LH: loop header
LB: loop body
LE: loop exit
PB: predicated region body
PF: predicated region fallthrough
CT: control target
= control target key end

     0   :  { %s9164_s0 = inlined_call_operand.hbm [shape: bf16[12,50,768], index: 0, kind: input, shape index: {}]   ;;  %s9165_s1 = inlined_call_operand.hbm [shape: f32[1,768], index: 1, kind: input, shape index: {}]   ;;  %s9166_s2 = inlined_call_operand.hbm [shape: f32[1,768], index: 2, kind: input, shape index: {}]   ;;  %s9167_s3 = inlined_call_operand.hbm [shape: f32[768,128], index: 3, kind: input, shape index: {}]   ;;  %s9168_s4 = inlined_call_operand.vmem [shape: f32[1,128], index: 4, kind: input, shape index: {}]   ;;  %s9169_s5 = inlined_call_operand.hbm [shape: f32[16,128], index: 5, kind: output, shape index: {}]  }
   0x1   :  { %9279 = sst [smem:[#allocation100_spill]] %s9165_s1 }
   0x2   :  { %9280 = sst [smem:[#allocation101_spill]] %s9166_s2 }
   0x3   :  { %9281 = sst [smem:[#allocation102_spill]] %s9167_s3 }
   0x4   :  { %9282 = sst [smem:[#allocation103_spill]] %s9169_s5 }
   0x5   :  { %10 = vsyncpa [#allocation5], 0 }
   0x6   :  { %12 = vsyncpa [#allocation5 + $0x1], 0 }
   0x7   :  { %13 = vsyncpa [#allocation8], 0 }
   0x8   :  { %14 = vsyncpa [#allocation11], 0 }
   0x9   :  { %15 = vsyncpa [#allocation6], 0 }
   0xa   :  { %17 = vsyncpa [#allocation6 + $0x1], 0  ;;  %s4836_s18 = smov 0   ;;  %s4838_s19 = smov 0  }
   0xb   :  { %s4840_s20 = smov 0   ;;  %s4842_s21 = smov 0  }
   0xc   :  { %s4844_s22 = smov 0   ;;  %s4846_s23 = smov 0  }
   0xd   :  { %s4848_s24 = smov 0   ;;  %s4850_s25 = smov 0  }
   0xe   :  { %s4852_s26 = smov 0   ;;  %s4854_s27 = smov 0  }
   0xf   :  { %s4856_s28 = smov 0  }
  0x10 LB: > { %9283 = sst [smem:[#allocation19_spill]] %s4747_s18  ;;  %s4095_s29 = sadd.s32 4294967295, %s4787_s28   ;;  %s4787_s28 = sphi %s4856_s28, %s23_s28   ;;  %s4783_s27 = sphi %s4854_s27, %s10438_s27   ;;  %s4779_s26 = sphi %s4852_s26, %s10437_s26   ;;  %s4775_s25 = sphi %s4850_s25, %s10430_s25   ;;  %s4771_s24 = sphi %s4848_s24, %s10429_s24   ;;  %s4767_s23 = sphi %s4846_s23, %s10428_s23   ;;  %s4763_s22 = sphi %s4844_s22, %s10436_s22   ;;  %s4759_s21 = sphi %s4842_s21, %s10435_s21   ;;  %s4755_s20 = sphi %s4840_s20, %s10426_s20   ;;  %s4751_s19 = sphi %s4838_s19, %s10434_s19   ;;  %s4747_s18 = sphi %s4836_s18, %s10433_s18  }
  0x11   : > { %9284 = sst [smem:[#allocation20_spill]] %s4755_s20  ;;  %s4096_s30 = sadd.s32 4294967294, %s4787_s28  }
  0x12   : > { %9285 = sst [smem:[#allocation21_spill]] %s4767_s23  ;;  %s32_s6 = sadd.s32 1, %s4779_s26 }
  0x13   : > { %9286 = sst [smem:[#allocation22_spill]] %s4779_s26  ;;  %s35_s7 = sadd.s32 1, %s4783_s27 }
  0x14   : > { %9287 = sst [smem:[#allocation23_spill]] %s4783_s27  ;;  %p33_p0 = scmp.ge.s32.totalorder %s32_s6, 4 }
  0x15   : > { %9288 = sst [smem:[#allocation24_spill]] %s4787_s28  ;;  %s44_s8 = sadd.s32 1, %s4767_s23 }
  0x16   : > { %p51_p1 = scmp.ne.s32.totalorder %s4767_s23, %s4763_s22  ;;  %p52_p2 = scmp.eq.s32.totalorder %s4787_s28, 0 }
  0x17   : > { %s10440_s6 = smov (%p33_p0, %s32_s6), 0  ;;  %s10442_s7 = smov (!%p33_p0, %s35_s7), %s4783_s27 }
  0x18   : > { %9289 = sst [smem:[#allocation25_spill]] %s10440_s6  ;;  %s40_s9 = ssub.s32 %s4779_s26, %s10440_s6 }
  0x19   : > { %p4902_p3 = por %p52_p2, %p51_p1  ;;  %p37_p4 = scmp.ge.s32.totalorder %s10442_s7, 2 }
  0x1a   : > { %p57_p5 = scmp.ne.s32.totalorder %s4763_s22, %s4759_s21  ;;  %p4907_p6 = scmp.eq.s32.totalorder %s4095_s29, 0 }
  0x1b   : > { %s9290_s10 = scalar_select %p4902_p3, 1, 0 }
  0x1c   : > { %s9291_s11 = scalar_select %p4907_p6, 1, 0 }
  0x1d   : > { %s154_s12 = sadd.s32 1, %s4755_s20  ;;  %s10444_s7 = smov (%p37_p4, %s10442_s7), 0 }
  0x1e   : > { %9292 = sst [smem:[#allocation26_spill]] %s10444_s7  ;;  %p4916_p7 = por %p4907_p6, %p57_p5 }
  0x1f   : > { %p164_p8 = scmp.ne.s32.totalorder %s4755_s20, %s4751_s19  ;;  %s39_s14 = ssub.s32 %s4783_s27, %s10444_s7 }
  0x20   : > { %s9293_s13 = scalar_select %p4916_p7, 1, 0 }
  0x21   : > { %p165_p9 = scmp.eq.s32.totalorder %s4095_s29, 7  ;;  %s41_s15 = sor.u32 %s40_s9, %s39_s14 }
  0x22   : > { %p152_p10 = scmp.eq.s32.totalorder %s39_s14, 0  ;;  %p42_p11 = scmp.eq.s32.totalorder %s41_s15, 0 }
  0x23   : > { %p4924_p12 = por %p165_p9, %p164_p8  ;;  %p170_p13 = scmp.ne.s32.totalorder %s4751_s19, %s4747_s18 }
  0x24   : > { %s4929_s17 = scalar_select %p152_p10, %s4755_s20, %s154_s12  }
  0x25   : > { %s9294_s16 = scalar_select %p4924_p12, 1, 0 }
  0x26   : > { %9296 = sst [smem:[#allocation28_spill]] %s4929_s17  ;;  %p171_p0 = scmp.eq.s32.totalorder %s4096_s30, 7 }
  0x27   : > { %9295 = sst [smem:[#allocation27_spill]] %s9294_s16  ;;  %p4097_p1 = scmp.ge.s32.totalorder %s4787_s28, 1 }
  0x28   : > { %s4932_s21 = scalar_select %p42_p11, %s4767_s23, %s44_s8  }
  0x29   : > { %p178_p2 = scmp.lt.s32.totalorder %s4787_s28, 9  ;;  %p4938_p4 = por %p171_p0, %p170_p13 }
  0x2a   : > { %9297 = sst [smem:[#allocation29_spill]] %s4932_s21  ;;  %s4789_s9 = smov [#allocation7]  }
  0x2b   : > { %s9298_s6 = scalar_select %p4938_p4, 1, 0 }
  0x2c   : > { %p4942_p5 = pnand %p4097_p1, %p178_p2  ;;  %s191_s14 = sshll.u32 %s4789_s9, 4  ;;  %s192_s14 = int_to_ptr.vmem [resolvable:$true] %s191_s14 }
  0x2d   : > { %9299 = sst [smem:[#allocation30_spill]] %s9298_s6  ;;  %s4790_s8 = smov [#allocation9]  }
  0x2e   : > { %s9300_s29 = scalar_select %p4942_p5, 1, 0 }
  0x2f   : > { %p4440_p8 = pneg %p4942_p5  ;;  %s202_s12 = sshll.u32 %s4790_s8, 4  ;;  %s203_s12 = int_to_ptr.vmem [resolvable:$true] %s202_s12 }
  0x30   : > { %s4791_s15 = smov [#allocation10]   ;;  %s4592_s9 = scalar_lea.vmem %s192_s14, 96 }
  0x31   : > { %p4950_p9 = pnand %p4440_p8, %p4907_p6  ;;  %s212_s7 = sshll.u32 %s4791_s15, 4  ;;  %s4954_s7 = int_to_ptr.vmem [resolvable:$true] %s212_s7 }
  0x32   : > { %p4593_p11 = scmp.ne.s32.totalorder %s192_s14, %s4592_s9  ;;  %p4600_p1 = scmp.lt.s32.totalorder %s192_s14, %s192_s14 }
  0x33   : > { %p4583_p10 = pneg %p4950_p9  ;;  %p4601_p2 = scmp.lt.s32.totalorder %s4592_s9, %s4592_s9 }
  0x35   : > { %p4595_p13 = pnand %p4593_p11, %p4583_p10  ;;  %p4602_p8 = por %p4601_p2, %p4600_p1 }
  0x37   : > { %p4596_p0 = pneg %p4595_p13 }
  0x39   : > { %p4603_p4 = pnand %p4602_p8, %p4596_p0 }
  0x3b   : > { %4606 = shalt.err (!%p4603_p4)
}
  0x3c   : > { %s9302_s1 = sld [smem:[#allocation100_spill]]  ;;  %s4618_s15 = scalar_lea.vmem %s203_s12, 96 }
  0x3d   : > { %p4619_p12 = scmp.ne.s32.totalorder %s203_s12, %s4618_s15  ;;  %p4626_p11 = scmp.lt.s32.totalorder %s203_s12, %s203_s12 }
  0x3e   : > { %p4627_p13 = scmp.lt.s32.totalorder %s4618_s15, %s4618_s15 }
  0x3f   : > { %p4621_p6 = pnand %p4619_p12, %p4583_p10 }
  0x40   : > { %p4628_p5 = por %p4627_p13, %p4626_p11 }
  0x41   : > { %p4622_p7 = pneg %p4621_p6 }
  0x42   : > { %4443 = dma.hbm_to_vmem [thread:$0]  (!%p4950_p9), %s9302_s1, 96, %s192_s14, [#allocation8]  }
  0x43   : > { %p4629_p3 = pnand %p4628_p5, %p4622_p7 }
  0x45   : > { %4632 = shalt.err (!%p4629_p3)
}
  0x46   : > { %s9303_s2 = sld [smem:[#allocation101_spill]]  ;;  %s4644_s21 = scalar_lea.vmem %s4954_s7, 12288 }
  0x47   : > { %p4645_p4 = scmp.ne.s32.totalorder %s4954_s7, %s4644_s21  ;;  %p4652_p0 = scmp.lt.s32.totalorder %s4954_s7, %s4954_s7 }
  0x48   : > { %p4653_p7 = scmp.lt.s32.totalorder %s4644_s21, %s4644_s21 }
  0x49   : > { %p4647_p6 = pnand %p4645_p4, %p4583_p10 }
  0x4a   : > { %p4654_p3 = por %p4653_p7, %p4652_p0 }
  0x4b   : > { %p4648_p12 = pneg %p4647_p6 }
  0x4c   : > { %4446 = dma.hbm_to_vmem [thread:$0]  (!%p4950_p9), %s9303_s2, 96, %s203_s12, [#allocation8]  }
  0x4d   : > { %p4655_p5 = pnand %p4654_p3, %p4648_p12 }
  0x4f   : > { %4658 = shalt.err (!%p4655_p5)
}
  0x50   : > { %s4792_s14 = smov 128   ;;  %s4793_s17 = smov 8  }
  0x51   : > { %s9304_s3 = sld [smem:[#allocation102_spill]]  ;;  %p4101_p1 = scmp.ge.s32.totalorder %s4787_s28, 8 }
  0x52   : > { %p9305_p10 = scmp.ne.s32.totalorder (!%p4101_p1), %s9290_s10, 0 }
  0x53   : > { %225 = sbr.rel (%p4101_p1) target bundleno = 119 (0x77), region = 32 }
  0x57   : > { %4449 = dma.hbm_to_vmem [thread:$0]  (!%p4950_p9), %s9304_s3, 12288, %s4954_s7, [#allocation11], %s4792_s14, %s4792_s14, %s4793_s17  }
  0x58   : > { %228 = sbr.rel (!%p9305_p10) target bundleno = 119 (0x77), region = 36 }
  0x5d   : > { %s229_s12 = sand.u32 1, %s4767_s23   ;;  %s4102_s9 = sshll.u32 %s4783_s27, 3 }
  0x5e   : > { %s4421_s21 = smul.u32 384, %s229_s12  ;;  %s4103_s1 = sshll.u32 %s4779_s26, 1 }
  0x5f   : > { %s236_s2 = ssub.s32 12, %s4102_s9  ;;  %s240_s30 = ssub.s32 7, %s4103_s1 }
  0x60   : > { %p237_p2 = scmp.lt.s32.totalorder %s236_s2, 8  ;;  %p241_p8 = scmp.lt.s32.totalorder %s240_s30, 2 }
  0x61   : > { %s4993_s15 = scalar_lea.sflag [#allocation5], %s229_s12  ;;  %s233_s10 = scalar_lea.vmem [#allocation4], %s4421_s21 }
  0x62   : > { %s10446_s2 = smov (!%p237_p2, %s236_s2), 8  ;;  %s10448_s30 = smov (!%p241_p8, %s240_s30), 2 }
  0x63   : > { %s4104_s8 = sshll.u32 %s10446_s2, 6 }
  0x64   : > { %s243_s7 = smul.u32 %s4104_s8, %s10448_s30 }
  0x66   : > { %s244_s14 = smul.u32 6, %s243_s7 }
  0x68   : > { %s246_s17 = ssub.s32 6144, %s244_s14 }
  0x69   : > { %247 = vsyncadd %s4993_s15, %s246_s17  ;;  %p4996_p9 = scmp.ne.s32.totalorder %s244_s14, 0  ;;  %s4422_s9 = smul.u32 12, %s4779_s26 }
  0x6a   : > { %s4423_s1 = smul.u32 336, %s4783_s27  ;;  %s260_s23 = sld [smem:[#allocation0]]  }
  0x6b   : > { %s254_s20 = smul.u32 24, %s10448_s30  ;;  %s268_s6 = sshll.u32 %s233_s10, 4  ;;  %s269_s6 = int_to_ptr.vmem [resolvable:$true] %s268_s6 }
  0x6c   : > { %s251_s18 = sadd.s32 %s4423_s1, %s4422_s9  ;;  %s4794_s14 = smov 2688  }
  0x6d   : > { %s4108_s8 = sshll.u32 %s251_s18, 6  ;;  %s255_s7 = smul.u32 %s254_s20, %s10446_s2 }
  0x6e   : > { %s253_s21 = scalar_lea.hbm %s9164_s0, %s4108_s8  ;;  %275 = sst [smem:[#allocation14]] %s4794_s14 }
  0x6f   : > { %s270_s17 = sshll.u32 %s255_s7, 4  ;;  %s4795_s26 = smov 768  }
  0x70   : > { %s4109_s5 = sshll.u32 %s260_s23, 26  ;;  %277 = sst [smem:[#allocation14 + $0x1]] %s4795_s26 }
  0x71   : > { %s4110_s16 = sadd.s32 134217728, %s4109_s5  ;;  %279 = sst [smem:[#allocation14 + $0x2]] %s10448_s30 }
  0x72   : > { %s4796_s27 = smov 384   ;;  %s4797_s10 = smov 24  }
  0x73   : > { %281 = sst [smem:[#allocation14 + $0x3]] %s4796_s27  ;;  %s4798_s2 = smov 131072  }
  0x74   : > { %283 = sst [smem:[#allocation14 + $0x4]] %s4796_s27 }
  0x75   : > { %285 = sst [smem:[#allocation14 + $0x5]] %s4797_s10 }
  0x76   : > { %287 = dma.general (%p4996_p9), %s253_s21, %s270_s17, %s269_s6, %s4993_s15, %s4798_s2, [#allocation14], %s4110_s16, 0  }
  0x77 PF: > { %p9307_p11 = scmp.ne.s32.totalorder %s9300_s29, 0 }
  0x78   : > { %s295_s18 = sand.u32 (!%p9307_p11), 1, %s4763_s22   ;;  %p9308_p13 = scmp.ne.s32.totalorder (!%p9307_p11), %s9293_s13, 0 }
  0x79   : > { %293 = sbr.rel (%p9307_p11) target bundleno = 1204 (0x4b4), region = 40  ;;  %s296_s20 = scalar_lea.sflag (!%p9307_p11), [#allocation5], %s295_s18 }
  0x7a   : > { %s4424_s5 = smul.u32 (!%p9307_p11), 384, %s295_s18 }
  0x7c   : > { %s5011_s23 = scalar_lea.vmem (!%p9307_p11), [#allocation4], %s4424_s5 }
  0x7e   : > { %4730 = dma.done.wait (%p9308_p13), %s296_s20, 6144  }
  0x7f   : > { %4732 = vsyncadd (%p9308_p13), %s296_s20, 4294961152  ;;  %p9309_p4 = scmp.ne.s32.totalorder %s9291_s11, 0 }
  0x81   : > { %4734 = dma.done.wait (%p9309_p4), [#allocation8], 192  }
  0x82   : > { %4736 = vsyncadd (%p9309_p4), [#allocation8], 4294967104 }
  0x83   : > { %4738 = dma.done.wait (%p9309_p4), [#allocation11], 12288  }
  0x84   : > { %4740 = vsyncadd (%p9309_p4), [#allocation11], 4294955008  ;;  %s335_s3 = sand.u32 1, %s4751_s19   ;;  %p4116_p6 = scmp.ne.s32.totalorder %s4771_s24, 0 }
  0x85   : > { %s5028_s26 = sshll.u32 %s335_s3, 3 }
  0x86   : > { %s337_s27 = scalar_lea.vmem [#allocation12], %s5028_s26  ;;  %355 = sbr.rel (%p4116_p6) target bundleno = 146 (0x92), region = 60 }
  0x8b   : > { %v4799_v0 = vmov 0.0  }
  0x8c   : > { %356 = vst [vmem:[#allocation2 + $0x28] sm:$0xff] %v4799_v0  ;;  %357 = vst [vmem:[#allocation2 + $0x10] sm:$0xff] %v4799_v0 }
  0x8d   : > { %358 = vst [vmem:[#allocation2 + $0x8] sm:$0xff] %v4799_v0  ;;  %359 = vst [vmem:[#allocation2] sm:$0xff] %v4799_v0 }
  0x8e   : > { %360 = vst [vmem:[#allocation2 + $0x18] sm:$0xff] %v4799_v0  ;;  %361 = vst [vmem:[#allocation2 + $0x20] sm:$0xff] %v4799_v0 }
  0x8f   : > { %362 = vst [vmem:[#allocation3] sm:$0xff] %v4799_v0  ;;  %363 = vst [vmem:[#allocation3 + $0x8] sm:$0xff] %v4799_v0 }
  0x90   : > { %364 = vst [vmem:[#allocation3 + $0x20] sm:$0xff] %v4799_v0  ;;  %365 = vst [vmem:[#allocation3 + $0x18] sm:$0xff] %v4799_v0 }
  0x91   : > { %366 = vst [vmem:[#allocation3 + $0x28] sm:$0xff] %v4799_v0  ;;  %367 = vst [vmem:[#allocation3 + $0x10] sm:$0xff] %v4799_v0 }
  0x92 PF: > { %p4117_p12 = scmp.eq.s32.totalorder %s4771_s24, 3 }
  0x94   : > { %371 = sbr.rel (%p4117_p12) target bundleno = 534 (0x216), region = 64 }
  0x99   : > { %v5034_v1 = vld [vmem:[%s5011_s23] sm:$0xff]  ;;  %v5037_v2 = vld [vmem:[%s5011_s23 + $0x8] sm:$0xff]  ;;  %v5040_v3 = vld [vmem:[%s5011_s23 + $0x10] sm:$0xff]  ;;  %vm9212_vm0 = vcmask 1041409   ;;  %vm9211_vm1 = vcmask 1042434   ;;  %vm9210_vm2 = vcmask 1043459  }
  0x9a   : > { %v5043_v4 = vld [vmem:[%s5011_s23 + $0x18] sm:$0xff]  ;;  %v5046_v5 = vld [vmem:[%s5011_s23 + $0x20] sm:$0xff]  ;;  %v5049_v6 = vld [vmem:[%s5011_s23 + $0x28] sm:$0xff]  ;;  %v426_v7 = vunpack.c.l.bf16 %v5034_v1  ;;  %v427_v8 = vunpack.c.h.bf16 %v5034_v1  ;;  %v428_v12 = vunpack.c.l.bf16 %v5037_v2  ;;  %v429_v13 = vunpack.c.h.bf16 %v5037_v2 }
  0x9b   : > { %v5054_v9 = vld [vmem:[%s5011_s23 + $0x30] sm:$0xff]  ;;  %v5057_v10 = vld [vmem:[%s5011_s23 + $0x38] sm:$0xff]  ;;  %v5060_v11 = vld [vmem:[%s5011_s23 + $0x40] sm:$0xff]  ;;  %v432_v18 = vunpack.c.l.bf16 %v5043_v4  ;;  %v433_v19 = vunpack.c.h.bf16 %v5043_v4  ;;  %v434_v20 = vunpack.c.l.bf16 %v5046_v5  ;;  %v9319_v21 = vunpack.c.h.bf16 %v5046_v5 }
  0x9c   : > { %v5067_v16 = vld [vmem:[%s5011_s23 + $0x48] sm:$0xff]  ;;  %v5070_v17 = vld [vmem:[%s5011_s23 + $0x50] sm:$0xff]  ;;  %v5077_v22 = vld [vmem:[%s5011_s23 + $0x58] sm:$0xff]  ;;  %v9320_v33 = vunpack.c.l.bf16 %v5040_v3  ;;  %v9321_v14 = vunpack.c.l.bf16 %v5049_v6  ;;  %v9322_v1 = vunpack.c.h.bf16 %v5040_v3  ;;  %v9323_v4 = vunpack.c.h.bf16 %v5049_v6 }
  0x9d   : > { %v5080_v23 = vld [vmem:[%s5011_s23 + $0x60] sm:$0xff]  ;;  %v5087_v28 = vld [vmem:[%s5011_s23 + $0x68] sm:$0xff]  ;;  %v5090_v29 = vld [vmem:[%s5011_s23 + $0x70] sm:$0xff]  ;;  %v522_v25 = vadd.f32 %v432_v18, %v426_v7  ;;  %v529_v27 = vadd.f32 %v433_v19, %v427_v8  ;;  %v536_v32 = vadd.f32 %v434_v20, %v428_v12  ;;  %v543_v30 = vadd.f32 %v9319_v21, %v429_v13 }
  0x9e   : > { %v5097_v34 = vld [vmem:[%s5011_s23 + $0x78] sm:$0xff]  ;;  %v5100_v35 = vld [vmem:[%s5011_s23 + $0x80] sm:$0xff]  ;;  %v5107_v40 = vld [vmem:[%s5011_s23 + $0x88] sm:$0xff]  ;;  %v550_v7 = vadd.f32 %v9321_v14, %v9320_v33  ;;  %v557_v8 = vadd.f32 %v9323_v4, %v9322_v1  ;;  %v9324_v18 = vunpack.c.l.bf16 %v5054_v9  ;;  %v9325_v19 = vunpack.c.l.bf16 %v5067_v16 }
  0x9f   : > { %v5110_v41 = vld [vmem:[%s5011_s23 + $0x90] sm:$0xff]  ;;  %v5117_v46 = vld [vmem:[%s5011_s23 + $0x98] sm:$0xff]  ;;  %v5120_v47 = vld [vmem:[%s5011_s23 + $0xa0] sm:$0xff]  ;;  %v9326_v2 = vunpack.c.h.bf16 %v5054_v9  ;;  %v9327_v5 = vunpack.c.h.bf16 %v5067_v16  ;;  %v523_v20 = vrot.slane %v522_v25, 4  ;;  %v530_v21 = vrot.slane %v529_v27, 4 }
  0xa0   : > { %v5127_v52 = vld [vmem:[%s5011_s23 + $0xa8] sm:$0xff]  ;;  %v5130_v53 = vld [vmem:[%s5011_s23 + $0xb0] sm:$0xff]  ;;  %v5137_v58 = vld [vmem:[%s5011_s23 + $0xb8] sm:$0xff]  ;;  %v564_v12 = vadd.f32 %v9325_v19, %v9324_v18  ;;  %v537_v24 = vrot.slane %v536_v32, 4  ;;  %v544_v44 = vrot.slane %v543_v30, 4  ;;  %v551_v14 = vrot.slane %v550_v7, 4 }
  0xa1   : > { %v5140_v59 = vld [vmem:[%s5011_s23 + $0xc0] sm:$0xff]  ;;  %v5147_v0 = vld [vmem:[%s5011_s23 + $0xc8] sm:$0xff]  ;;  %v5150_v51 = vld [vmem:[%s5011_s23 + $0xd0] sm:$0xff]  ;;  %v571_v13 = vadd.f32 %v9327_v5, %v9326_v2  ;;  %v558_v33 = vrot.slane %v557_v8, 4  ;;  %v524_v6 = vadd.f32 %v523_v20, %v522_v25  ;;  %v531_v1 = vadd.f32 %v530_v21, %v529_v27 }
  0xa2   : > { %v5157_v61 = vld [vmem:[%s5011_s23 + $0xd8] sm:$0xff]  ;;  %v5160_v56 = vld [vmem:[%s5011_s23 + $0xe0] sm:$0xff]  ;;  %v5167_v57 = vld [vmem:[%s5011_s23 + $0xe8] sm:$0xff]  ;;  %v565_v3 = vrot.slane %v564_v12, 4  ;;  %v538_v4 = vadd.f32 %v537_v24, %v536_v32  ;;  %vm9209_vm3 = vcmask 1044484   ;;  %vm9208_vm4 = vcmask 1045509  }
  0xa3   : > { %v5170_v55 = vld [vmem:[%s5011_s23 + $0xf0] sm:$0xff]  ;;  %v5177_v62 = vld [vmem:[%s5011_s23 + $0xf8] sm:$0xff]  ;;  %v5180_v54 = vld [vmem:[%s5011_s23 + $0x100] sm:$0xff]  ;;  %v572_v26 = vrot.slane %v571_v13, 4  ;;  %v559_v18 = vadd.f32 %v558_v33, %v557_v8  ;;  %v532_v16 = vrot.slane %v531_v1, 2  ;;  %vm9207_vm5 = vcmask 1046534  }
  0xa4   : > { %v5187_v60 = vld [vmem:[%s5011_s23 + $0x108] sm:$0xff]  ;;  %v5190_v43 = vld [vmem:[%s5011_s23 + $0x110] sm:$0xff]  ;;  %v5197_v50 = vld [vmem:[%s5011_s23 + $0x118] sm:$0xff]  ;;  %v566_v19 = vadd.f32 %v565_v3, %v564_v12  ;;  %v539_v2 = vrot.slane %v538_v4, 2  ;;  %vm9206_vm6 = vcmask 1047559  }
  0xa5   : > { %v5200_v42 = vld [vmem:[%s5011_s23 + $0x120] sm:$0xff]  ;;  %v5207_v63 = vld [vmem:[%s5011_s23 + $0x128] sm:$0xff]  ;;  %v5210_v39 = vld [vmem:[%s5011_s23 + $0x130] sm:$0xff]  ;;  %v573_v9 = vadd.f32 %v572_v26, %v571_v13  ;;  %v533_v25 = vadd.f32 %v532_v16, %v531_v1  ;;  %v9334_v1 = vunpack.c.l.bf16 %v5070_v17  ;;  %v9338_v16 = vunpack.c.l.bf16 %v5077_v22 }
  0xa6   : > { %9310 = vst [vmem:[#allocation31_spill] sm:$0xff] %v5207_v63  ;;  %9311 = vst [vmem:[#allocation32_spill] sm:$0xff] %v5210_v39  ;;  %v5217_v49 = vld [vmem:[%s5011_s23 + $0x138] sm:$0xff]  ;;  %v5220_v38 = vld [vmem:[%s5011_s23 + $0x140] sm:$0xff]  ;;  %v540_v20 = vadd.f32 %v539_v2, %v538_v4 }
  0xa7   : > { %9312 = vst [vmem:[#allocation33_spill] sm:$0xff] %v5220_v38  ;;  %v5227_v48 = vld [vmem:[%s5011_s23 + $0x148] sm:$0xff]  ;;  %v5230_v37 = vld [vmem:[%s5011_s23 + $0x150] sm:$0xff]  ;;  %v5237_v36 = vld [vmem:[%s5011_s23 + $0x158] sm:$0xff]  ;;  %v574_v39 = vrot.slane %v573_v9, 2  ;;  %v534_v26 = vrot.slane %v533_v25, 1 }
  0xa8   : > { %9313 = vst [vmem:[#allocation34_spill] sm:$0xff] %v5227_v48  ;;  %9314 = vst [vmem:[#allocation35_spill] sm:$0xff] %v5230_v37  ;;  %v5240_v45 = vld [vmem:[%s5011_s23 + $0x160] sm:$0xff]  ;;  %v5247_v15 = vld [vmem:[%s5011_s23 + $0x168] sm:$0xff]  ;;  %v560_v37 = vrot.slane %v559_v18, 2  ;;  %v567_v48 = vrot.slane %v566_v19, 2 }
  0xa9   : > { %9315 = vst [vmem:[#allocation36_spill] sm:$0xff] %v5237_v36  ;;  %9316 = vst [vmem:[#allocation37_spill] sm:$0xff] %v5240_v45  ;;  %v5250_v31 = vld [vmem:[%s5011_s23 + $0x170] sm:$0xff]  ;;  %v545_v45 = vadd.f32 %v544_v44, %v543_v30  ;;  %v525_v36 = vrot.slane %v524_v6, 2  ;;  %v5301_v38 = vld [vmem:[%s5011_s23 + $0x178] sm:$0xff]  ;;  %v575_v44 = vadd.f32 %v574_v39, %v573_v9  ;;  %v541_v8 = vrot.slane %v540_v20, 1 }
  0xaa   : > { %9317 = vst [vmem:[#allocation38_spill] sm:$0xff] %v5247_v15  ;;  %9318 = vst [vmem:[#allocation39_spill] sm:$0xff] %v5250_v31  ;;  %v552_v31 = vadd.f32 %v551_v14, %v550_v7  ;;  %v561_v30 = vadd.f32 %v560_v37, %v559_v18  ;;  %v568_v32 = vadd.f32 %v567_v48, %v566_v19  ;;  %v9333_v48 = vunpack.c.l.bf16 %v5057_v10 }
  0xab   : > { %v546_v5 = vrot.slane %v545_v45, 2  ;;  %v526_v63 = vadd.f32 %v525_v36, %v524_v6  ;;  %v5307_v36 = vadd.f32 %v534_v26, %v533_v25  ;;  %v9336_v18 = vunpack.c.h.bf16 %v5070_v17 }
  0xac   : > { %v553_v15 = vrot.slane %v552_v31, 2  ;;  %v562_v33 = vrot.slane %v561_v30, 1  ;;  %v569_v6 = vrot.slane %v568_v32, 1  ;;  %v578_v4 = vadd.f32 %v9334_v1, %v9333_v48 }
  0xad   : > { %v547_v27 = vadd.f32 %v546_v5, %v545_v45  ;;  %v527_v7 = vrot.slane %v526_v63, 1  ;;  %9328 = vst [vmem:[#allocation40_spill] sm:$0xff] %v5307_v36  ;;  %v576_v45 = vrot.slane %v575_v44, 1  ;;  %v9337_v9 = vunpack.c.l.bf16 %v5060_v11 }
  0xae   : > { %v554_v24 = vadd.f32 %v553_v15, %v552_v31  ;;  %v5309_v15 = vadd.f32 %v541_v8, %v540_v20  ;;  %v5315_v39 = vadd.f32 %v562_v33, %v561_v30  ;;  %v9339_v5 = vunpack.c.h.bf16 %v5060_v11 }
  0xaf   : > { %v548_v12 = vrot.slane %v547_v27, 1  ;;  %v5305_v3 = vadd.f32 %v527_v7, %v526_v63  ;;  %v9335_v63 = vunpack.c.h.bf16 %v5057_v10  ;;  %v592_v2 = vadd.f32 %v9338_v16, %v9337_v9 }
  0xb0   : > { %v555_v14 = vrot.slane %v554_v24, 1  ;;  %9329 = vst [vmem:[#allocation41_spill] sm:$0xff] %v5309_v15  ;;  %9332 = vst [vmem:[#allocation44_spill] sm:$0xff] %v5315_v39  ;;  %v9340_v25 = vunpack.c.h.bf16 %v5077_v22  ;;  %v9343_v10 = vunpack.c.h.bf16 %v5080_v23  ;;  %v9344_v17 = vunpack.c.h.bf16 %v5097_v34 }
  0xb1   : > { %v5311_v31 = vadd.f32 %v548_v12, %v547_v27  ;;  %v585_v19 = vadd.f32 %v9336_v18, %v9335_v63  ;;  %v9341_v27 = vunpack.c.l.bf16 %v5080_v23  ;;  %v9345_v26 = vunpack.c.l.bf16 %v5087_v28 }
  0xb2   : > { %v5313_v37 = vadd.f32 %v555_v14, %v554_v24  ;;  %v599_v20 = vadd.f32 %v9340_v25, %v9339_v5  ;;  %v9342_v24 = vunpack.c.l.bf16 %v5097_v34  ;;  %v613_v7 = vadd.f32 %v9344_v17, %v9343_v10 }
  0xb3   : > { %9330 = vst [vmem:[#allocation42_spill] sm:$0xff] %v5311_v31  ;;  %v9346_v8 = vunpack.c.l.bf16 %v5100_v35  ;;  %v9347_v11 = vunpack.c.h.bf16 %v5087_v28  ;;  %v9348_v22 = vunpack.c.h.bf16 %v5100_v35  ;;  %v579_v33 = vrot.slane %v578_v4, 4 }
  0xb4   : > { %9331 = vst [vmem:[#allocation43_spill] sm:$0xff] %v5313_v37  ;;  %v606_v30 = vadd.f32 %v9342_v24, %v9341_v27  ;;  %v586_v48 = vrot.slane %v585_v19, 4  ;;  %v593_v1 = vrot.slane %v592_v2, 4  ;;  %v600_v63 = vrot.slane %v599_v20, 4 }
  0xb5   : > { %v620_v12 = vadd.f32 %v9346_v8, %v9345_v26  ;;  %v627_v14 = vadd.f32 %v9348_v22, %v9347_v11  ;;  %v614_v9 = vrot.slane %v613_v7, 4  ;;  %v580_v34 = vadd.f32 %v579_v33, %v578_v4 }
  0xb6   : > { %v607_v18 = vrot.slane %v606_v30, 4  ;;  %v587_v5 = vadd.f32 %v586_v48, %v585_v19  ;;  %v594_v25 = vadd.f32 %v593_v1, %v592_v2  ;;  %v601_v27 = vadd.f32 %v600_v63, %v599_v20 }
  0xb7   : > { %v621_v23 = vrot.slane %v620_v12, 4  ;;  %v628_v16 = vrot.slane %v627_v14, 4  ;;  %v615_v10 = vadd.f32 %v614_v9, %v613_v7  ;;  %v581_v28 = vrot.slane %v580_v34, 2 }
  0xb8   : > { %v608_v24 = vadd.f32 %v607_v18, %v606_v30  ;;  %v588_v8 = vrot.slane %v587_v5, 2  ;;  %v595_v35 = vrot.slane %v594_v25, 2  ;;  %v602_v11 = vrot.slane %v601_v27, 2 }
  0xb9   : > { %v622_v17 = vadd.f32 %v621_v23, %v620_v12  ;;  %v629_v26 = vadd.f32 %v628_v16, %v627_v14  ;;  %v616_v21 = vrot.slane %v615_v10, 2  ;;  %v582_v37 = vadd.f32 %v581_v28, %v580_v34 }
  0xba   : > { %v609_v22 = vrot.slane %v608_v24, 2  ;;  %v589_v31 = vadd.f32 %v588_v8, %v587_v5  ;;  %v596_v15 = vadd.f32 %v595_v35, %v594_v25  ;;  %v603_v36 = vadd.f32 %v602_v11, %v601_v27 }
  0xbb   : > { %v623_v13 = vrot.slane %v622_v17, 2  ;;  %v630_v39 = vrot.slane %v629_v26, 2  ;;  %v617_v19 = vadd.f32 %v616_v21, %v615_v10  ;;  %v583_v30 = vrot.slane %v582_v37, 1 }
  0xbc   : > { %v610_v4 = vadd.f32 %v609_v22, %v608_v24  ;;  %v590_v7 = vrot.slane %v589_v31, 1  ;;  %v597_v12 = vrot.slane %v596_v15, 1  ;;  %v604_v14 = vrot.slane %v603_v36, 1 }
  0xbd   : > { %v624_v2 = vadd.f32 %v623_v13, %v622_v17  ;;  %v631_v20 = vadd.f32 %v630_v39, %v629_v26  ;;  %v5349_v33 = vadd.f32 %v569_v6, %v568_v32  ;;  %v5351_v48 = vadd.f32 %v576_v45, %v575_v44 }
  0xbe   : > { %v611_v1 = vrot.slane %v610_v4, 1  ;;  %v618_v63 = vrot.slane %v617_v19, 1  ;;  %v5353_v18 = vadd.f32 %v583_v30, %v582_v37  ;;  %v5355_v9 = vadd.f32 %v590_v7, %v589_v31 }
  0xbf   : > { %v625_v23 = vrot.slane %v624_v2, 1  ;;  %v632_v16 = vrot.slane %v631_v20, 1  ;;  %v5357_v34 = vadd.f32 %v597_v12, %v596_v15  ;;  %v5359_v13 = vadd.f32 %v604_v14, %v603_v36 }
  0xc0   : > { %v5361_v21 = vadd.f32 %v611_v1, %v610_v4  ;;  %v5363_v39 = vadd.f32 %v618_v63, %v617_v19  ;;  %v9349_v32 = vunpack.c.l.bf16 %v5090_v29  ;;  %v9350_v44 = vunpack.c.l.bf16 %v5107_v40 }
  0xc1   : > { %v9351_v45 = vunpack.c.h.bf16 %v5090_v29  ;;  %v9352_v31 = vunpack.c.h.bf16 %v5107_v40  ;;  %v9353_v5 = vunpack.c.l.bf16 %v5110_v41  ;;  %v9354_v15 = vunpack.c.l.bf16 %v5127_v52 }
  0xc2   : > { %v634_v6 = vadd.f32 %v9350_v44, %v9349_v32  ;;  %v9355_v25 = vunpack.c.h.bf16 %v5110_v41  ;;  %v9356_v27 = vunpack.c.h.bf16 %v5127_v52  ;;  %v9357_v10 = vunpack.c.l.bf16 %v5117_v46 }
  0xc3   : > { %v641_v37 = vadd.f32 %v9352_v31, %v9351_v45  ;;  %v648_v36 = vadd.f32 %v9354_v15, %v9353_v5  ;;  %v9358_v17 = vunpack.c.l.bf16 %v5130_v53  ;;  %v9359_v29 = vunpack.c.h.bf16 %v5117_v46 }
  0xc4   : > { %v655_v24 = vadd.f32 %v9356_v27, %v9355_v25  ;;  %v9360_v40 = vunpack.c.h.bf16 %v5130_v53  ;;  %v9361_v8 = vunpack.c.l.bf16 %v5120_v47  ;;  %v9362_v35 = vunpack.c.l.bf16 %v5137_v58 }
  0xc5   : > { %v662_v26 = vadd.f32 %v9358_v17, %v9357_v10  ;;  %v9363_v41 = vunpack.c.h.bf16 %v5120_v47  ;;  %v9364_v52 = vunpack.c.h.bf16 %v5137_v58  ;;  %v635_v4 = vrot.slane %v634_v6, 4 }
  0xc6   : > { %v669_v28 = vadd.f32 %v9360_v40, %v9359_v29  ;;  %v676_v11 = vadd.f32 %v9362_v35, %v9361_v8  ;;  %v642_v19 = vrot.slane %v641_v37, 4  ;;  %v649_v30 = vrot.slane %v648_v36, 4 }
  0xc7   : > { %v683_v22 = vadd.f32 %v9364_v52, %v9363_v41  ;;  %v656_v7 = vrot.slane %v655_v24, 4  ;;  %v663_v12 = vrot.slane %v662_v26, 4  ;;  %v636_v53 = vadd.f32 %v635_v4, %v634_v6 }
  0xc8   : > { %v670_v14 = vrot.slane %v669_v28, 4  ;;  %v677_v46 = vrot.slane %v676_v11, 4  ;;  %v643_v63 = vadd.f32 %v642_v19, %v641_v37  ;;  %v650_v32 = vadd.f32 %v649_v30, %v648_v36 }
  0xc9   : > { %v684_v1 = vrot.slane %v683_v22, 4  ;;  %v657_v44 = vadd.f32 %v656_v7, %v655_v24  ;;  %v664_v45 = vadd.f32 %v663_v12, %v662_v26  ;;  %v637_v47 = vrot.slane %v636_v53, 2 }
  0xca   : > { %v671_v31 = vadd.f32 %v670_v14, %v669_v28  ;;  %v678_v5 = vadd.f32 %v677_v46, %v676_v11  ;;  %v644_v25 = vrot.slane %v643_v63, 2  ;;  %v651_v58 = vrot.slane %v650_v32, 2 }
  0xcb   : > { %v685_v15 = vadd.f32 %v684_v1, %v683_v22  ;;  %v658_v27 = vrot.slane %v657_v44, 2  ;;  %v665_v10 = vrot.slane %v664_v45, 2  ;;  %v638_v8 = vadd.f32 %v637_v47, %v636_v53 }
  0xcc   : > { %v672_v17 = vrot.slane %v671_v31, 2  ;;  %v679_v29 = vrot.slane %v678_v5, 2  ;;  %v645_v35 = vadd.f32 %v644_v25, %v643_v63  ;;  %v652_v41 = vadd.f32 %v651_v58, %v650_v32 }
  0xcd   : > { %v686_v40 = vrot.slane %v685_v15, 2  ;;  %v659_v52 = vadd.f32 %v658_v27, %v657_v44  ;;  %v666_v6 = vadd.f32 %v665_v10, %v664_v45  ;;  %v639_v26 = vrot.slane %v638_v8, 1 }
  0xce   : > { %v673_v37 = vadd.f32 %v672_v17, %v671_v31  ;;  %v680_v36 = vadd.f32 %v679_v29, %v678_v5  ;;  %v646_v28 = vrot.slane %v645_v35, 1  ;;  %v653_v11 = vrot.slane %v652_v41, 1 }
  0xcf   : > { %v687_v24 = vadd.f32 %v686_v40, %v685_v15  ;;  %v660_v22 = vrot.slane %v659_v52, 1  ;;  %v5397_v4 = vadd.f32 %v625_v23, %v624_v2  ;;  %v5399_v19 = vadd.f32 %v632_v16, %v631_v20 }
  0xd0   : > { %v667_v30 = vrot.slane %v666_v6, 1  ;;  %v674_v7 = vrot.slane %v673_v37, 1  ;;  %v5401_v12 = vadd.f32 %v639_v26, %v638_v8  ;;  %v5403_v14 = vadd.f32 %v646_v28, %v645_v35 }
  0xd1   : > { %v681_v46 = vrot.slane %v680_v36, 1  ;;  %v688_v1 = vrot.slane %v687_v24, 1  ;;  %v5405_v53 = vadd.f32 %v653_v11, %v652_v41  ;;  %v5407_v63 = vadd.f32 %v660_v22, %v659_v52 }
  0xd2   : > { %v5409_v32 = vadd.f32 %v667_v30, %v666_v6  ;;  %v5411_v44 = vadd.f32 %v674_v7, %v673_v37  ;;  %v9365_v2 = vunpack.c.l.bf16 %v5140_v59  ;;  %v9366_v20 = vunpack.c.l.bf16 %v5157_v61 }
  0xd3   : > { %v9367_v16 = vunpack.c.h.bf16 %v5140_v59  ;;  %v9368_v45 = vunpack.c.h.bf16 %v5157_v61  ;;  %v9369_v5 = vunpack.c.l.bf16 %v5147_v0  ;;  %v9370_v15 = vunpack.c.l.bf16 %v5160_v56 }
  0xd4   : > { %v690_v23 = vadd.f32 %v9366_v20, %v9365_v2  ;;  %v9371_v25 = vunpack.c.h.bf16 %v5147_v0  ;;  %v9372_v58 = vunpack.c.h.bf16 %v5160_v56  ;;  %v9373_v10 = vunpack.c.l.bf16 %v5150_v51 }
  0xd5   : > { %v697_v31 = vadd.f32 %v9368_v45, %v9367_v16  ;;  %v704_v47 = vadd.f32 %v9370_v15, %v9369_v5  ;;  %v9374_v17 = vunpack.c.l.bf16 %v5167_v57  ;;  %v9375_v59 = vunpack.c.h.bf16 %v5150_v51 }
  0xd6   : > { %v711_v27 = vadd.f32 %v9372_v58, %v9371_v25  ;;  %v9376_v61 = vunpack.c.h.bf16 %v5167_v57  ;;  %v9377_v8 = vunpack.c.l.bf16 %v5170_v55  ;;  %v9378_v35 = vunpack.c.l.bf16 %v5187_v60 }
  0xd7   : > { %v718_v29 = vadd.f32 %v9374_v17, %v9373_v10  ;;  %v9379_v0 = vunpack.c.h.bf16 %v5170_v55  ;;  %v9380_v56 = vunpack.c.h.bf16 %v5187_v60  ;;  %v691_v6 = vrot.slane %v690_v23, 4 }
  0xd8   : > { %v725_v40 = vadd.f32 %v9376_v61, %v9375_v59  ;;  %v732_v41 = vadd.f32 %v9378_v35, %v9377_v8  ;;  %v698_v37 = vrot.slane %v697_v31, 4  ;;  %v705_v26 = vrot.slane %v704_v47, 4 }
  0xd9   : > { %v739_v52 = vadd.f32 %v9380_v56, %v9379_v0  ;;  %v712_v28 = vrot.slane %v711_v27, 4  ;;  %v719_v11 = vrot.slane %v718_v29, 4  ;;  %v692_v57 = vadd.f32 %v691_v6, %v690_v23 }
  0xda   : > { %v726_v22 = vrot.slane %v725_v40, 4  ;;  %v733_v51 = vrot.slane %v732_v41, 4  ;;  %v699_v7 = vadd.f32 %v698_v37, %v697_v31  ;;  %v706_v2 = vadd.f32 %v705_v26, %v704_v47 }
  0xdb   : > { %v740_v30 = vrot.slane %v739_v52, 4  ;;  %v713_v20 = vadd.f32 %v712_v28, %v711_v27  ;;  %v720_v16 = vadd.f32 %v719_v11, %v718_v29  ;;  %v693_v55 = vrot.slane %v692_v57, 2 }
  0xdc   : > { %v727_v45 = vadd.f32 %v726_v22, %v725_v40  ;;  %v734_v5 = vadd.f32 %v733_v51, %v732_v41  ;;  %v700_v25 = vrot.slane %v699_v7, 2  ;;  %v707_v60 = vrot.slane %v706_v2, 2 }
  0xdd   : > { %v741_v15 = vadd.f32 %v740_v30, %v739_v52  ;;  %v714_v58 = vrot.slane %v713_v20, 2  ;;  %v721_v10 = vrot.slane %v720_v16, 2  ;;  %v694_v8 = vadd.f32 %v693_v55, %v692_v57 }
  0xde   : > { %v728_v17 = vrot.slane %v727_v45, 2  ;;  %v735_v59 = vrot.slane %v734_v5, 2  ;;  %v701_v35 = vadd.f32 %v700_v25, %v699_v7  ;;  %v708_v0 = vadd.f32 %v707_v60, %v706_v2 }
  0xdf   : > { %v742_v61 = vrot.slane %v741_v15, 2  ;;  %v715_v56 = vadd.f32 %v714_v58, %v713_v20  ;;  %v722_v23 = vadd.f32 %v721_v10, %v720_v16  ;;  %v695_v29 = vrot.slane %v694_v8, 1 }
  0xe0   : > { %v729_v31 = vadd.f32 %v728_v17, %v727_v45  ;;  %v736_v47 = vadd.f32 %v735_v59, %v734_v5  ;;  %v702_v40 = vrot.slane %v701_v35, 1  ;;  %v709_v41 = vrot.slane %v708_v0, 1 }
  0xe1   : > { %v743_v27 = vadd.f32 %v742_v61, %v741_v15  ;;  %v716_v52 = vrot.slane %v715_v56, 1  ;;  %v5445_v6 = vadd.f32 %v681_v46, %v680_v36  ;;  %v5447_v37 = vadd.f32 %v688_v1, %v687_v24 }
  0xe2   : > { %v723_v26 = vrot.slane %v722_v23, 1  ;;  %v730_v28 = vrot.slane %v729_v31, 1  ;;  %v5449_v11 = vadd.f32 %v695_v29, %v694_v8  ;;  %v5451_v22 = vadd.f32 %v702_v40, %v701_v35  ;;  %v9396_v8 = vld [vmem:[#allocation31_spill] sm:$0xff] }
  0xe3   : > { %9381 = vst [vmem:[#allocation45_spill] sm:$0xff] %v5447_v37  ;;  %v737_v51 = vrot.slane %v736_v47, 1  ;;  %v744_v30 = vrot.slane %v743_v27, 1  ;;  %v5453_v57 = vadd.f32 %v709_v41, %v708_v0  ;;  %v5455_v7 = vadd.f32 %v716_v52, %v715_v56  ;;  %v9398_v0 = vld [vmem:[#allocation33_spill] sm:$0xff] }
  0xe4   : > { %v5457_v2 = vadd.f32 %v723_v26, %v722_v23  ;;  %v5459_v20 = vadd.f32 %v730_v28, %v729_v31  ;;  %v9384_v36 = vunpack.c.l.bf16 %v5177_v62  ;;  %v9385_v24 = vunpack.c.l.bf16 %v5190_v43 }
  0xe5   : > { %v9386_v1 = vunpack.c.h.bf16 %v5177_v62  ;;  %v9387_v16 = vunpack.c.h.bf16 %v5190_v43  ;;  %v9388_v5 = vunpack.c.l.bf16 %v5180_v54  ;;  %v9389_v15 = vunpack.c.l.bf16 %v5197_v50 }
  0xe6   : > { %9382 = vst [vmem:[#allocation46_spill] sm:$0xff] %v5457_v2  ;;  %9383 = vst [vmem:[#allocation47_spill] sm:$0xff] %v5459_v20  ;;  %v746_v46 = vadd.f32 %v9385_v24, %v9384_v36  ;;  %v9390_v25 = vunpack.c.h.bf16 %v5180_v54  ;;  %v9391_v60 = vunpack.c.h.bf16 %v5197_v50  ;;  %v9392_v10 = vunpack.c.l.bf16 %v5200_v42 }
  0xe7   : > { %v753_v45 = vadd.f32 %v9387_v16, %v9386_v1  ;;  %v760_v55 = vadd.f32 %v9389_v15, %v9388_v5  ;;  %v9393_v17 = vunpack.c.l.bf16 %v5217_v49  ;;  %v9394_v62 = vunpack.c.h.bf16 %v5200_v42 }
  0xe8   : > { %v767_v58 = vadd.f32 %v9391_v60, %v9390_v25  ;;  %v9395_v43 = vunpack.c.h.bf16 %v5217_v49  ;;  %v9397_v35 = vunpack.c.l.bf16 %v9396_v8  ;;  %v9399_v56 = vunpack.c.l.bf16 %v9398_v0 }
  0xe9   : > { %v774_v59 = vadd.f32 %v9393_v17, %v9392_v10  ;;  %v9400_v54 = vunpack.c.h.bf16 %v9396_v8  ;;  %v9401_v50 = vunpack.c.h.bf16 %v9398_v0  ;;  %v747_v29 = vrot.slane %v746_v46, 4 }
  0xea   : > { %v781_v61 = vadd.f32 %v9395_v43, %v9394_v62  ;;  %v788_v23 = vadd.f32 %v9399_v56, %v9397_v35  ;;  %v754_v40 = vrot.slane %v753_v45, 4  ;;  %v761_v41 = vrot.slane %v760_v55, 4 }
  0xeb   : > { %v795_v31 = vadd.f32 %v9401_v50, %v9400_v54  ;;  %v768_v52 = vrot.slane %v767_v58, 4  ;;  %v775_v26 = vrot.slane %v774_v59, 4  ;;  %v748_v49 = vadd.f32 %v747_v29, %v746_v46 }
  0xec   : > { %v782_v28 = vrot.slane %v781_v61, 4  ;;  %v789_v42 = vrot.slane %v788_v23, 4  ;;  %v755_v24 = vadd.f32 %v754_v40, %v753_v45  ;;  %v762_v1 = vadd.f32 %v761_v41, %v760_v55 }
  0xed   : > { %v796_v36 = vrot.slane %v795_v31, 4  ;;  %v769_v16 = vadd.f32 %v768_v52, %v767_v58  ;;  %v776_v5 = vadd.f32 %v775_v26, %v774_v59  ;;  %v749_v10 = vrot.slane %v748_v49, 2 }
  0xee   : > { %v783_v15 = vadd.f32 %v782_v28, %v781_v61  ;;  %v790_v25 = vadd.f32 %v789_v42, %v788_v23  ;;  %v756_v17 = vrot.slane %v755_v24, 2  ;;  %v763_v62 = vrot.slane %v762_v1, 2 }
  0xef   : > { %v797_v60 = vadd.f32 %v796_v36, %v795_v31  ;;  %v770_v43 = vrot.slane %v769_v16, 2  ;;  %v777_v8 = vrot.slane %v776_v5, 2  ;;  %v750_v54 = vadd.f32 %v749_v10, %v748_v49  ;;  %v9410_v10 = vld [vmem:[#allocation35_spill] sm:$0xff] }
  0xf0   : > { %v784_v35 = vrot.slane %v783_v15, 2  ;;  %v791_v0 = vrot.slane %v790_v25, 2  ;;  %v757_v50 = vadd.f32 %v756_v17, %v755_v24  ;;  %v764_v20 = vadd.f32 %v763_v62, %v762_v1 }
  0xf1   : > { %v798_v56 = vrot.slane %v797_v60, 2  ;;  %v771_v2 = vadd.f32 %v770_v43, %v769_v16  ;;  %v778_v46 = vadd.f32 %v777_v8, %v776_v5  ;;  %v751_v59 = vrot.slane %v750_v54, 1 }
  0xf2   : > { %v785_v45 = vadd.f32 %v784_v35, %v783_v15  ;;  %v5493_v55 = vadd.f32 %v791_v0, %v790_v25  ;;  %v758_v61 = vrot.slane %v757_v50, 1  ;;  %v765_v23 = vrot.slane %v764_v20, 1  ;;  %v9416_v0 = vld [vmem:[#allocation36_spill] sm:$0xff] }
  0xf3   : > { %v5495_v58 = vadd.f32 %v798_v56, %v797_v60  ;;  %v772_v31 = vrot.slane %v771_v2, 1  ;;  %v5497_v29 = vadd.f32 %v737_v51, %v736_v47  ;;  %v5499_v40 = vadd.f32 %v744_v30, %v743_v27  ;;  %v9404_v27 = vld [vmem:[#allocation32_spill] sm:$0xff]  ;;  %v9406_v30 = vld [vmem:[#allocation34_spill] sm:$0xff] }
  0xf4   : > { %v779_v41 = vrot.slane %v778_v46, 1  ;;  %v786_v52 = vrot.slane %v785_v45, 1  ;;  %v5501_v26 = vadd.f32 %v751_v59, %v750_v54  ;;  %v5503_v28 = vadd.f32 %v758_v61, %v757_v50  ;;  %v9418_v54 = vld [vmem:[#allocation39_spill] sm:$0xff] }
  0xf5   : > { %v793_v42 = vrot.slane %v5493_v55, 1  ;;  %v800_v36 = vrot.slane %v5495_v58, 1  ;;  %v5507_v49 = vadd.f32 %v765_v23, %v764_v20  ;;  %v5509_v24 = vadd.f32 %v772_v31, %v771_v2  ;;  %v9412_v20 = vld [vmem:[#allocation38_spill] sm:$0xff]  ;;  %v9422_v23 = vld [vmem:[#allocation37_spill] sm:$0xff] }
  0xf6   : > { %v5511_v1 = vadd.f32 %v779_v41, %v778_v46  ;;  %v5513_v47 = vadd.f32 %v786_v52, %v785_v45  ;;  %v9405_v51 = vunpack.c.l.bf16 %v9404_v27  ;;  %v9407_v16 = vunpack.c.l.bf16 %v9406_v30 }
  0xf7   : > { %9402 = vst [vmem:[#allocation31_spill] sm:$0xff] %v5507_v49  ;;  %9403 = vst [vmem:[#allocation33_spill] sm:$0xff] %v5509_v24  ;;  %v9408_v15 = vunpack.c.h.bf16 %v9404_v27  ;;  %v9409_v25 = vunpack.c.h.bf16 %v9406_v30  ;;  %v9411_v17 = vunpack.c.l.bf16 %v9410_v10  ;;  %v9413_v62 = vunpack.c.l.bf16 %v9412_v20 }
  0xf8   : > { %v802_v5 = vadd.f32 %v9407_v16, %v9405_v51  ;;  %v9414_v43 = vunpack.c.h.bf16 %v9410_v10  ;;  %v9415_v8 = vunpack.c.h.bf16 %v9412_v20  ;;  %v9417_v56 = vunpack.c.l.bf16 %v9416_v0 }
  0xf9   : > { %v809_v60 = vadd.f32 %v9409_v25, %v9408_v15  ;;  %v816_v2 = vadd.f32 %v9413_v62, %v9411_v17  ;;  %v9419_v50 = vunpack.c.l.bf16 %v9418_v54  ;;  %v9420_v45 = vunpack.c.h.bf16 %v9416_v0 }
  0xfa   : > { %v823_v35 = vadd.f32 %v9415_v8, %v9414_v43  ;;  %v9421_v59 = vunpack.c.h.bf16 %v9418_v54  ;;  %v9423_v31 = vunpack.c.l.bf16 %v9422_v23  ;;  %v9424_v41 = vunpack.c.l.bf16 %v5301_v38 }
  0xfb   : > { %v830_v46 = vadd.f32 %v9419_v50, %v9417_v56  ;;  %v9425_v27 = vunpack.c.h.bf16 %v9422_v23  ;;  %v9426_v51 = vunpack.c.h.bf16 %v5301_v38  ;;  %v803_v16 = vrot.slane %v802_v5, 4 }
  0xfc   : > { %v837_v61 = vadd.f32 %v9421_v59, %v9420_v45  ;;  %v844_v52 = vadd.f32 %v9424_v41, %v9423_v31  ;;  %v810_v15 = vrot.slane %v809_v60, 4  ;;  %v817_v25 = vrot.slane %v816_v2, 4 }
  0xfd   : > { %v851_v30 = vadd.f32 %v9426_v51, %v9425_v27  ;;  %v824_v10 = vrot.slane %v823_v35, 4  ;;  %v831_v17 = vrot.slane %v830_v46, 4  ;;  %v804_v8 = vadd.f32 %v803_v16, %v802_v5 }
  0xfe   : > { %v838_v20 = vrot.slane %v837_v61, 4  ;;  %v845_v62 = vrot.slane %v844_v52, 4  ;;  %v811_v0 = vadd.f32 %v810_v15, %v809_v60  ;;  %v818_v56 = vadd.f32 %v817_v25, %v816_v2 }
  0xff   : > { %v852_v43 = vrot.slane %v851_v30, 4  ;;  %v825_v54 = vadd.f32 %v824_v10, %v823_v35  ;;  %v832_v50 = vadd.f32 %v831_v17, %v830_v46  ;;  %v805_v38 = vrot.slane %v804_v8, 2 }
 0x100   : > { %v839_v45 = vadd.f32 %v838_v20, %v837_v61  ;;  %v846_v59 = vadd.f32 %v845_v62, %v844_v52  ;;  %v812_v31 = vrot.slane %v811_v0, 2  ;;  %v819_v41 = vrot.slane %v818_v56, 2 }
 0x101   : > { %v853_v23 = vadd.f32 %v852_v43, %v851_v30  ;;  %v826_v27 = vrot.slane %v825_v54, 2  ;;  %v833_v51 = vrot.slane %v832_v50, 2  ;;  %v806_v5 = vadd.f32 %v805_v38, %v804_v8 }
 0x102   : > { %v840_v24 = vrot.slane %v839_v45, 2  ;;  %v847_v49 = vrot.slane %v846_v59, 2  ;;  %v813_v60 = vadd.f32 %v812_v31, %v811_v0  ;;  %v820_v2 = vadd.f32 %v819_v41, %v818_v56  ;;  %v372_v41 = vld [vmem:[#allocation2 + $0x28] sm:$0xff] }
 0x103   : > { %v854_v37 = vrot.slane %v853_v23, 2  ;;  %v827_v35 = vadd.f32 %v826_v27, %v825_v54  ;;  %v834_v46 = vadd.f32 %v833_v51, %v832_v50  ;;  %v807_v16 = vrot.slane %v806_v5, 1  ;;  %v374_v27 = vld [vmem:[#allocation2 + $0x8] sm:$0xff]  ;;  %v375_v51 = vld [vmem:[#allocation2] sm:$0xff] }
 0x104   : > { %v841_v61 = vadd.f32 %v840_v24, %v839_v45  ;;  %v848_v52 = vadd.f32 %v847_v49, %v846_v59  ;;  %v814_v15 = vrot.slane %v813_v60, 1  ;;  %v821_v25 = vrot.slane %v820_v2, 1  ;;  %v9427_v59 = vld [vmem:[#allocation40_spill] sm:$0xff] }
 0x105   : > { %v855_v30 = vadd.f32 %v854_v37, %v853_v23  ;;  %v828_v10 = vrot.slane %v827_v35, 1  ;;  %v794_v17 = vadd.f32 %v793_v42, %v5493_v55  ;;  %v801_v20 = vadd.f32 %v800_v36, %v5495_v58  ;;  %v9428_v58 = vld [vmem:[#allocation41_spill] sm:$0xff]  ;;  %v9429_v36 = vld [vmem:[#allocation42_spill] sm:$0xff] }
 0x106   : > { %v835_v62 = vrot.slane %v834_v46, 1  ;;  %v842_v43 = vrot.slane %v841_v61, 1  ;;  %v5549_v8 = vadd.f32 %v807_v16, %v806_v5  ;;  %v5551_v0 = vadd.f32 %v814_v15, %v813_v60 }
 0x107   : > { %v849_v56 = vrot.slane %v848_v52, 1  ;;  %v856_v54 = vrot.slane %v855_v30, 1  ;;  %v822_v24 = vadd.f32 %v821_v25, %v820_v2  ;;  %v829_v49 = vadd.f32 %v828_v10, %v827_v35  ;;  %v9430_v2 = vld [vmem:[#allocation43_spill] sm:$0xff] }
 0x108   : > { %v836_v37 = vadd.f32 %v835_v62, %v834_v46  ;;  %v843_v50 = vadd.f32 %v842_v43, %v841_v61  ;;  %v907_v45 = vsel %vm9212_vm0, %v5349_v33, %v5305_v3  ;;  %v920_v55 = vsel %vm9212_vm0, %v5351_v48, %v9427_v59 }
 0x109   : > { %v927_v42 = vsel %vm9212_vm0, %v5353_v18, %v9428_v58  ;;  %v934_v23 = vsel %vm9212_vm0, %v5355_v9, %v9429_v36  ;;  %v909_v38 = vsel %vm9211_vm1, %v5361_v21, %v907_v45  ;;  %v921_v31 = vsel %vm9211_vm1, %v5363_v39, %v920_v55  ;;  %v5645_v36 = vld [vmem:[%s5011_s23 + $0x18] sm:$0xff] }
 0x10a   : > { %v928_v3 = vsel %vm9211_vm1, %v5397_v4, %v927_v42  ;;  %v935_v33 = vsel %vm9211_vm1, %v5399_v19, %v934_v23  ;;  %v911_v48 = vsel %vm9210_vm2, %v5405_v53, %v909_v38  ;;  %v922_v18 = vsel %vm9210_vm2, %v5407_v63, %v921_v31  ;;  %v373_v63 = vld [vmem:[#allocation2 + $0x10] sm:$0xff]  ;;  %v5639_v42 = vld [vmem:[%s5011_s23 + $0x8] sm:$0xff]  ;;  %v5648_v23 = vld [vmem:[%s5011_s23 + $0x20] sm:$0xff] }
 0x10b   : > { %v929_v9 = vsel %vm9210_vm2, %v5409_v32, %v928_v3  ;;  %v936_v21 = vsel %vm9210_vm2, %v5411_v44, %v935_v33  ;;  %v913_v39 = vsel %vm9209_vm3, %v5449_v11, %v911_v48  ;;  %v923_v4 = vsel %vm9209_vm3, %v5451_v22, %v922_v18  ;;  %v5651_v38 = vld [vmem:[%s5011_s23 + $0x28] sm:$0xff]  ;;  %v5654_v31 = vld [vmem:[%s5011_s23 + $0x30] sm:$0xff]  ;;  %v5657_v3 = vld [vmem:[%s5011_s23 + $0x38] sm:$0xff] }
 0x10c   : > { %v930_v19 = vsel %vm9209_vm3, %v5453_v57, %v929_v9  ;;  %v937_v53 = vsel %vm9209_vm3, %v5455_v7, %v936_v21  ;;  %v915_v32 = vsel %vm9208_vm4, %v5497_v29, %v913_v39  ;;  %v924_v44 = vsel %vm9208_vm4, %v5499_v40, %v923_v4  ;;  %v5660_v33 = vld [vmem:[%s5011_s23 + $0x40] sm:$0xff]  ;;  %v5663_v48 = vld [vmem:[%s5011_s23 + $0x48] sm:$0xff]  ;;  %v5666_v18 = vld [vmem:[%s5011_s23 + $0x50] sm:$0xff] }
 0x10d   : > { %v931_v11 = vsel %vm9208_vm4, %v5501_v26, %v930_v19  ;;  %v938_v22 = vsel %vm9208_vm4, %v5503_v28, %v937_v53  ;;  %v917_v57 = vsel %vm9207_vm5, %v5511_v1, %v915_v32  ;;  %v925_v7 = vsel %vm9207_vm5, %v5513_v47, %v924_v44  ;;  %v9431_v1 = vld [vmem:[#allocation44_spill] sm:$0xff]  ;;  %v5669_v9 = vld [vmem:[%s5011_s23 + $0x58] sm:$0xff]  ;;  %v5678_v4 = vld [vmem:[%s5011_s23 + $0x70] sm:$0xff] }
 0x10e   : > { %v932_v5 = vsel %vm9207_vm5, %v794_v17, %v931_v11  ;;  %v939_v29 = vsel %vm9207_vm5, %v801_v20, %v938_v22  ;;  %v919_v40 = vsel %vm9206_vm6, %v822_v24, %v917_v57  ;;  %v926_v60 = vsel %vm9206_vm6, %v829_v49, %v925_v7  ;;  %v9434_v49 = vld [vmem:[#allocation47_spill] sm:$0xff]  ;;  %v5675_v39 = vld [vmem:[%s5011_s23 + $0x68] sm:$0xff]  ;;  %v5704_v22 = vld [vmem:[%s5011_s23 + $0xb0] sm:$0xff] }
 0x10f   : > { %v933_v26 = vsel %vm9206_vm6, %v836_v37, %v932_v5  ;;  %v940_v28 = vsel %vm9206_vm6, %v843_v50, %v939_v29  ;;  %v941_v35 = vsel %vm9212_vm0, %v5357_v34, %v9430_v2  ;;  %v948_v47 = vsel %vm9212_vm0, %v5359_v13, %v9431_v1  ;;  %v9432_v34 = vld [vmem:[#allocation45_spill] sm:$0xff]  ;;  %v9433_v13 = vld [vmem:[#allocation46_spill] sm:$0xff]  ;;  %v5672_v21 = vld [vmem:[%s5011_s23 + $0x60] sm:$0xff] }
 0x110   : > { %v961_v46 = vadd.f32 %v919_v40, %v372_v41  ;;  %v962_v61 = vadd.f32 %v926_v60, %v373_v63  ;;  %v942_v16 = vsel %vm9211_vm1, %v5401_v12, %v941_v35  ;;  %v949_v15 = vsel %vm9211_vm1, %v5403_v14, %v948_v47  ;;  %v376_v14 = vld [vmem:[#allocation2 + $0x18] sm:$0xff]  ;;  %v5684_v53 = vld [vmem:[%s5011_s23 + $0x80] sm:$0xff]  ;;  %v5687_v41 = vld [vmem:[%s5011_s23 + $0x88] sm:$0xff] }
 0x111   : > { %v963_v25 = vadd.f32 %v933_v26, %v374_v27  ;;  %v964_v10 = vadd.f32 %v940_v28, %v375_v51  ;;  %v850_v17 = vadd.f32 %v849_v56, %v848_v52  ;;  %v857_v20 = vadd.f32 %v856_v54, %v855_v30  ;;  %v9435_v52 = vld [vmem:[#allocation31_spill] sm:$0xff]  ;;  %v9436_v56 = vld [vmem:[#allocation33_spill] sm:$0xff] }
 0x112   : > { %v943_v62 = vsel %vm9210_vm2, %v5445_v6, %v942_v16  ;;  %v950_v43 = vsel %vm9210_vm2, %v9432_v34, %v949_v15  ;;  %967 = vst [vmem:[#allocation2 + $0x28] sm:$0xff] %v961_v46  ;;  %968 = vst [vmem:[#allocation2 + $0x10] sm:$0xff] %v962_v61  ;;  %v377_v6 = vld [vmem:[#allocation2 + $0x20] sm:$0xff]  ;;  %v5681_v19 = vld [vmem:[%s5011_s23 + $0x78] sm:$0xff]  ;;  %vm1028_vm8 = vcmp.ne.bf16.partialorder %v5639_v42, 0  ;;  %vm1030_vm10 = vcmp.ne.bf16.partialorder %v5645_v36, 0 }
 0x113   : > { %v944_v24 = vsel %vm9209_vm3, %v9433_v13, %v943_v62  ;;  %v951_v12 = vsel %vm9209_vm3, %v9434_v49, %v950_v43  ;;  %969 = vst [vmem:[#allocation2 + $0x8] sm:$0xff] %v963_v25  ;;  %970 = vst [vmem:[#allocation2] sm:$0xff] %v964_v10  ;;  %v5690_v63 = vld [vmem:[%s5011_s23 + $0x90] sm:$0xff]  ;;  %v5693_v32 = vld [vmem:[%s5011_s23 + $0x98] sm:$0xff]  ;;  %vm1031_vm11 = vcmp.ne.bf16.partialorder %v5648_v23, 0  ;;  %vm1032_vm12 = vcmp.ne.bf16.partialorder %v5651_v38, 0 }
 0x114   : > { %v945_v30 = vsel %vm9208_vm4, %v9435_v52, %v944_v24  ;;  %v952_v54 = vsel %vm9208_vm4, %v9436_v56, %v951_v12  ;;  %v5696_v44 = vld [vmem:[%s5011_s23 + $0xa0] sm:$0xff]  ;;  %v5699_v11 = vld [vmem:[%s5011_s23 + $0xa8] sm:$0xff]  ;;  %v5707_v27 = vld [vmem:[%s5011_s23 + $0xb8] sm:$0xff]  ;;  %v4800_v13 = vmov 0  }
 0x115   : > { %v946_v37 = vsel %vm9207_vm5, %v5549_v8, %v945_v30  ;;  %v953_v50 = vsel %vm9207_vm5, %v5551_v0, %v952_v54  ;;  %v5636_v8 = vld [vmem:[%s5011_s23] sm:$0xff]  ;;  %v5642_v0 = vld [vmem:[%s5011_s23 + $0x10] sm:$0xff]  ;;  %v5713_v57 = vld [vmem:[%s5011_s23 + $0xc8] sm:$0xff]  ;;  %v5831_v49 = vsel %vm1028_vm8, 65537, %v4800_v13  ;;  %v5849_v52 = vsel %vm1032_vm12, 65537, %v4800_v13 }
 0x116   : > { %v947_v45 = vsel %vm9206_vm6, %v850_v17, %v946_v37  ;;  %v954_v59 = vsel %vm9206_vm6, %v857_v20, %v953_v50  ;;  %vm1027_vm7 = vcmp.ne.bf16.partialorder %v5636_v8, 0  ;;  %v5710_v51 = vld [vmem:[%s5011_s23 + $0xc0] sm:$0xff]  ;;  %vm1029_vm9 = vcmp.ne.bf16.partialorder %v5642_v0, 0  ;;  %v5720_v7 = vld [vmem:[%s5011_s23 + $0xd0] sm:$0xff]  ;;  %v5723_v5 = vld [vmem:[%s5011_s23 + $0xd8] sm:$0xff] }
 0x117   : > { %v965_v55 = vadd.f32 %v947_v45, %v376_v14  ;;  %v966_v58 = vadd.f32 %v954_v59, %v377_v6  ;;  %v5726_v29 = vld [vmem:[%s5011_s23 + $0xe0] sm:$0xff]  ;;  %v5729_v40 = vld [vmem:[%s5011_s23 + $0xe8] sm:$0xff]  ;;  %v5736_v60 = vld [vmem:[%s5011_s23 + $0xf0] sm:$0xff]  ;;  %v5827_v24 = vsel %vm1027_vm7, 65537, %v4800_v13  ;;  %v5837_v12 = vsel %vm1029_vm9, 65537, %v4800_v13 }
 0x118   : > { %v5739_v26 = vld [vmem:[%s5011_s23 + $0xf8] sm:$0xff]  ;;  %v5742_v28 = vld [vmem:[%s5011_s23 + $0x100] sm:$0xff]  ;;  %v5745_v2 = vld [vmem:[%s5011_s23 + $0x108] sm:$0xff]  ;;  %v5841_v14 = vsel %vm1030_vm10, 65537, %v4800_v13  ;;  %v5845_v6 = vsel %vm1031_vm11, 65537, %v4800_v13  ;;  %vm9437_vm7 = vcmp.ne.bf16.partialorder %v5654_v31, 0 }
 0x119   : > { %971 = vst [vmem:[#allocation2 + $0x18] sm:$0xff] %v965_v55  ;;  %972 = vst [vmem:[#allocation2 + $0x20] sm:$0xff] %v966_v58  ;;  %v5752_v35 = vld [vmem:[%s5011_s23 + $0x110] sm:$0xff]  ;;  %v5755_v1 = vld [vmem:[%s5011_s23 + $0x118] sm:$0xff]  ;;  %v5853_v30 = vsel %vm9437_vm7, 65537, %v4800_v13  ;;  %vm9438_vm8 = vcmp.ne.bf16.partialorder %v5657_v3, 0 }
 0x11a   : > { %v5758_v47 = vld [vmem:[%s5011_s23 + $0x120] sm:$0xff]  ;;  %v5761_v46 = vld [vmem:[%s5011_s23 + $0x128] sm:$0xff]  ;;  %v5768_v61 = vld [vmem:[%s5011_s23 + $0x130] sm:$0xff]  ;;  %v5857_v56 = vsel %vm9438_vm8, 65537, %v4800_v13  ;;  %vm9439_vm9 = vcmp.ne.bf16.partialorder %v5660_v33, 0  ;;  %vm9440_vm10 = vcmp.ne.bf16.partialorder %v5663_v48, 0 }
 0x11b   : > { %v5771_v16 = vld [vmem:[%s5011_s23 + $0x138] sm:$0xff]  ;;  %v5778_v15 = vld [vmem:[%s5011_s23 + $0x140] sm:$0xff]  ;;  %v5781_v25 = vld [vmem:[%s5011_s23 + $0x148] sm:$0xff]  ;;  %vm1063_vm1 = vcmp.ne.bf16.partialorder %v5758_v47, 0  ;;  %vm1064_vm6 = vcmp.ne.bf16.partialorder %v5761_v46, 0  ;;  %vm1065_vm2 = vcmp.ne.bf16.partialorder %v5768_v61, 0  ;;  %v1126_v47 = vunpack.c.h.b16 %v5831_v49 }
 0x11c   : > { %v5788_v10 = vld [vmem:[%s5011_s23 + $0x150] sm:$0xff]  ;;  %v5791_v17 = vld [vmem:[%s5011_s23 + $0x158] sm:$0xff]  ;;  %v5798_v20 = vld [vmem:[%s5011_s23 + $0x160] sm:$0xff]  ;;  %vm1066_vm0 = vcmp.ne.bf16.partialorder %v5771_v16, 0  ;;  %v5861_v54 = vsel %vm9439_vm9, 65537, %v4800_v13  ;;  %v5865_v37 = vsel %vm9440_vm10, 65537, %v4800_v13  ;;  %v1127_v46 = vunpack.c.l.b16 %v5837_v12 }
 0x11d   : > { %v5801_v62 = vld [vmem:[%s5011_s23 + $0x168] sm:$0xff]  ;;  %v5808_v34 = vld [vmem:[%s5011_s23 + $0x170] sm:$0xff]  ;;  %v5811_v43 = vld [vmem:[%s5011_s23 + $0x178] sm:$0xff]  ;;  %vm1069_vm14 = vcmp.ne.bf16.partialorder %v5788_v10, 0  ;;  %vm1070_vm13 = vcmp.ne.bf16.partialorder %v5791_v17, 0  ;;  %vm1071_vm5 = vcmp.ne.bf16.partialorder %v5798_v20, 0  ;;  %v1128_v61 = vunpack.c.h.b16 %v5837_v12 }
 0x11e   : > { %vm1072_vm4 = vcmp.ne.bf16.partialorder %v5801_v62, 0  ;;  %vm1073_vm3 = vcmp.ne.bf16.partialorder %v5808_v34, 0  ;;  %vm1074_vm15 = vcmp.ne.bf16.partialorder %v5811_v43, 0  ;;  %vm9441_vm11 = vcmp.ne.bf16.partialorder %v5666_v18, 0 }
 0x11f   : > { %v5869_v50 = vsel %vm9441_vm11, 65537, %v4800_v13  ;;  %vm9442_vm12 = vcmp.ne.bf16.partialorder %v5669_v9, 0  ;;  %vm9443_vm7 = vcmp.ne.bf16.partialorder %v5672_v21, 0  ;;  %vm9444_vm8 = vcmp.ne.bf16.partialorder %v5675_v39, 0 }
 0x120   : > { %v5873_v45 = vsel %vm9442_vm12, 65537, %v4800_v13  ;;  %v5877_v59 = vsel %vm9443_vm7, 65537, %v4800_v13  ;;  %v5881_v55 = vsel %vm9444_vm8, 65537, %v4800_v13  ;;  %vm9445_vm9 = vcmp.ne.bf16.partialorder %v5678_v4, 0 }
 0x121   : > { %v5885_v58 = vsel %vm9445_vm9, 65537, %v4800_v13  ;;  %vm9446_vm10 = vcmp.ne.bf16.partialorder %v5681_v19, 0  ;;  %vm9447_vm11 = vcmp.ne.bf16.partialorder %v5684_v53, 0  ;;  %vm9448_vm12 = vcmp.ne.bf16.partialorder %v5687_v41, 0 }
 0x122   : > { %v5889_v8 = vsel %vm9446_vm10, 65537, %v4800_v13  ;;  %v5893_v42 = vsel %vm9447_vm11, 65537, %v4800_v13  ;;  %v5897_v0 = vsel %vm9448_vm12, 65537, %v4800_v13  ;;  %vm9449_vm7 = vcmp.ne.bf16.partialorder %v5690_v63, 0 }
 0x123   : > { %v5901_v36 = vsel %vm9449_vm7, 65537, %v4800_v13  ;;  %vm9450_vm8 = vcmp.ne.bf16.partialorder %v5693_v32, 0  ;;  %vm9451_vm9 = vcmp.ne.bf16.partialorder %v5696_v44, 0  ;;  %vm9452_vm10 = vcmp.ne.bf16.partialorder %v5699_v11, 0 }
 0x124   : > { %v5905_v23 = vsel %vm9450_vm8, 65537, %v4800_v13  ;;  %v5909_v38 = vsel %vm9451_vm9, 65537, %v4800_v13  ;;  %v5913_v31 = vsel %vm9452_vm10, 65537, %v4800_v13  ;;  %vm9453_vm11 = vcmp.ne.bf16.partialorder %v5704_v22, 0 }
 0x125   : > { %v5917_v3 = vsel %vm9453_vm11, 65537, %v4800_v13  ;;  %vm9454_vm12 = vcmp.ne.bf16.partialorder %v5707_v27, 0  ;;  %vm9455_vm7 = vcmp.ne.bf16.partialorder %v5710_v51, 0  ;;  %vm9456_vm8 = vcmp.ne.bf16.partialorder %v5713_v57, 0 }
 0x126   : > { %v5921_v33 = vsel %vm9454_vm12, 65537, %v4800_v13  ;;  %v5925_v48 = vsel %vm9455_vm7, 65537, %v4800_v13  ;;  %v5929_v18 = vsel %vm9456_vm8, 65537, %v4800_v13  ;;  %vm9457_vm9 = vcmp.ne.bf16.partialorder %v5720_v7, 0 }
 0x127   : > { %v5933_v9 = vsel %vm9457_vm9, 65537, %v4800_v13  ;;  %vm9458_vm10 = vcmp.ne.bf16.partialorder %v5723_v5, 0  ;;  %vm9459_vm11 = vcmp.ne.bf16.partialorder %v5726_v29, 0  ;;  %vm9460_vm12 = vcmp.ne.bf16.partialorder %v5729_v40, 0 }
 0x128   : > { %v5937_v21 = vsel %vm9458_vm10, 65537, %v4800_v13  ;;  %v5941_v39 = vsel %vm9459_vm11, 65537, %v4800_v13  ;;  %v5945_v4 = vsel %vm9460_vm12, 65537, %v4800_v13  ;;  %vm9461_vm7 = vcmp.ne.bf16.partialorder %v5736_v60, 0 }
 0x129   : > { %v5949_v19 = vsel %vm9461_vm7, 65537, %v4800_v13  ;;  %vm9462_vm8 = vcmp.ne.bf16.partialorder %v5739_v26, 0  ;;  %vm9463_vm9 = vcmp.ne.bf16.partialorder %v5742_v28, 0  ;;  %vm9464_vm10 = vcmp.ne.bf16.partialorder %v5745_v2, 0 }
 0x12a   : > { %v5953_v53 = vsel %vm9462_vm8, 65537, %v4800_v13  ;;  %v5957_v41 = vsel %vm9463_vm9, 65537, %v4800_v13  ;;  %v5961_v63 = vsel %vm9464_vm10, 65537, %v4800_v13  ;;  %vm9465_vm11 = vcmp.ne.bf16.partialorder %v5752_v35, 0 }
 0x12b   : > { %v5965_v32 = vsel %vm9465_vm11, 65537, %v4800_v13  ;;  %vm9466_vm12 = vcmp.ne.bf16.partialorder %v5755_v1, 0  ;;  %v5973_v11 = vsel %vm1063_vm1, 65537, %v4800_v13  ;;  %v5977_v22 = vsel %vm1064_vm6, 65537, %v4800_v13 }
 0x12c   : > { %v5969_v44 = vsel %vm9466_vm12, 65537, %v4800_v13  ;;  %v5981_v27 = vsel %vm1065_vm2, 65537, %v4800_v13  ;;  %v5985_v51 = vsel %vm1066_vm0, 65537, %v4800_v13  ;;  %vm9468_vm7 = vcmp.ne.bf16.partialorder %v5778_v15, 0 }
 0x12d   : > { %9467 = vst [vmem:[#allocation32_spill] sm:$0xff] %v5985_v51  ;;  %v5989_v57 = vsel %vm9468_vm7, 65537, %v4800_v13  ;;  %vm9470_vm8 = vcmp.ne.bf16.partialorder %v5781_v25, 0  ;;  %v5997_v5 = vsel %vm1069_vm14, 65537, %v4800_v13  ;;  %v6001_v29 = vsel %vm1070_vm13, 65537, %v4800_v13 }
 0x12e   : > { %9469 = vst [vmem:[#allocation34_spill] sm:$0xff] %v5989_v57  ;;  %v5993_v7 = vsel %vm9470_vm8, 65537, %v4800_v13  ;;  %9472 = vst [vmem:[#allocation38_spill] sm:$0xff] %v5997_v5  ;;  %v6005_v40 = vsel %vm1071_vm5, 65537, %v4800_v13  ;;  %v6009_v60 = vsel %vm1072_vm4, 65537, %v4800_v13  ;;  %v6013_v26 = vsel %vm1073_vm3, 65537, %v4800_v13 }
 0x12f   : > { %9471 = vst [vmem:[#allocation35_spill] sm:$0xff] %v5993_v7  ;;  %9473 = vst [vmem:[#allocation36_spill] sm:$0xff] %v6001_v29  ;;  %v6017_v28 = vsel %vm1074_vm15, 65537, %v4800_v13  ;;  %v1123_v2 = vunpack.c.l.b16 %v5827_v24  ;;  %v1124_v35 = vunpack.c.h.b16 %v5827_v24  ;;  %v1125_v1 = vunpack.c.l.b16 %v5831_v49 }
 0x130   : > { %9474 = vst [vmem:[#allocation39_spill] sm:$0xff] %v6005_v40  ;;  %9475 = vst [vmem:[#allocation37_spill] sm:$0xff] %v6009_v60  ;;  %vm6135_vm3 = vcmp.ne.s32.totalorder %v1126_v47, 0  ;;  %vm6141_vm4 = vcmp.ne.s32.totalorder %v1127_v46, 0  ;;  %vm6147_vm5 = vcmp.ne.s32.totalorder %v1128_v61, 0  ;;  %v9496_v46 = vunpack.c.l.b16 %v5845_v6 }
 0x131   : > { %9476 = vst [vmem:[#allocation40_spill] sm:$0xff] %v6013_v26  ;;  %9477 = vst [vmem:[#allocation41_spill] sm:$0xff] %v6017_v28  ;;  %vm6117_vm0 = vcmp.ne.s32.totalorder %v1123_v2, 0  ;;  %vm6123_vm1 = vcmp.ne.s32.totalorder %v1124_v35, 0  ;;  %vm6129_vm2 = vcmp.ne.s32.totalorder %v1125_v1, 0  ;;  %v9490_v35 = vunpack.c.l.b16 %v5841_v14 }
 0x132   : > { %v9493_v1 = vunpack.c.h.b16 %v5841_v14  ;;  %vm6165_vm14 = vcmp.ne.s32.totalorder %v9496_v46, 0  ;;  %v9499_v61 = vunpack.c.h.b16 %v5845_v6  ;;  %v9508_v46 = vunpack.c.l.b16 %v5853_v30 }
 0x133   : > { %vm6153_vm6 = vcmp.ne.s32.totalorder %v9490_v35, 0  ;;  %v9502_v35 = vunpack.c.l.b16 %v5849_v52  ;;  %v9509_v6 = vmov 0  ;;  %v9512_v20 = vmov 0 }
 0x134   : > { %vm6159_vm13 = vcmp.ne.s32.totalorder %v9493_v1, 0  ;;  %vm6171_vm15 = vcmp.ne.s32.totalorder %v9499_v61, 0  ;;  %v9505_v1 = vunpack.c.h.b16 %v5849_v52  ;;  %vm6189_vm11 = vcmp.ne.s32.totalorder %v9508_v46, 0 }
 0x135   : > { %vm6177_vm9 = vcmp.ne.s32.totalorder %v9502_v35, 0  ;;  %v9510_v6 = vsel %vm6189_vm11, 4294967295, %v9509_v6  ;;  %v9511_v61 = vunpack.c.h.b16 %v5853_v30  ;;  %v9514_v35 = vunpack.c.l.b16 %v5857_v56 }
 0x136   : > { %vm6183_vm10 = vcmp.ne.s32.totalorder %v9505_v1, 0  ;;  %v9515_v52 = vmov 0  ;;  %v9517_v1 = vunpack.c.h.b16 %v5857_v56  ;;  %v9518_v10 = vmov 0 }
 0x137   : > { %vm6195_vm12 = vcmp.ne.s32.totalorder %v9511_v61, 0  ;;  %vm6201_vm7 = vcmp.ne.s32.totalorder %v9514_v35, 0  ;;  %v9520_v46 = vunpack.c.l.b16 %v5861_v54  ;;  %v9521_v30 = vmov 0 }
 0x138   : > { %v9513_v20 = vsel %vm6195_vm12, 4294967295, %v9512_v20  ;;  %v9516_v52 = vsel %vm6201_vm7, 4294967295, %v9515_v52  ;;  %vm6207_vm8 = vcmp.ne.s32.totalorder %v9517_v1, 0  ;;  %v9523_v61 = vunpack.c.h.b16 %v5861_v54 }
 0x139   : > { %v9519_v10 = vsel %vm6207_vm8, 4294967295, %v9518_v10  ;;  %vm6213_vm11 = vcmp.ne.s32.totalorder %v9520_v46, 0  ;;  %v9524_v25 = vmov 0  ;;  %v9526_v35 = vunpack.c.l.b16 %v5865_v37 }
 0x13a   : > { %v9522_v30 = vsel %vm6213_vm11, 4294967295, %v9521_v30  ;;  %vm6219_vm12 = vcmp.ne.s32.totalorder %v9523_v61, 0  ;;  %v9527_v56 = vmov 0  ;;  %v9529_v1 = vunpack.c.h.b16 %v5865_v37 }
 0x13b   : > { %v9525_v25 = vsel %vm6219_vm12, 4294967295, %v9524_v25  ;;  %vm6225_vm7 = vcmp.ne.s32.totalorder %v9526_v35, 0  ;;  %v9530_v16 = vmov 0  ;;  %v9532_v46 = vunpack.c.l.b16 %v5869_v50 }
 0x13c   : > { %v9528_v56 = vsel %vm6225_vm7, 4294967295, %v9527_v56  ;;  %vm6231_vm8 = vcmp.ne.s32.totalorder %v9529_v1, 0  ;;  %v9533_v54 = vmov 0  ;;  %v9535_v61 = vunpack.c.h.b16 %v5869_v50 }
 0x13d   : > { %v9531_v16 = vsel %vm6231_vm8, 4294967295, %v9530_v16  ;;  %vm6237_vm11 = vcmp.ne.s32.totalorder %v9532_v46, 0  ;;  %v9536_v28 = vmov 0  ;;  %v9538_v35 = vunpack.c.l.b16 %v5873_v45 }
 0x13e   : > { %v9534_v54 = vsel %vm6237_vm11, 4294967295, %v9533_v54  ;;  %vm6243_vm12 = vcmp.ne.s32.totalorder %v9535_v61, 0  ;;  %v9539_v37 = vmov 0  ;;  %v9541_v1 = vunpack.c.h.b16 %v5873_v45 }
 0x13f   : > { %v9537_v28 = vsel %vm6243_vm12, 4294967295, %v9536_v28  ;;  %vm6249_vm7 = vcmp.ne.s32.totalorder %v9538_v35, 0  ;;  %v9542_v26 = vmov 0  ;;  %v9544_v46 = vunpack.c.l.b16 %v5877_v59 }
 0x140   : > { %v9540_v37 = vsel %vm6249_vm7, 4294967295, %v9539_v37  ;;  %vm6255_vm8 = vcmp.ne.s32.totalorder %v9541_v1, 0  ;;  %v9545_v50 = vmov 0  ;;  %v9547_v61 = vunpack.c.h.b16 %v5877_v59 }
 0x141   : > { %v9543_v26 = vsel %vm6255_vm8, 4294967295, %v9542_v26  ;;  %vm6261_vm11 = vcmp.ne.s32.totalorder %v9544_v46, 0  ;;  %v9548_v60 = vmov 0  ;;  %v9550_v35 = vunpack.c.l.b16 %v5881_v55 }
 0x142   : > { %v9546_v50 = vsel %vm6261_vm11, 4294967295, %v9545_v50  ;;  %vm6267_vm12 = vcmp.ne.s32.totalorder %v9547_v61, 0  ;;  %v9551_v45 = vmov 0  ;;  %v9553_v1 = vunpack.c.h.b16 %v5881_v55 }
 0x143   : > { %v9549_v60 = vsel %vm6267_vm12, 4294967295, %v9548_v60  ;;  %vm6273_vm7 = vcmp.ne.s32.totalorder %v9550_v35, 0  ;;  %v9554_v40 = vmov 0  ;;  %v9556_v46 = vunpack.c.l.b16 %v5885_v58 }
 0x144   : > { %v9552_v45 = vsel %vm6273_vm7, 4294967295, %v9551_v45  ;;  %vm6279_vm8 = vcmp.ne.s32.totalorder %v9553_v1, 0  ;;  %v9557_v59 = vmov 0  ;;  %v9559_v61 = vunpack.c.h.b16 %v5885_v58 }
 0x145   : > { %v9555_v40 = vsel %vm6279_vm8, 4294967295, %v9554_v40  ;;  %vm6285_vm11 = vcmp.ne.s32.totalorder %v9556_v46, 0  ;;  %v9560_v29 = vmov 0  ;;  %v9562_v35 = vunpack.c.l.b16 %v5889_v8 }
 0x146   : > { %v9558_v59 = vsel %vm6285_vm11, 4294967295, %v9557_v59  ;;  %vm6291_vm12 = vcmp.ne.s32.totalorder %v9559_v61, 0  ;;  %v9563_v55 = vmov 0  ;;  %v9565_v1 = vunpack.c.h.b16 %v5889_v8 }
 0x147   : > { %v9561_v29 = vsel %vm6291_vm12, 4294967295, %v9560_v29  ;;  %vm6297_vm7 = vcmp.ne.s32.totalorder %v9562_v35, 0  ;;  %v9566_v5 = vmov 0  ;;  %v9568_v46 = vunpack.c.l.b16 %v5893_v42 }
 0x148   : > { %v9564_v55 = vsel %vm6297_vm7, 4294967295, %v9563_v55  ;;  %vm6303_vm8 = vcmp.ne.s32.totalorder %v9565_v1, 0  ;;  %v9569_v58 = vmov 0  ;;  %v9571_v61 = vunpack.c.h.b16 %v5893_v42 }
 0x149   : > { %v9567_v5 = vsel %vm6303_vm8, 4294967295, %v9566_v5  ;;  %vm6309_vm11 = vcmp.ne.s32.totalorder %v9568_v46, 0  ;;  %v9572_v7 = vmov 0  ;;  %v9574_v35 = vunpack.c.l.b16 %v5897_v0 }
 0x14a   : > { %v9570_v58 = vsel %vm6309_vm11, 4294967295, %v9569_v58  ;;  %vm6315_vm12 = vcmp.ne.s32.totalorder %v9571_v61, 0  ;;  %v9575_v8 = vmov 0  ;;  %v9577_v1 = vunpack.c.h.b16 %v5897_v0 }
 0x14b   : > { %v9573_v7 = vsel %vm6315_vm12, 4294967295, %v9572_v7  ;;  %vm6321_vm7 = vcmp.ne.s32.totalorder %v9574_v35, 0  ;;  %v9578_v57 = vmov 0  ;;  %v9581_v46 = vunpack.c.l.b16 %v5901_v36 }
 0x14c   : > { %v9576_v8 = vsel %vm6321_vm7, 4294967295, %v9575_v8  ;;  %vm6327_vm8 = vcmp.ne.s32.totalorder %v9577_v1, 0  ;;  %v9582_v42 = vmov 0  ;;  %v9584_v61 = vunpack.c.h.b16 %v5901_v36 }
 0x14d   : > { %v9579_v57 = vsel %vm6327_vm8, 4294967295, %v9578_v57  ;;  %vm6333_vm11 = vcmp.ne.s32.totalorder %v9581_v46, 0  ;;  %v9585_v51 = vmov 0  ;;  %v9588_v35 = vunpack.c.l.b16 %v5905_v23 }
 0x14e   : > { %9580 = vst [vmem:[#allocation42_spill] sm:$0xff] %v9579_v57  ;;  %v9583_v42 = vsel %vm6333_vm11, 4294967295, %v9582_v42  ;;  %vm6339_vm12 = vcmp.ne.s32.totalorder %v9584_v61, 0  ;;  %v9589_v0 = vmov 0  ;;  %v9591_v1 = vunpack.c.h.b16 %v5905_v23 }
 0x14f   : > { %v9586_v51 = vsel %vm6339_vm12, 4294967295, %v9585_v51  ;;  %vm6345_vm7 = vcmp.ne.s32.totalorder %v9588_v35, 0  ;;  %v9592_v57 = vmov 0  ;;  %v9595_v46 = vunpack.c.l.b16 %v5909_v38 }
 0x150   : > { %9587 = vst [vmem:[#allocation43_spill] sm:$0xff] %v9586_v51  ;;  %v9590_v0 = vsel %vm6345_vm7, 4294967295, %v9589_v0  ;;  %vm6351_vm8 = vcmp.ne.s32.totalorder %v9591_v1, 0  ;;  %v9596_v36 = vmov 0  ;;  %v9598_v61 = vunpack.c.h.b16 %v5909_v38 }
 0x151   : > { %v9593_v57 = vsel %vm6351_vm8, 4294967295, %v9592_v57  ;;  %vm6357_vm11 = vcmp.ne.s32.totalorder %v9595_v46, 0  ;;  %v9599_v51 = vmov 0  ;;  %v9602_v35 = vunpack.c.l.b16 %v5913_v31 }
 0x152   : > { %9594 = vst [vmem:[#allocation44_spill] sm:$0xff] %v9593_v57  ;;  %v9597_v36 = vsel %vm6357_vm11, 4294967295, %v9596_v36  ;;  %vm6363_vm12 = vcmp.ne.s32.totalorder %v9598_v61, 0  ;;  %v9605_v1 = vunpack.c.h.b16 %v5913_v31  ;;  %v9608_v46 = vunpack.c.l.b16 %v5917_v3 }
 0x153   : > { %v9600_v51 = vsel %vm6363_vm12, 4294967295, %v9599_v51  ;;  %vm6369_vm7 = vcmp.ne.s32.totalorder %v9602_v35, 0  ;;  %v9609_v38 = vmov 0  ;;  %v9612_v61 = vunpack.c.h.b16 %v5917_v3 }
 0x154   : > { %9601 = vst [vmem:[#allocation45_spill] sm:$0xff] %v9600_v51  ;;  %vm6375_vm8 = vcmp.ne.s32.totalorder %v9605_v1, 0  ;;  %vm6381_vm11 = vcmp.ne.s32.totalorder %v9608_v46, 0  ;;  %v9613_v51 = vmov 0  ;;  %v9236_v35 = vmov 0.0  }
 0x155   : > { %v9610_v38 = vsel %vm6381_vm11, 4294967295, %v9609_v38  ;;  %vm6387_vm12 = vcmp.ne.s32.totalorder %v9612_v61, 0  ;;  %v6394_v31 = vsel %vm6117_vm0, 1.0, %v9236_v35  ;;  %v6399_v1 = vsel %vm6123_vm1, 1.0, %v9236_v35 }
 0x156   : > { %9611 = vst [vmem:[#allocation46_spill] sm:$0xff] %v9610_v38  ;;  %v9614_v51 = vsel %vm6387_vm12, 4294967295, %v9613_v51  ;;  %9615 = vst [vmem:[#allocation47_spill] sm:$0xff] %v6394_v31  ;;  %v9616_v46 = vunpack.c.l.b16 %v5921_v33  ;;  %v9619_v3 = vunpack.c.h.b16 %v5921_v33  ;;  %v9622_v15 = vunpack.c.l.b16 %v5925_v48 }
 0x157   : > { %v9625_v17 = vunpack.c.h.b16 %v5925_v48  ;;  %v9626_v35 = vmov 0  ;;  %v9635_v13 = vunpack.c.h.b16 %v5929_v18  ;;  %v9638_v24 = vunpack.c.l.b16 %v5933_v9 }
 0x158   : > { %vm6403_vm11 = vcmp.ne.s32.totalorder %v9616_v46, 0  ;;  %vm6409_vm12 = vcmp.ne.s32.totalorder %v9619_v3, 0  ;;  %vm6415_vm0 = vcmp.ne.s32.totalorder %v9622_v15, 0  ;;  %v9628_v46 = vmov 0.0  }
 0x159   : > { %vm6421_vm1 = vcmp.ne.s32.totalorder %v9625_v17, 0  ;;  %v6428_v33 = vsel %vm6129_vm2, 1.0, %v9628_v46  ;;  %v6433_v3 = vsel %vm6135_vm3, 1.0, %v9628_v46  ;;  %v6438_v15 = vsel %vm6141_vm4, 1.0, %v9628_v46 }
 0x15a   : > { %v9627_v35 = vsel %vm6421_vm1, 4294967295, %v9626_v35  ;;  %9629 = vst [vmem:[#allocation31_spill] sm:$0xff] %v6433_v3  ;;  %9630 = vst [vmem:[#allocation33_spill] sm:$0xff] %v6438_v15  ;;  %v6443_v48 = vsel %vm6147_vm5, 1.0, %v9628_v46  ;;  %v9632_v17 = vunpack.c.l.b16 %v5929_v18  ;;  %vm6453_vm2 = vcmp.ne.s32.totalorder %v9635_v13, 0 }
 0x15b   : > { %9631 = vst [vmem:[#allocation48_spill] sm:$0xff] %v6443_v48  ;;  %vm6459_vm3 = vcmp.ne.s32.totalorder %v9638_v24, 0  ;;  %v9641_v2 = vunpack.c.h.b16 %v5933_v9  ;;  %v6472_v18 = vsel %vm6153_vm6, 1.0, %v9628_v46  ;;  %v6482_v13 = vsel %vm6165_vm14, 1.0, %v9628_v46 }
 0x15c   : > { %vm6447_vm1 = vcmp.ne.s32.totalorder %v9632_v17, 0  ;;  %v6477_v17 = vsel %vm6159_vm13, 1.0, %v9628_v46  ;;  %9644 = vst [vmem:[#allocation49_spill] sm:$0xff] %v6482_v13  ;;  %v6487_v9 = vsel %vm6171_vm15, 1.0, %v9628_v46  ;;  %v9646_v24 = vunpack.c.l.b16 %v5937_v21 }
 0x15d   : > { %vm6465_vm4 = vcmp.ne.s32.totalorder %v9641_v2, 0  ;;  %9645 = vst [vmem:[#allocation50_spill] sm:$0xff] %v6487_v9  ;;  %v9649_v47 = vunpack.c.h.b16 %v5937_v21  ;;  %v9652_v12 = vunpack.c.l.b16 %v5941_v39  ;;  %v9653_v13 = vmov 0 }
 0x15e   : > { %vm6491_vm5 = vcmp.ne.s32.totalorder %v9646_v24, 0  ;;  %v9655_v43 = vunpack.c.h.b16 %v5941_v39  ;;  %v9656_v9 = vmov 0  ;;  %v6516_v21 = vsel %vm6177_vm9, 1.0, %v9628_v46 }
 0x15f   : > { %vm6497_vm6 = vcmp.ne.s32.totalorder %v9649_v47, 0  ;;  %vm6503_vm13 = vcmp.ne.s32.totalorder %v9652_v12, 0  ;;  %v6521_v24 = vsel %vm6183_vm10, 1.0, %v9628_v46  ;;  %vm9658_vm15 = vnez %v9510_v6 }
 0x160   : > { %v9654_v13 = vsel %vm6503_vm13, 4294967295, %v9653_v13  ;;  %vm6509_vm14 = vcmp.ne.s32.totalorder %v9655_v43, 0  ;;  %v6526_v47 = vsel %vm9658_vm15, 1.0, %v9628_v46  ;;  %vm9660_vm13 = vnez %v9513_v20 }
 0x161   : > { %v9657_v9 = vsel %vm6509_vm14, 4294967295, %v9656_v9  ;;  %9659 = vst [vmem:[#allocation51_spill] sm:$0xff] %v6526_v47  ;;  %v6531_v39 = vsel %vm9660_vm13, 1.0, %v9628_v46  ;;  %v9662_v12 = vunpack.c.l.b16 %v5945_v4  ;;  %v9663_v14 = vmov 0 }
 0x162   : > { %9661 = vst [vmem:[#allocation52_spill] sm:$0xff] %v6531_v39  ;;  %v9665_v62 = vunpack.c.h.b16 %v5945_v4  ;;  %v9666_v43 = vmov 0  ;;  %v9668_v6 = vunpack.c.l.b16 %v5949_v19  ;;  %v9669_v47 = vmov 0 }
 0x163   : > { %vm6535_vm14 = vcmp.ne.s32.totalorder %v9662_v12, 0  ;;  %v9671_v20 = vunpack.c.h.b16 %v5949_v19  ;;  %v9672_v39 = vmov 0  ;;  %vm9674_vm15 = vnez %v9516_v52 }
 0x164   : > { %v9664_v14 = vsel %vm6535_vm14, 4294967295, %v9663_v14  ;;  %vm6541_vm9 = vcmp.ne.s32.totalorder %v9665_v62, 0  ;;  %vm6547_vm10 = vcmp.ne.s32.totalorder %v9668_v6, 0  ;;  %v6560_v4 = vsel %vm9674_vm15, 1.0, %v9628_v46 }
 0x165   : > { %v9667_v43 = vsel %vm6541_vm9, 4294967295, %v9666_v43  ;;  %v9670_v47 = vsel %vm6547_vm10, 4294967295, %v9669_v47  ;;  %vm6553_vm13 = vcmp.ne.s32.totalorder %v9671_v20, 0  ;;  %vm9675_vm9 = vnez %v9519_v10 }
 0x166   : > { %v9673_v39 = vsel %vm6553_vm13, 4294967295, %v9672_v39  ;;  %v6565_v12 = vsel %vm9675_vm9, 1.0, %v9628_v46  ;;  %vm9677_vm14 = vnez %v9522_v30  ;;  %vm9679_vm10 = vnez %v9525_v25 }
 0x167   : > { %9676 = vst [vmem:[#allocation53_spill] sm:$0xff] %v6565_v12  ;;  %v6570_v62 = vsel %vm9677_vm14, 1.0, %v9628_v46  ;;  %v6575_v19 = vsel %vm9679_vm10, 1.0, %v9628_v46  ;;  %v9681_v6 = vunpack.c.l.b16 %v5953_v53  ;;  %v9682_v52 = vmov 0 }
 0x168   : > { %9678 = vst [vmem:[#allocation54_spill] sm:$0xff] %v6570_v62  ;;  %9680 = vst [vmem:[#allocation55_spill] sm:$0xff] %v6575_v19  ;;  %v9684_v10 = vunpack.c.h.b16 %v5953_v53  ;;  %v9685_v20 = vmov 0  ;;  %v9687_v30 = vunpack.c.l.b16 %v5957_v41  ;;  %v9688_v62 = vmov 0 }
 0x169   : > { %vm6579_vm13 = vcmp.ne.s32.totalorder %v9681_v6, 0  ;;  %v9690_v25 = vunpack.c.h.b16 %v5957_v41  ;;  %v9691_v19 = vmov 0  ;;  %vm9693_vm15 = vnez %v9528_v56 }
 0x16a   : > { %v9683_v52 = vsel %vm6579_vm13, 4294967295, %v9682_v52  ;;  %vm6585_vm9 = vcmp.ne.s32.totalorder %v9684_v10, 0  ;;  %vm6591_vm14 = vcmp.ne.s32.totalorder %v9687_v30, 0  ;;  %v6604_v53 = vsel %vm9693_vm15, 1.0, %v9628_v46 }
 0x16b   : > { %v9686_v20 = vsel %vm6585_vm9, 4294967295, %v9685_v20  ;;  %v9689_v62 = vsel %vm6591_vm14, 4294967295, %v9688_v62  ;;  %vm6597_vm10 = vcmp.ne.s32.totalorder %v9690_v25, 0  ;;  %vm9694_vm9 = vnez %v9531_v16 }
 0x16c   : > { %v9692_v19 = vsel %vm6597_vm10, 4294967295, %v9691_v19  ;;  %v6609_v6 = vsel %vm9694_vm9, 1.0, %v9628_v46  ;;  %vm9695_vm13 = vnez %v9534_v54  ;;  %vm9697_vm14 = vnez %v9537_v28 }
 0x16d   : > { %v6614_v10 = vsel %vm9695_vm13, 1.0, %v9628_v46  ;;  %v6619_v41 = vsel %vm9697_vm14, 1.0, %v9628_v46  ;;  %v9699_v30 = vunpack.c.l.b16 %v5961_v63  ;;  %v9700_v56 = vmov 0 }
 0x16e   : > { %9696 = vst [vmem:[#allocation56_spill] sm:$0xff] %v6614_v10  ;;  %9698 = vst [vmem:[#allocation57_spill] sm:$0xff] %v6619_v41  ;;  %v9702_v16 = vunpack.c.h.b16 %v5961_v63  ;;  %v9703_v25 = vmov 0  ;;  %v9705_v54 = vunpack.c.l.b16 %v5965_v32  ;;  %v9706_v12 = vmov 0 }
 0x16f   : > { %vm6623_vm10 = vcmp.ne.s32.totalorder %v9699_v30, 0  ;;  %v9708_v28 = vunpack.c.h.b16 %v5965_v32  ;;  %v9709_v41 = vmov 0  ;;  %vm9711_vm15 = vnez %v9540_v37 }
 0x170   : > { %v9701_v56 = vsel %vm6623_vm10, 4294967295, %v9700_v56  ;;  %vm6629_vm9 = vcmp.ne.s32.totalorder %v9702_v16, 0  ;;  %vm6635_vm13 = vcmp.ne.s32.totalorder %v9705_v54, 0  ;;  %v6648_v63 = vsel %vm9711_vm15, 1.0, %v9628_v46 }
 0x171   : > { %v9704_v25 = vsel %vm6629_vm9, 4294967295, %v9703_v25  ;;  %v9707_v12 = vsel %vm6635_vm13, 4294967295, %v9706_v12  ;;  %vm6641_vm14 = vcmp.ne.s32.totalorder %v9708_v28, 0  ;;  %9712 = vst [vmem:[#allocation58_spill] sm:$0xff] %v6648_v63  ;;  %vm9713_vm9 = vnez %v9543_v26 }
 0x172   : > { %v9710_v41 = vsel %vm6641_vm14, 4294967295, %v9709_v41  ;;  %v6653_v30 = vsel %vm9713_vm9, 1.0, %v9628_v46  ;;  %vm9715_vm10 = vnez %v9546_v50  ;;  %vm9717_vm13 = vnez %v9549_v60 }
 0x173   : > { %9714 = vst [vmem:[#allocation59_spill] sm:$0xff] %v6653_v30  ;;  %v6658_v16 = vsel %vm9715_vm10, 1.0, %v9628_v46  ;;  %v6663_v32 = vsel %vm9717_vm13, 1.0, %v9628_v46  ;;  %v9719_v54 = vunpack.c.l.b16 %v5969_v44  ;;  %v9720_v37 = vmov 0  ;;  %v9807_v30 = vld [vmem:[#allocation36_spill] sm:$0xff] }
 0x174   : > { %9716 = vst [vmem:[#allocation60_spill] sm:$0xff] %v6658_v16  ;;  %9718 = vst [vmem:[#allocation61_spill] sm:$0xff] %v6663_v32  ;;  %v9722_v26 = vunpack.c.h.b16 %v5969_v44  ;;  %v9723_v28 = vmov 0  ;;  %v9725_v50 = vunpack.c.l.b16 %v5973_v11  ;;  %v9726_v16 = vmov 0 }
 0x175   : > { %vm6667_vm14 = vcmp.ne.s32.totalorder %v9719_v54, 0  ;;  %v9728_v60 = vunpack.c.h.b16 %v5973_v11  ;;  %v9729_v32 = vmov 0  ;;  %vm9731_vm15 = vnez %v9552_v45 }
 0x176   : > { %v9721_v37 = vsel %vm6667_vm14, 4294967295, %v9720_v37  ;;  %vm6673_vm9 = vcmp.ne.s32.totalorder %v9722_v26, 0  ;;  %vm6679_vm10 = vcmp.ne.s32.totalorder %v9725_v50, 0  ;;  %v6692_v44 = vsel %vm9731_vm15, 1.0, %v9628_v46 }
 0x177   : > { %v9724_v28 = vsel %vm6673_vm9, 4294967295, %v9723_v28  ;;  %v9727_v16 = vsel %vm6679_vm10, 4294967295, %v9726_v16  ;;  %vm6685_vm13 = vcmp.ne.s32.totalorder %v9728_v60, 0  ;;  %9732 = vst [vmem:[#allocation62_spill] sm:$0xff] %v6692_v44  ;;  %vm9733_vm9 = vnez %v9555_v40 }
 0x178   : > { %v9730_v32 = vsel %vm6685_vm13, 4294967295, %v9729_v32  ;;  %v6697_v54 = vsel %vm9733_vm9, 1.0, %v9628_v46  ;;  %vm9735_vm14 = vnez %v9558_v59  ;;  %vm9737_vm10 = vnez %v9561_v29 }
 0x179   : > { %9734 = vst [vmem:[#allocation63_spill] sm:$0xff] %v6697_v54  ;;  %v6702_v26 = vsel %vm9735_vm14, 1.0, %v9628_v46  ;;  %v6707_v11 = vsel %vm9737_vm10, 1.0, %v9628_v46  ;;  %v9739_v50 = vunpack.c.l.b16 %v5977_v22  ;;  %v9740_v45 = vmov 0 }
 0x17a   : > { %9736 = vst [vmem:[#allocation64_spill] sm:$0xff] %v6702_v26  ;;  %9738 = vst [vmem:[#allocation65_spill] sm:$0xff] %v6707_v11  ;;  %v9742_v40 = vunpack.c.h.b16 %v5977_v22  ;;  %v9743_v60 = vmov 0  ;;  %v9745_v59 = vunpack.c.l.b16 %v5981_v27  ;;  %v9746_v26 = vmov 0 }
 0x17b   : > { %vm6711_vm13 = vcmp.ne.s32.totalorder %v9739_v50, 0  ;;  %v9748_v29 = vunpack.c.h.b16 %v5981_v27  ;;  %v9749_v11 = vmov 0  ;;  %vm9751_vm15 = vnez %v9564_v55 }
 0x17c   : > { %v9741_v45 = vsel %vm6711_vm13, 4294967295, %v9740_v45  ;;  %vm6717_vm9 = vcmp.ne.s32.totalorder %v9742_v40, 0  ;;  %vm6723_vm14 = vcmp.ne.s32.totalorder %v9745_v59, 0  ;;  %v6736_v22 = vsel %vm9751_vm15, 1.0, %v9628_v46  ;;  %v9759_v59 = vld [vmem:[#allocation32_spill] sm:$0xff] }
 0x17d   : > { %v9744_v60 = vsel %vm6717_vm9, 4294967295, %v9743_v60  ;;  %v9747_v26 = vsel %vm6723_vm14, 4294967295, %v9746_v26  ;;  %vm6729_vm10 = vcmp.ne.s32.totalorder %v9748_v29, 0  ;;  %9752 = vst [vmem:[#allocation66_spill] sm:$0xff] %v6736_v22  ;;  %vm9753_vm9 = vnez %v9567_v5 }
 0x17e   : > { %v9750_v11 = vsel %vm6729_vm10, 4294967295, %v9749_v11  ;;  %v6741_v50 = vsel %vm9753_vm9, 1.0, %v9628_v46  ;;  %vm9755_vm13 = vnez %v9570_v58  ;;  %vm9757_vm14 = vnez %v9573_v7  ;;  %v9766_v58 = vld [vmem:[#allocation34_spill] sm:$0xff] }
 0x17f   : > { %9754 = vst [vmem:[#allocation67_spill] sm:$0xff] %v6741_v50  ;;  %v6746_v40 = vsel %vm9755_vm13, 1.0, %v9628_v46  ;;  %v6751_v27 = vsel %vm9757_vm14, 1.0, %v9628_v46  ;;  %v9760_v29 = vunpack.c.l.b16 %v9759_v59  ;;  %v9761_v55 = vmov 0  ;;  %v9783_v50 = vld [vmem:[#allocation35_spill] sm:$0xff] }
 0x180   : > { %9756 = vst [vmem:[#allocation68_spill] sm:$0xff] %v6746_v40  ;;  %9758 = vst [vmem:[#allocation69_spill] sm:$0xff] %v6751_v27  ;;  %v9763_v5 = vunpack.c.h.b16 %v9759_v59  ;;  %v9764_v54 = vmov 0  ;;  %v9767_v44 = vunpack.c.l.b16 %v9766_v58  ;;  %v9768_v40 = vmov 0 }
 0x181   : > { %vm6755_vm10 = vcmp.ne.s32.totalorder %v9760_v29, 0  ;;  %v9770_v7 = vunpack.c.h.b16 %v9766_v58  ;;  %v9771_v27 = vmov 0  ;;  %vm9773_vm15 = vnez %v9576_v8  ;;  %v9775_v29 = vld [vmem:[#allocation42_spill] sm:$0xff]  ;;  %v9780_v58 = vld [vmem:[#allocation43_spill] sm:$0xff] }
 0x182   : > { %v9762_v55 = vsel %vm6755_vm10, 4294967295, %v9761_v55  ;;  %vm6761_vm9 = vcmp.ne.s32.totalorder %v9763_v5, 0  ;;  %vm6767_vm13 = vcmp.ne.s32.totalorder %v9767_v44, 0  ;;  %v6780_v59 = vsel %vm9773_vm15, 1.0, %v9628_v46 }
 0x183   : > { %v9765_v54 = vsel %vm6761_vm9, 4294967295, %v9764_v54  ;;  %v9769_v40 = vsel %vm6767_vm13, 4294967295, %v9768_v40  ;;  %vm6773_vm14 = vcmp.ne.s32.totalorder %v9770_v7, 0  ;;  %9774 = vst [vmem:[#allocation32_spill] sm:$0xff] %v6780_v59  ;;  %vm9776_vm9 = vnez %v9775_v29 }
 0x184   : > { %v9772_v27 = vsel %vm6773_vm14, 4294967295, %v9771_v27  ;;  %v6785_v5 = vsel %vm9776_vm9, 1.0, %v9628_v46  ;;  %vm9778_vm10 = vnez %v9583_v42  ;;  %vm9781_vm13 = vnez %v9780_v58  ;;  %v9790_v42 = vld [vmem:[#allocation38_spill] sm:$0xff] }
 0x185   : > { %9777 = vst [vmem:[#allocation34_spill] sm:$0xff] %v6785_v5  ;;  %v6790_v44 = vsel %vm9778_vm10, 1.0, %v9628_v46  ;;  %v6795_v7 = vsel %vm9781_vm13, 1.0, %v9628_v46  ;;  %v9784_v22 = vunpack.c.l.b16 %v9783_v50  ;;  %v9785_v8 = vmov 0 }
 0x186   : > { %9779 = vst [vmem:[#allocation42_spill] sm:$0xff] %v6790_v44  ;;  %9782 = vst [vmem:[#allocation43_spill] sm:$0xff] %v6795_v7  ;;  %v9787_v29 = vunpack.c.h.b16 %v9783_v50  ;;  %v9788_v5 = vmov 0  ;;  %v9791_v59 = vunpack.c.l.b16 %v9790_v42  ;;  %v9792_v44 = vmov 0  ;;  %v9799_v50 = vld [vmem:[#allocation44_spill] sm:$0xff] }
 0x187   : > { %vm6799_vm14 = vcmp.ne.s32.totalorder %v9784_v22, 0  ;;  %v9794_v58 = vunpack.c.h.b16 %v9790_v42  ;;  %v9795_v7 = vmov 0  ;;  %vm9797_vm15 = vnez %v9590_v0  ;;  %v9804_v42 = vld [vmem:[#allocation45_spill] sm:$0xff] }
 0x188   : > { %v9786_v8 = vsel %vm6799_vm14, 4294967295, %v9785_v8  ;;  %vm6805_vm9 = vcmp.ne.s32.totalorder %v9787_v29, 0  ;;  %vm6811_vm10 = vcmp.ne.s32.totalorder %v9791_v59, 0  ;;  %v6824_v22 = vsel %vm9797_vm15, 1.0, %v9628_v46 }
 0x189   : > { %v9789_v5 = vsel %vm6805_vm9, 4294967295, %v9788_v5  ;;  %v9793_v44 = vsel %vm6811_vm10, 4294967295, %v9792_v44  ;;  %vm6817_vm13 = vcmp.ne.s32.totalorder %v9794_v58, 0  ;;  %9798 = vst [vmem:[#allocation35_spill] sm:$0xff] %v6824_v22  ;;  %vm9800_vm9 = vnez %v9799_v50 }
 0x18a   : > { %v9796_v7 = vsel %vm6817_vm13, 4294967295, %v9795_v7  ;;  %v6829_v29 = vsel %vm9800_vm9, 1.0, %v9628_v46  ;;  %vm9802_vm14 = vnez %v9597_v36  ;;  %vm9805_vm10 = vnez %v9804_v42  ;;  %v9814_v36 = vld [vmem:[#allocation39_spill] sm:$0xff] }
 0x18b   : > { %9801 = vst [vmem:[#allocation38_spill] sm:$0xff] %v6829_v29  ;;  %v6834_v59 = vsel %vm9802_vm14, 1.0, %v9628_v46  ;;  %v6839_v58 = vsel %vm9805_vm10, 1.0, %v9628_v46  ;;  %v9808_v63 = vunpack.c.l.b16 %v9807_v30  ;;  %v9811_v50 = vunpack.c.h.b16 %v9807_v30 }
 0x18c   : > { %9803 = vst [vmem:[#allocation44_spill] sm:$0xff] %v6834_v59  ;;  %9806 = vst [vmem:[#allocation45_spill] sm:$0xff] %v6839_v58  ;;  %v9815_v22 = vunpack.c.l.b16 %v9814_v36  ;;  %v9816_v59 = vmov 0  ;;  %v9818_v42 = vunpack.c.h.b16 %v9814_v36  ;;  %v9819_v58 = vmov 0 }
 0x18d   : > { %vm6843_vm13 = vcmp.ne.s32.totalorder %v9808_v63, 0  ;;  %vm6849_vm9 = vcmp.ne.s32.totalorder %v9811_v50, 0  ;;  %v6868_v63 = vsel %vm6369_vm7, 1.0, %v9628_v46  ;;  %v6873_v30 = vsel %vm6375_vm8, 1.0, %v9628_v46 }
 0x18e   : > { %vm6855_vm14 = vcmp.ne.s32.totalorder %v9815_v22, 0  ;;  %vm6861_vm10 = vcmp.ne.s32.totalorder %v9818_v42, 0  ;;  %9821 = vst [vmem:[#allocation36_spill] sm:$0xff] %v6868_v63  ;;  %9822 = vst [vmem:[#allocation39_spill] sm:$0xff] %v6873_v30  ;;  %v9823_v22 = vld [vmem:[#allocation46_spill] sm:$0xff]  ;;  %v9828_v42 = vld [vmem:[#allocation37_spill] sm:$0xff] }
 0x18f   : > { %v9817_v59 = vsel %vm6855_vm14, 4294967295, %v9816_v59  ;;  %v9820_v58 = vsel %vm6861_vm10, 4294967295, %v9819_v58  ;;  %vm9824_vm15 = vnez %v9823_v22  ;;  %vm9826_vm14 = vnez %v9614_v51  ;;  %v9835_v22 = vld [vmem:[#allocation40_spill] sm:$0xff] }
 0x190   : > { %v6878_v50 = vsel %vm9824_vm15, 1.0, %v9628_v46  ;;  %v6883_v36 = vsel %vm9826_vm14, 1.0, %v9628_v46  ;;  %v9829_v10 = vunpack.c.l.b16 %v9828_v42  ;;  %v9832_v57 = vunpack.c.h.b16 %v9828_v42 }
 0x191   : > { %9825 = vst [vmem:[#allocation46_spill] sm:$0xff] %v6878_v50  ;;  %9827 = vst [vmem:[#allocation70_spill] sm:$0xff] %v6883_v36  ;;  %v9836_v63 = vunpack.c.l.b16 %v9835_v22  ;;  %v9839_v51 = vunpack.c.h.b16 %v9835_v22  ;;  %v6917_v42 = vsel %vm6409_vm12, 1.0, %v9628_v46  ;;  %vm9842_vm15 = vnez %v9627_v35  ;;  %v9899_v22 = vld [vmem:[#allocation41_spill] sm:$0xff]  ;;  %v9906_v50 = vld [vmem:[#allocation47_spill] sm:$0xff] }
 0x192   : > { %vm6887_vm10 = vcmp.ne.s32.totalorder %v9829_v10, 0  ;;  %vm6893_vm7 = vcmp.ne.s32.totalorder %v9832_v57, 0  ;;  %v6912_v10 = vsel %vm6403_vm11, 1.0, %v9628_v46  ;;  %v6927_v57 = vsel %vm9842_vm15, 1.0, %v9628_v46 }
 0x193   : > { %vm6899_vm8 = vcmp.ne.s32.totalorder %v9836_v63, 0  ;;  %vm6905_vm14 = vcmp.ne.s32.totalorder %v9839_v51, 0  ;;  %v6922_v63 = vsel %vm6415_vm0, 1.0, %v9628_v46  ;;  %v6932_v38 = vsel %vm6447_vm1, 1.0, %v9628_v46 }
 0x194   : > { %v6937_v61 = vsel %vm6453_vm2, 1.0, %v9628_v46  ;;  %v6942_v31 = vsel %vm6459_vm3, 1.0, %v9628_v46  ;;  %v6947_v35 = vsel %vm6465_vm4, 1.0, %v9628_v46  ;;  %v6952_v34 = vsel %vm6491_vm5, 1.0, %v9628_v46 }
 0x195   : > { %v6957_v3 = vsel %vm6497_vm6, 1.0, %v9628_v46  ;;  %vm9843_vm11 = vnez %v9654_v13  ;;  %vm9844_vm12 = vnez %v9657_v9  ;;  %vm9845_vm0 = vnez %v9664_v14 }
 0x196   : > { %v6962_v15 = vsel %vm9843_vm11, 1.0, %v9628_v46  ;;  %v6967_v48 = vsel %vm9844_vm12, 1.0, %v9628_v46  ;;  %v6972_v49 = vsel %vm9845_vm0, 1.0, %v9628_v46  ;;  %vm9846_vm1 = vnez %v9667_v43 }
 0x197   : > { %v6977_v2 = vsel %vm9846_vm1, 1.0, %v9628_v46  ;;  %vm9847_vm2 = vnez %v9670_v47  ;;  %vm9848_vm3 = vnez %v9673_v39  ;;  %vm9849_vm4 = vnez %v9683_v52 }
 0x198   : > { %v6982_v13 = vsel %vm9847_vm2, 1.0, %v9628_v46  ;;  %v6987_v9 = vsel %vm9848_vm3, 1.0, %v9628_v46  ;;  %v6992_v14 = vsel %vm9849_vm4, 1.0, %v9628_v46  ;;  %vm9850_vm5 = vnez %v9686_v20 }
 0x199   : > { %v6997_v43 = vsel %vm9850_vm5, 1.0, %v9628_v46  ;;  %vm9851_vm6 = vnez %v9689_v62  ;;  %vm9852_vm15 = vnez %v9692_v19  ;;  %vm9854_vm11 = vnez %v9701_v56 }
 0x19a   : > { %v7002_v47 = vsel %vm9851_vm6, 1.0, %v9628_v46  ;;  %v7007_v39 = vsel %vm9852_vm15, 1.0, %v9628_v46  ;;  %v7012_v52 = vsel %vm9854_vm11, 1.0, %v9628_v46  ;;  %vm9855_vm12 = vnez %v9704_v25 }
 0x19b   : > { %9853 = vst [vmem:[#allocation37_spill] sm:$0xff] %v7007_v39  ;;  %v7017_v20 = vsel %vm9855_vm12, 1.0, %v9628_v46  ;;  %vm9856_vm0 = vnez %v9707_v12  ;;  %vm9857_vm1 = vnez %v9710_v41  ;;  %vm9858_vm2 = vnez %v9721_v37 }
 0x19c   : > { %v7022_v62 = vsel %vm9856_vm0, 1.0, %v9628_v46  ;;  %v7027_v19 = vsel %vm9857_vm1, 1.0, %v9628_v46  ;;  %v7032_v56 = vsel %vm9858_vm2, 1.0, %v9628_v46  ;;  %vm9859_vm3 = vnez %v9724_v28 }
 0x19d   : > { %v7037_v25 = vsel %vm9859_vm3, 1.0, %v9628_v46  ;;  %vm9861_vm4 = vnez %v9727_v16  ;;  %vm9863_vm5 = vnez %v9730_v32  ;;  %vm9865_vm6 = vnez %v9741_v45 }
 0x19e   : > { %9860 = vst [vmem:[#allocation40_spill] sm:$0xff] %v7037_v25  ;;  %v7042_v12 = vsel %vm9861_vm4, 1.0, %v9628_v46  ;;  %v7047_v41 = vsel %vm9863_vm5, 1.0, %v9628_v46  ;;  %v7052_v37 = vsel %vm9865_vm6, 1.0, %v9628_v46  ;;  %vm9867_vm15 = vnez %v9744_v60 }
 0x19f   : > { %9862 = vst [vmem:[#allocation71_spill] sm:$0xff] %v7042_v12  ;;  %9864 = vst [vmem:[#allocation72_spill] sm:$0xff] %v7047_v41  ;;  %v7057_v28 = vsel %vm9867_vm15, 1.0, %v9628_v46  ;;  %vm9869_vm11 = vnez %v9747_v26  ;;  %vm9871_vm12 = vnez %v9750_v11  ;;  %vm9873_vm0 = vnez %v9762_v55 }
 0x1a0   : > { %9866 = vst [vmem:[#allocation73_spill] sm:$0xff] %v7052_v37  ;;  %9868 = vst [vmem:[#allocation74_spill] sm:$0xff] %v7057_v28  ;;  %v7062_v16 = vsel %vm9869_vm11, 1.0, %v9628_v46  ;;  %v7067_v32 = vsel %vm9871_vm12, 1.0, %v9628_v46  ;;  %v7072_v45 = vsel %vm9873_vm0, 1.0, %v9628_v46  ;;  %vm9875_vm1 = vnez %v9765_v54 }
 0x1a1   : > { %9870 = vst [vmem:[#allocation75_spill] sm:$0xff] %v7062_v16  ;;  %9872 = vst [vmem:[#allocation76_spill] sm:$0xff] %v7067_v32  ;;  %v7077_v60 = vsel %vm9875_vm1, 1.0, %v9628_v46  ;;  %vm9877_vm2 = vnez %v9769_v40  ;;  %vm9879_vm3 = vnez %v9772_v27  ;;  %vm9881_vm4 = vnez %v9786_v8 }
 0x1a2   : > { %9874 = vst [vmem:[#allocation77_spill] sm:$0xff] %v7072_v45  ;;  %9876 = vst [vmem:[#allocation78_spill] sm:$0xff] %v7077_v60  ;;  %v7082_v26 = vsel %vm9877_vm2, 1.0, %v9628_v46  ;;  %v7087_v11 = vsel %vm9879_vm3, 1.0, %v9628_v46  ;;  %v7092_v55 = vsel %vm9881_vm4, 1.0, %v9628_v46  ;;  %vm9883_vm5 = vnez %v9789_v5 }
 0x1a3   : > { %9878 = vst [vmem:[#allocation79_spill] sm:$0xff] %v7082_v26  ;;  %9880 = vst [vmem:[#allocation80_spill] sm:$0xff] %v7087_v11  ;;  %v7097_v54 = vsel %vm9883_vm5, 1.0, %v9628_v46  ;;  %vm9885_vm6 = vnez %v9793_v44  ;;  %vm9887_vm15 = vnez %v9796_v7  ;;  %v7112_v8 = vsel %vm6843_vm13, 1.0, %v9628_v46 }
 0x1a4   : > { %9882 = vst [vmem:[#allocation81_spill] sm:$0xff] %v7092_v55  ;;  %9884 = vst [vmem:[#allocation82_spill] sm:$0xff] %v7097_v54  ;;  %v7102_v40 = vsel %vm9885_vm6, 1.0, %v9628_v46  ;;  %v7107_v27 = vsel %vm9887_vm15, 1.0, %v9628_v46  ;;  %v7117_v5 = vsel %vm6849_vm9, 1.0, %v9628_v46  ;;  %vm9891_vm11 = vnez %v9817_v59  ;;  %v9913_v54 = vld [vmem:[#allocation52_spill] sm:$0xff] }
 0x1a5   : > { %9886 = vst [vmem:[#allocation83_spill] sm:$0xff] %v7102_v40  ;;  %9888 = vst [vmem:[#allocation84_spill] sm:$0xff] %v7107_v27  ;;  %v7122_v44 = vsel %vm9891_vm11, 1.0, %v9628_v46  ;;  %vm9893_vm12 = vnez %v9820_v58  ;;  %v7132_v0 = vsel %vm6887_vm10, 1.0, %v9628_v46  ;;  %v7137_v29 = vsel %vm6893_vm7, 1.0, %v9628_v46 }
 0x1a6   : > { %9889 = vst [vmem:[#allocation85_spill] sm:$0xff] %v7112_v8  ;;  %9890 = vst [vmem:[#allocation86_spill] sm:$0xff] %v7117_v5  ;;  %v7127_v7 = vsel %vm9893_vm12, 1.0, %v9628_v46  ;;  %v7142_v59 = vsel %vm6899_vm8, 1.0, %v9628_v46  ;;  %v7147_v58 = vsel %vm6905_vm14, 1.0, %v9628_v46  ;;  %v9900_v51 = vunpack.c.l.b16 %v9899_v22 }
 0x1a7   : > { %9892 = vst [vmem:[#allocation87_spill] sm:$0xff] %v7122_v44  ;;  %9894 = vst [vmem:[#allocation88_spill] sm:$0xff] %v7127_v7  ;;  %v9903_v30 = vunpack.c.h.b16 %v9899_v22  ;;  %v1507_v44 = vadd.f32 %v6472_v18, %v9906_v50  ;;  %v1514_v36 = vadd.f32 %v6477_v17, %v6399_v1  ;;  %v9911_v22 = vld [vmem:[#allocation48_spill] sm:$0xff]  ;;  %v1556_v18 = vadd.f32 %v6609_v6, %v9913_v54 }
 0x1a8   : > { %9895 = vst [vmem:[#allocation89_spill] sm:$0xff] %v7132_v0  ;;  %9896 = vst [vmem:[#allocation90_spill] sm:$0xff] %v7137_v29  ;;  %vm7151_vm13 = vcmp.ne.s32.totalorder %v9900_v51, 0  ;;  %v9909_v51 = vld [vmem:[#allocation50_spill] sm:$0xff]  ;;  %v9910_v29 = vld [vmem:[#allocation33_spill] sm:$0xff]  ;;  %vm9986_vm10 = vcmask 1041409  }
 0x1a9   : > { %9897 = vst [vmem:[#allocation91_spill] sm:$0xff] %v7142_v59  ;;  %9898 = vst [vmem:[#allocation92_spill] sm:$0xff] %v7147_v58  ;;  %vm7157_vm9 = vcmp.ne.s32.totalorder %v9903_v30, 0  ;;  %v9907_v58 = vld [vmem:[#allocation49_spill] sm:$0xff]  ;;  %v9908_v59 = vld [vmem:[#allocation31_spill] sm:$0xff]  ;;  %v1535_v27 = vadd.f32 %v6516_v21, %v9910_v29  ;;  %v1542_v30 = vadd.f32 %v6521_v24, %v9911_v22  ;;  %v1508_v50 = vrot.slane %v1507_v44, 4 }
 0x1aa   : > { %v1521_v5 = vadd.f32 %v9907_v58, %v6428_v33  ;;  %v1528_v8 = vadd.f32 %v9909_v51, %v9908_v59  ;;  %v9912_v0 = vld [vmem:[#allocation51_spill] sm:$0xff]  ;;  %v1515_v1 = vrot.slane %v1514_v36, 4  ;;  %v1557_v59 = vrot.slane %v1556_v18, 4  ;;  %v9922_v7 = vld [vmem:[#allocation56_spill] sm:$0xff]  ;;  %vm9988_vm7 = vmmov %vm9986_vm10 }
 0x1ab   : > { %v1549_v40 = vadd.f32 %v6604_v53, %v9912_v0  ;;  %v1536_v33 = vrot.slane %v1535_v27, 4  ;;  %v1543_v58 = vrot.slane %v1542_v30, 4  ;;  %v1509_v51 = vadd.f32 %v1508_v50, %v1507_v44  ;;  %vm9991_vm8 = vmmov %vm9988_vm7 }
 0x1ac   : > { %v1522_v17 = vrot.slane %v1521_v5, 4  ;;  %v1529_v32 = vrot.slane %v1528_v8, 4  ;;  %v1516_v16 = vadd.f32 %v1515_v1, %v1514_v36  ;;  %v1558_v28 = vadd.f32 %v1557_v59, %v1556_v18  ;;  %v9926_v59 = vld [vmem:[#allocation58_spill] sm:$0xff]  ;;  %vm9994_vm14 = vmmov %vm9988_vm7 }
 0x1ad   : > { %v1550_v55 = vrot.slane %v1549_v40, 4  ;;  %v1537_v11 = vadd.f32 %v1536_v33, %v1535_v27  ;;  %v1544_v24 = vadd.f32 %v1543_v58, %v1542_v30  ;;  %v1510_v53 = vrot.slane %v1509_v51, 2  ;;  %v9924_v33 = vld [vmem:[#allocation57_spill] sm:$0xff] }
 0x1ae   : > { %v1523_v21 = vadd.f32 %v1522_v17, %v1521_v5  ;;  %v1530_v29 = vadd.f32 %v1529_v32, %v1528_v8  ;;  %v1517_v0 = vrot.slane %v1516_v16, 2  ;;  %v1559_v41 = vrot.slane %v1558_v28, 2  ;;  %v9923_v17 = vld [vmem:[#allocation53_spill] sm:$0xff] }
 0x1af   : > { %v1551_v22 = vadd.f32 %v1550_v55, %v1549_v40  ;;  %v1538_v54 = vrot.slane %v1537_v11, 2  ;;  %v1545_v37 = vrot.slane %v1544_v24, 2  ;;  %v1511_v45 = vadd.f32 %v1510_v53, %v1509_v51  ;;  %v9927_v51 = vld [vmem:[#allocation55_spill] sm:$0xff] }
 0x1b0   : > { %v1524_v26 = vrot.slane %v1523_v21, 2  ;;  %v1531_v6 = vrot.slane %v1530_v29, 2  ;;  %v1518_v12 = vadd.f32 %v1517_v0, %v1516_v16  ;;  %v1560_v32 = vadd.f32 %v1559_v41, %v1558_v28  ;;  %v9932_v53 = vld [vmem:[#allocation67_spill] sm:$0xff] }
 0x1b1   : > { %v1552_v60 = vrot.slane %v1551_v22, 2  ;;  %v1539_v44 = vadd.f32 %v1538_v54, %v1537_v11  ;;  %v1546_v36 = vadd.f32 %v1545_v37, %v1544_v24  ;;  %v1512_v27 = vrot.slane %v1511_v45, 1  ;;  %v9930_v24 = vld [vmem:[#allocation66_spill] sm:$0xff]  ;;  %v9934_v54 = vld [vmem:[#allocation68_spill] sm:$0xff] }
 0x1b2   : > { %v1525_v25 = vadd.f32 %v1524_v26, %v1523_v21  ;;  %v1532_v39 = vadd.f32 %v1531_v6, %v1530_v29  ;;  %v1519_v8 = vrot.slane %v1518_v12, 1  ;;  %v7180_v30 = vsel %vm7151_vm13, 1.0, %v9628_v46  ;;  %v9928_v21 = vld [vmem:[#allocation59_spill] sm:$0xff]  ;;  %v9933_v6 = vld [vmem:[#allocation62_spill] sm:$0xff] }
 0x1b3   : > { %v1553_v5 = vadd.f32 %v1552_v60, %v1551_v22  ;;  %9914 = vst [vmem:[#allocation41_spill] sm:$0xff] %v7180_v30  ;;  %v7185_v18 = vsel %vm7157_vm9, 1.0, %v9628_v46  ;;  %v1540_v16 = vrot.slane %v1539_v44, 1  ;;  %v1547_v26 = vrot.slane %v1546_v36, 1  ;;  %v9931_v22 = vld [vmem:[#allocation61_spill] sm:$0xff] }
 0x1b4   : > { %v1526_v55 = vrot.slane %v1525_v25, 1  ;;  %v1533_v40 = vrot.slane %v1532_v39, 1  ;;  %9915 = vst [vmem:[#allocation47_spill] sm:$0xff] %v7185_v18  ;;  %v7187_v11 = vadd.f32 %v1512_v27, %v1511_v45  ;;  %v7189_v37 = vadd.f32 %v1519_v8, %v1518_v12  ;;  %v9925_v45 = vld [vmem:[#allocation54_spill] sm:$0xff] }
 0x1b5   : > { %v1554_v41 = vrot.slane %v1553_v5, 1  ;;  %v1561_v28 = vrot.slane %v1560_v32, 1  ;;  %v7195_v23 = vadd.f32 %v1540_v16, %v1539_v44  ;;  %v7197_v1 = vadd.f32 %v1547_v26, %v1546_v36  ;;  %v9935_v36 = vld [vmem:[#allocation63_spill] sm:$0xff] }
 0x1b6   : > { %9916 = vst [vmem:[#allocation49_spill] sm:$0xff] %v7187_v11  ;;  %9917 = vst [vmem:[#allocation31_spill] sm:$0xff] %v7189_v37  ;;  %v7191_v60 = vadd.f32 %v1526_v55, %v1525_v25  ;;  %v7193_v50 = vadd.f32 %v1533_v40, %v1532_v39  ;;  %v1563_v46 = vadd.f32 %v9922_v7, %v6560_v4  ;;  %v9929_v25 = vld [vmem:[#allocation60_spill] sm:$0xff]  ;;  %v9936_v4 = vld [vmem:[#allocation69_spill] sm:$0xff]  ;;  %vm9996_vm0 = vcmask 1042434  }
 0x1b7   : > { %9920 = vst [vmem:[#allocation48_spill] sm:$0xff] %v7195_v23  ;;  %9921 = vst [vmem:[#allocation51_spill] sm:$0xff] %v7197_v1  ;;  %v1570_v58 = vadd.f32 %v9924_v33, %v9923_v17  ;;  %v1577_v12 = vadd.f32 %v9926_v59, %v9925_v45  ;;  %v1584_v29 = vadd.f32 %v9928_v21, %v9927_v51  ;;  %vm10001_vm4 = vcmask 1043459  }
 0x1b8   : > { %9918 = vst [vmem:[#allocation50_spill] sm:$0xff] %v7191_v60  ;;  %9919 = vst [vmem:[#allocation33_spill] sm:$0xff] %v7193_v50  ;;  %v1591_v39 = vadd.f32 %v9930_v24, %v9929_v25  ;;  %v1598_v0 = vadd.f32 %v9932_v53, %v9931_v22  ;;  %v1605_v44 = vadd.f32 %v9934_v54, %v9933_v6  ;;  %v1564_v8 = vrot.slane %v1563_v46, 4 }
 0x1b9   : > { %v1612_v27 = vadd.f32 %v9936_v4, %v9935_v36  ;;  %v1571_v55 = vrot.slane %v1570_v58, 4  ;;  %v1578_v40 = vrot.slane %v1577_v12, 4  ;;  %v1585_v16 = vrot.slane %v1584_v29, 4  ;;  %vm9998_vm1 = vmmov %vm9996_vm0 }
 0x1ba   : > { %v1592_v26 = vrot.slane %v1591_v39, 4  ;;  %v1599_v7 = vrot.slane %v1598_v0, 4  ;;  %v1606_v17 = vrot.slane %v1605_v44, 4  ;;  %v1565_v45 = vadd.f32 %v1564_v8, %v1563_v46  ;;  %vm9999_vm2 = vmmov %vm9996_vm0 }
 0x1bb   : > { %v1613_v33 = vrot.slane %v1612_v27, 4  ;;  %v1572_v59 = vadd.f32 %v1571_v55, %v1570_v58  ;;  %v1579_v51 = vadd.f32 %v1578_v40, %v1577_v12  ;;  %v1586_v21 = vadd.f32 %v1585_v16, %v1584_v29  ;;  %vm10000_vm3 = vmmov %vm9996_vm0 }
 0x1bc   : > { %v1593_v25 = vadd.f32 %v1592_v26, %v1591_v39  ;;  %v1600_v24 = vadd.f32 %v1599_v7, %v1598_v0  ;;  %v1607_v22 = vadd.f32 %v1606_v17, %v1605_v44  ;;  %v1566_v6 = vrot.slane %v1565_v45, 2  ;;  %vm10002_vm5 = vmmov %vm10001_vm4 }
 0x1bd   : > { %v1614_v53 = vadd.f32 %v1613_v33, %v1612_v27  ;;  %v1573_v54 = vrot.slane %v1572_v59, 2  ;;  %v1580_v1 = vrot.slane %v1579_v51, 2  ;;  %v1587_v36 = vrot.slane %v1586_v21, 2  ;;  %vm10003_vm6 = vmmov %vm10001_vm4 }
 0x1be   : > { %v1594_v4 = vrot.slane %v1593_v25, 2  ;;  %v1601_v23 = vrot.slane %v1600_v24, 2  ;;  %v1608_v50 = vrot.slane %v1607_v22, 2  ;;  %v1567_v37 = vadd.f32 %v1566_v6, %v1565_v45  ;;  %v9946_v45 = vld [vmem:[#allocation34_spill] sm:$0xff]  ;;  %vm10004_vm15 = vmmov %vm10001_vm4 }
 0x1bf   : > { %v1615_v60 = vrot.slane %v1614_v53, 2  ;;  %v1574_v11 = vadd.f32 %v1573_v54, %v1572_v59  ;;  %v1581_v18 = vadd.f32 %v1580_v1, %v1579_v51  ;;  %v1588_v30 = vadd.f32 %v1587_v36, %v1586_v21  ;;  %v9948_v51 = vld [vmem:[#allocation36_spill] sm:$0xff]  ;;  %v9949_v21 = vld [vmem:[#allocation43_spill] sm:$0xff]  ;;  %v9954_v6 = vld [vmem:[#allocation70_spill] sm:$0xff] }
 0x1c0   : > { %v1595_v46 = vadd.f32 %v1594_v4, %v1593_v25  ;;  %v1602_v58 = vadd.f32 %v1601_v23, %v1600_v24  ;;  %v1609_v12 = vadd.f32 %v1608_v50, %v1607_v22  ;;  %v1568_v39 = vrot.slane %v1567_v37, 1  ;;  %v9950_v25 = vld [vmem:[#allocation39_spill] sm:$0xff]  ;;  %v9952_v22 = vld [vmem:[#allocation46_spill] sm:$0xff]  ;;  %v9955_v36 = vld [vmem:[#allocation44_spill] sm:$0xff] }
 0x1c1   : > { %v1616_v29 = vadd.f32 %v1615_v60, %v1614_v53  ;;  %v1575_v0 = vrot.slane %v1574_v11, 1  ;;  %v1582_v44 = vrot.slane %v1581_v18, 1  ;;  %v1589_v27 = vrot.slane %v1588_v30, 1  ;;  %v9953_v53 = vld [vmem:[#allocation38_spill] sm:$0xff] }
 0x1c2   : > { %v7215_v8 = vadd.f32 %v1554_v41, %v1553_v5  ;;  %v7217_v55 = vadd.f32 %v1561_v28, %v1560_v32  ;;  %v1596_v40 = vrot.slane %v1595_v46, 1  ;;  %v1603_v16 = vrot.slane %v1602_v58, 1  ;;  %v9943_v5 = vld [vmem:[#allocation64_spill] sm:$0xff]  ;;  %v9945_v28 = vld [vmem:[#allocation65_spill] sm:$0xff] }
 0x1c3   : > { %v7219_v26 = vadd.f32 %v1568_v39, %v1567_v37  ;;  %v7221_v7 = vadd.f32 %v1575_v0, %v1574_v11  ;;  %v1610_v1 = vrot.slane %v1609_v12, 1  ;;  %v1617_v17 = vrot.slane %v1616_v29, 1  ;;  %v9944_v41 = vld [vmem:[#allocation32_spill] sm:$0xff]  ;;  %v9947_v37 = vld [vmem:[#allocation42_spill] sm:$0xff] }
 0x1c4   : > { %v7223_v33 = vadd.f32 %v1582_v44, %v1581_v18  ;;  %v7225_v50 = vadd.f32 %v1589_v27, %v1588_v30  ;;  %v7227_v60 = vadd.f32 %v1596_v40, %v1595_v46  ;;  %v7229_v23 = vadd.f32 %v1603_v16, %v1602_v58  ;;  %v9951_v18 = vld [vmem:[#allocation35_spill] sm:$0xff]  ;;  %v9956_v46 = vld [vmem:[#allocation45_spill] sm:$0xff] }
 0x1c5   : > { %9937 = vst [vmem:[#allocation52_spill] sm:$0xff] %v7219_v26  ;;  %9938 = vst [vmem:[#allocation56_spill] sm:$0xff] %v7221_v7  ;;  %v1619_v32 = vadd.f32 %v9944_v41, %v9943_v5  ;;  %v1626_v59 = vadd.f32 %v9946_v45, %v9945_v28  ;;  %v1633_v11 = vadd.f32 %v9948_v51, %v9947_v37  ;;  %vm10005_vm11 = vcmask 1044484  }
 0x1c6   : > { %9939 = vst [vmem:[#allocation53_spill] sm:$0xff] %v7223_v33  ;;  %9940 = vst [vmem:[#allocation57_spill] sm:$0xff] %v7225_v50  ;;  %v1640_v24 = vadd.f32 %v9950_v25, %v9949_v21  ;;  %v1647_v30 = vadd.f32 %v9952_v22, %v9951_v18  ;;  %v1654_v54 = vadd.f32 %v9954_v6, %v9953_v53 }
 0x1c7   : > { %9941 = vst [vmem:[#allocation54_spill] sm:$0xff] %v7227_v60  ;;  %9942 = vst [vmem:[#allocation58_spill] sm:$0xff] %v7229_v23  ;;  %v1661_v4 = vadd.f32 %v6912_v10, %v9955_v36  ;;  %v1668_v58 = vadd.f32 %v6917_v42, %v9956_v46  ;;  %v1620_v39 = vrot.slane %v1619_v32, 4  ;;  %v1627_v0 = vrot.slane %v1626_v59, 4 }
 0x1c8   : > { %v1634_v44 = vrot.slane %v1633_v11, 4  ;;  %v1641_v27 = vrot.slane %v1640_v24, 4  ;;  %v1648_v40 = vrot.slane %v1647_v30, 4  ;;  %v1655_v16 = vrot.slane %v1654_v54, 4  ;;  %vm10006_vm12 = vmmov %vm10005_vm11 }
 0x1c9   : > { %v1662_v5 = vrot.slane %v1661_v4, 4  ;;  %v1669_v41 = vrot.slane %v1668_v58, 4  ;;  %v1621_v28 = vadd.f32 %v1620_v39, %v1619_v32  ;;  %v1628_v45 = vadd.f32 %v1627_v0, %v1626_v59  ;;  %vm10007_vm13 = vmmov %vm10005_vm11 }
 0x1ca   : > { %v1635_v37 = vadd.f32 %v1634_v44, %v1633_v11  ;;  %v1642_v51 = vadd.f32 %v1641_v27, %v1640_v24  ;;  %v1649_v21 = vadd.f32 %v1648_v40, %v1647_v30  ;;  %v1656_v25 = vadd.f32 %v1655_v16, %v1654_v54  ;;  %vm10008_vm9 = vmmov %vm10005_vm11 }
 0x1cb   : > { %v1663_v18 = vadd.f32 %v1662_v5, %v1661_v4  ;;  %v1670_v22 = vadd.f32 %v1669_v41, %v1668_v58  ;;  %v1622_v10 = vrot.slane %v1621_v28, 2  ;;  %v1629_v53 = vrot.slane %v1628_v45, 2 }
 0x1cc   : > { %v1636_v6 = vrot.slane %v1635_v37, 2  ;;  %v1643_v42 = vrot.slane %v1642_v51, 2  ;;  %v1650_v36 = vrot.slane %v1649_v21, 2  ;;  %v1657_v46 = vrot.slane %v1656_v25, 2 }
 0x1cd   : > { %v1664_v50 = vrot.slane %v1663_v18, 2  ;;  %v1671_v33 = vrot.slane %v1670_v22, 2  ;;  %v1623_v23 = vadd.f32 %v1622_v10, %v1621_v28  ;;  %v1630_v60 = vadd.f32 %v1629_v53, %v1628_v45 }
 0x1ce   : > { %v1637_v7 = vadd.f32 %v1636_v6, %v1635_v37  ;;  %v1644_v26 = vadd.f32 %v1643_v42, %v1642_v51  ;;  %v1651_v32 = vadd.f32 %v1650_v36, %v1649_v21  ;;  %v1658_v59 = vadd.f32 %v1657_v46, %v1656_v25 }
 0x1cf   : > { %v1665_v11 = vadd.f32 %v1664_v50, %v1663_v18  ;;  %v1672_v24 = vadd.f32 %v1671_v33, %v1670_v22  ;;  %v1624_v30 = vrot.slane %v1623_v23, 1  ;;  %v1631_v54 = vrot.slane %v1630_v60, 1 }
 0x1d0   : > { %v1638_v4 = vrot.slane %v1637_v7, 1  ;;  %v1645_v58 = vrot.slane %v1644_v26, 1  ;;  %v7247_v39 = vadd.f32 %v1610_v1, %v1609_v12  ;;  %v7249_v0 = vadd.f32 %v1617_v17, %v1616_v29 }
 0x1d1   : > { %v1652_v44 = vrot.slane %v1651_v32, 1  ;;  %v1659_v27 = vrot.slane %v1658_v59, 1  ;;  %v7251_v40 = vadd.f32 %v1624_v30, %v1623_v23  ;;  %v7253_v16 = vadd.f32 %v1631_v54, %v1630_v60 }
 0x1d2   : > { %v1666_v5 = vrot.slane %v1665_v11, 1  ;;  %v1673_v41 = vrot.slane %v1672_v24, 1  ;;  %v7255_v28 = vadd.f32 %v1638_v4, %v1637_v7  ;;  %v7257_v50 = vadd.f32 %v1645_v58, %v1644_v26 }
 0x1d3   : > { %v7259_v33 = vadd.f32 %v1652_v44, %v1651_v32  ;;  %v7261_v45 = vadd.f32 %v1659_v27, %v1658_v59  ;;  %v1675_v12 = vadd.f32 %v6952_v34, %v6922_v63  ;;  %v1682_v29 = vadd.f32 %v6957_v3, %v6927_v57 }
 0x1d4   : > { %v1689_v1 = vadd.f32 %v6962_v15, %v6932_v38  ;;  %v1696_v17 = vadd.f32 %v6967_v48, %v6937_v61  ;;  %v1703_v26 = vadd.f32 %v6972_v49, %v6942_v31  ;;  %v1710_v7 = vadd.f32 %v6977_v2, %v6947_v35 }
 0x1d5   : > { %v1717_v60 = vadd.f32 %v7012_v52, %v6982_v13  ;;  %v1724_v63 = vadd.f32 %v7017_v20, %v6987_v9  ;;  %v1676_v34 = vrot.slane %v1675_v12, 4  ;;  %v1683_v57 = vrot.slane %v1682_v29, 4 }
 0x1d6   : > { %v1690_v3 = vrot.slane %v1689_v1, 4  ;;  %v1697_v23 = vrot.slane %v1696_v17, 4  ;;  %v1704_v38 = vrot.slane %v1703_v26, 4  ;;  %v1711_v15 = vrot.slane %v1710_v7, 4 }
 0x1d7   : > { %v1718_v37 = vrot.slane %v1717_v60, 4  ;;  %v1725_v61 = vrot.slane %v1724_v63, 4  ;;  %v1677_v48 = vadd.f32 %v1676_v34, %v1675_v12  ;;  %v1684_v51 = vadd.f32 %v1683_v57, %v1682_v29 }
 0x1d8   : > { %v1691_v31 = vadd.f32 %v1690_v3, %v1689_v1  ;;  %v1698_v49 = vadd.f32 %v1697_v23, %v1696_v17  ;;  %v1705_v21 = vadd.f32 %v1704_v38, %v1703_v26  ;;  %v1712_v35 = vadd.f32 %v1711_v15, %v1710_v7  ;;  %v9958_v38 = vld [vmem:[#allocation40_spill] sm:$0xff] }
 0x1d9   : > { %v1719_v2 = vadd.f32 %v1718_v37, %v1717_v60  ;;  %v1726_v25 = vadd.f32 %v1725_v61, %v1724_v63  ;;  %v1678_v13 = vrot.slane %v1677_v48, 2  ;;  %v1685_v52 = vrot.slane %v1684_v51, 2  ;;  %v9959_v37 = vld [vmem:[#allocation71_spill] sm:$0xff]  ;;  %v9960_v61 = vld [vmem:[#allocation77_spill] sm:$0xff] }
 0x1da   : > { %v1692_v18 = vrot.slane %v1691_v31, 2  ;;  %v1699_v9 = vrot.slane %v1698_v49, 2  ;;  %v1706_v20 = vrot.slane %v1705_v21, 2  ;;  %v1713_v22 = vrot.slane %v1712_v35, 2 }
 0x1db   : > { %v1720_v10 = vrot.slane %v1719_v2, 2  ;;  %v1727_v53 = vrot.slane %v1726_v25, 2  ;;  %v1679_v6 = vadd.f32 %v1678_v13, %v1677_v48  ;;  %v1686_v42 = vadd.f32 %v1685_v52, %v1684_v51  ;;  %v9961_v51 = vld [vmem:[#allocation72_spill] sm:$0xff] }
 0x1dc   : > { %v1693_v36 = vadd.f32 %v1692_v18, %v1691_v31  ;;  %v1700_v46 = vadd.f32 %v1699_v9, %v1698_v49  ;;  %v1707_v32 = vadd.f32 %v1706_v20, %v1705_v21  ;;  %v1714_v59 = vadd.f32 %v1713_v22, %v1712_v35  ;;  %v9962_v31 = vld [vmem:[#allocation78_spill] sm:$0xff]  ;;  %v9963_v21 = vld [vmem:[#allocation73_spill] sm:$0xff]  ;;  %v9964_v35 = vld [vmem:[#allocation79_spill] sm:$0xff] }
 0x1dd   : > { %v1721_v30 = vadd.f32 %v1720_v10, %v1719_v2  ;;  %v1728_v54 = vadd.f32 %v1727_v53, %v1726_v25  ;;  %v1680_v4 = vrot.slane %v1679_v6, 1  ;;  %v1687_v58 = vrot.slane %v1686_v42, 1  ;;  %v9965_v25 = vld [vmem:[#allocation74_spill] sm:$0xff] }
 0x1de   : > { %v1694_v44 = vrot.slane %v1693_v36, 1  ;;  %v1701_v27 = vrot.slane %v1700_v46, 1  ;;  %v7279_v12 = vadd.f32 %v1666_v5, %v1665_v11  ;;  %v7281_v29 = vadd.f32 %v1673_v41, %v1672_v24  ;;  %v9957_v41 = vld [vmem:[#allocation37_spill] sm:$0xff] }
 0x1df   : > { %v1708_v1 = vrot.slane %v1707_v32, 1  ;;  %v1715_v17 = vrot.slane %v1714_v59, 1  ;;  %v7283_v26 = vadd.f32 %v1680_v4, %v1679_v6  ;;  %v7285_v7 = vadd.f32 %v1687_v58, %v1686_v42 }
 0x1e0   : > { %v1722_v60 = vrot.slane %v1721_v30, 1  ;;  %v1729_v63 = vrot.slane %v1728_v54, 1  ;;  %v7287_v34 = vadd.f32 %v1694_v44, %v1693_v36  ;;  %v7289_v57 = vadd.f32 %v1701_v27, %v1700_v46 }
 0x1e1   : > { %v7291_v3 = vadd.f32 %v1708_v1, %v1707_v32  ;;  %v7293_v23 = vadd.f32 %v1715_v17, %v1714_v59  ;;  %v1731_v11 = vadd.f32 %v7022_v62, %v6992_v14  ;;  %v1738_v24 = vadd.f32 %v7027_v19, %v6997_v43  ;;  %v9966_v14 = vld [vmem:[#allocation80_spill] sm:$0xff] }
 0x1e2   : > { %v1745_v5 = vadd.f32 %v7032_v56, %v7002_v47  ;;  %v1752_v15 = vadd.f32 %v9958_v38, %v9957_v41  ;;  %v1759_v48 = vadd.f32 %v9960_v61, %v9959_v37  ;;  %v1766_v49 = vadd.f32 %v9962_v31, %v9961_v51 }
 0x1e3   : > { %v1773_v2 = vadd.f32 %v9964_v35, %v9963_v21  ;;  %v1780_v62 = vadd.f32 %v9966_v14, %v9965_v25  ;;  %v1732_v13 = vrot.slane %v1731_v11, 4  ;;  %v1739_v43 = vrot.slane %v1738_v24, 4 }
 0x1e4   : > { %v1746_v19 = vrot.slane %v1745_v5, 4  ;;  %v1753_v52 = vrot.slane %v1752_v15, 4  ;;  %v1760_v47 = vrot.slane %v1759_v48, 4  ;;  %v1767_v56 = vrot.slane %v1766_v49, 4 }
 0x1e5   : > { %v1774_v18 = vrot.slane %v1773_v2, 4  ;;  %v1781_v9 = vrot.slane %v1780_v62, 4  ;;  %v1733_v20 = vadd.f32 %v1732_v13, %v1731_v11  ;;  %v1740_v22 = vadd.f32 %v1739_v43, %v1738_v24 }
 0x1e6   : > { %v1747_v10 = vadd.f32 %v1746_v19, %v1745_v5  ;;  %v1754_v53 = vadd.f32 %v1753_v52, %v1752_v15  ;;  %v1761_v6 = vadd.f32 %v1760_v47, %v1759_v48  ;;  %v1768_v42 = vadd.f32 %v1767_v56, %v1766_v49 }
 0x1e7   : > { %v1775_v36 = vadd.f32 %v1774_v18, %v1773_v2  ;;  %v1782_v46 = vadd.f32 %v1781_v9, %v1780_v62  ;;  %v1734_v32 = vrot.slane %v1733_v20, 2  ;;  %v1741_v59 = vrot.slane %v1740_v22, 2  ;;  %v9972_v18 = vld [vmem:[#allocation82_spill] sm:$0xff] }
 0x1e8   : > { %v1748_v4 = vrot.slane %v1747_v10, 2  ;;  %v1755_v58 = vrot.slane %v1754_v53, 2  ;;  %v1762_v44 = vrot.slane %v1761_v6, 2  ;;  %v1769_v27 = vrot.slane %v1768_v42, 2 }
 0x1e9   : > { %v1776_v1 = vrot.slane %v1775_v36, 2  ;;  %v1783_v17 = vrot.slane %v1782_v46, 2  ;;  %v1735_v41 = vadd.f32 %v1734_v32, %v1733_v20  ;;  %v1742_v38 = vadd.f32 %v1741_v59, %v1740_v22  ;;  %v9973_v20 = vld [vmem:[#allocation83_spill] sm:$0xff]  ;;  %v9974_v22 = vld [vmem:[#allocation89_spill] sm:$0xff]  ;;  %v9979_v59 = vld [vmem:[#allocation86_spill] sm:$0xff] }
 0x1ea   : > { %v1749_v37 = vadd.f32 %v1748_v4, %v1747_v10  ;;  %v1756_v61 = vadd.f32 %v1755_v58, %v1754_v53  ;;  %v1763_v11 = vadd.f32 %v1762_v44, %v1761_v6  ;;  %v1770_v24 = vadd.f32 %v1769_v27, %v1768_v42  ;;  %v9975_v53 = vld [vmem:[#allocation84_spill] sm:$0xff]  ;;  %v9976_v6 = vld [vmem:[#allocation90_spill] sm:$0xff]  ;;  %v9981_v44 = vld [vmem:[#allocation87_spill] sm:$0xff] }
 0x1eb   : > { %v1777_v5 = vadd.f32 %v1776_v1, %v1775_v36  ;;  %v1784_v15 = vadd.f32 %v1783_v17, %v1782_v46  ;;  %v1736_v48 = vrot.slane %v1735_v41, 1  ;;  %v1743_v51 = vrot.slane %v1742_v38, 1  ;;  %v9977_v36 = vld [vmem:[#allocation85_spill] sm:$0xff]  ;;  %v9978_v46 = vld [vmem:[#allocation91_spill] sm:$0xff]  ;;  %v9980_v4 = vld [vmem:[#allocation92_spill] sm:$0xff] }
 0x1ec   : > { %v1750_v31 = vrot.slane %v1749_v37, 1  ;;  %v1757_v49 = vrot.slane %v1756_v61, 1  ;;  %v7311_v21 = vadd.f32 %v1722_v60, %v1721_v30  ;;  %v7313_v35 = vadd.f32 %v1729_v63, %v1728_v54  ;;  %v9969_v30 = vld [vmem:[#allocation75_spill] sm:$0xff]  ;;  %v9970_v60 = vld [vmem:[#allocation81_spill] sm:$0xff]  ;;  %v9971_v63 = vld [vmem:[#allocation76_spill] sm:$0xff] }
 0x1ed   : > { %v1764_v2 = vrot.slane %v1763_v11, 1  ;;  %v1771_v25 = vrot.slane %v1770_v24, 1  ;;  %v7315_v14 = vadd.f32 %v1736_v48, %v1735_v41  ;;  %v7317_v62 = vadd.f32 %v1743_v51, %v1742_v38  ;;  %v9982_v27 = vld [vmem:[#allocation41_spill] sm:$0xff]  ;;  %v9983_v17 = vld [vmem:[#allocation88_spill] sm:$0xff]  ;;  %v9984_v41 = vld [vmem:[#allocation47_spill] sm:$0xff] }
 0x1ee   : > { %v1778_v13 = vrot.slane %v1777_v5, 1  ;;  %v1785_v43 = vrot.slane %v1784_v15, 1  ;;  %v7319_v19 = vadd.f32 %v1750_v31, %v1749_v37  ;;  %v7321_v52 = vadd.f32 %v1757_v49, %v1756_v61 }
 0x1ef   : > { %v7323_v47 = vadd.f32 %v1764_v2, %v1763_v11  ;;  %v7325_v56 = vadd.f32 %v1771_v25, %v1770_v24  ;;  %v1787_v54 = vadd.f32 %v9970_v60, %v9969_v30  ;;  %v1794_v9 = vadd.f32 %v9972_v18, %v9971_v63 }
 0x1f0   : > { %9967 = vst [vmem:[#allocation55_spill] sm:$0xff] %v7319_v19  ;;  %9968 = vst [vmem:[#allocation59_spill] sm:$0xff] %v7321_v52  ;;  %v1801_v10 = vadd.f32 %v9974_v22, %v9973_v20  ;;  %v1808_v42 = vadd.f32 %v9976_v6, %v9975_v53  ;;  %v1815_v32 = vadd.f32 %v9978_v46, %v9977_v36 }
 0x1f1   : > { %v1822_v58 = vadd.f32 %v9980_v4, %v9979_v59  ;;  %v1829_v1 = vadd.f32 %v9982_v27, %v9981_v44  ;;  %v1836_v38 = vadd.f32 %v9984_v41, %v9983_v17  ;;  %v1788_v37 = vrot.slane %v1787_v54, 4 }
 0x1f2   : > { %v1795_v61 = vrot.slane %v1794_v9, 4  ;;  %v1802_v11 = vrot.slane %v1801_v10, 4  ;;  %v1809_v24 = vrot.slane %v1808_v42, 4  ;;  %v1816_v48 = vrot.slane %v1815_v32, 4 }
 0x1f3   : > { %v1823_v51 = vrot.slane %v1822_v58, 4  ;;  %v1830_v31 = vrot.slane %v1829_v1, 4  ;;  %v1837_v49 = vrot.slane %v1836_v38, 4  ;;  %v1789_v2 = vadd.f32 %v1788_v37, %v1787_v54 }
 0x1f4   : > { %v1796_v25 = vadd.f32 %v1795_v61, %v1794_v9  ;;  %v1803_v30 = vadd.f32 %v1802_v11, %v1801_v10  ;;  %v1810_v60 = vadd.f32 %v1809_v24, %v1808_v42  ;;  %v1817_v63 = vadd.f32 %v1816_v48, %v1815_v32 }
 0x1f5   : > { %v1824_v18 = vadd.f32 %v1823_v51, %v1822_v58  ;;  %v1831_v20 = vadd.f32 %v1830_v31, %v1829_v1  ;;  %v1838_v22 = vadd.f32 %v1837_v49, %v1836_v38  ;;  %v1790_v53 = vrot.slane %v1789_v2, 2 }
 0x1f6   : > { %v1797_v6 = vrot.slane %v1796_v25, 2  ;;  %v1804_v36 = vrot.slane %v1803_v30, 2  ;;  %v1811_v46 = vrot.slane %v1810_v60, 2  ;;  %v1818_v59 = vrot.slane %v1817_v63, 2 }
 0x1f7   : > { %v1825_v4 = vrot.slane %v1824_v18, 2  ;;  %v1832_v44 = vrot.slane %v1831_v20, 2  ;;  %v1839_v27 = vrot.slane %v1838_v22, 2  ;;  %v1791_v17 = vadd.f32 %v1790_v53, %v1789_v2  ;;  %v9993_v53 = vld [vmem:[#allocation56_spill] sm:$0xff] }
 0x1f8   : > { %v1798_v41 = vadd.f32 %v1797_v6, %v1796_v25  ;;  %v1805_v52 = vadd.f32 %v1804_v36, %v1803_v30  ;;  %v1812_v19 = vadd.f32 %v1811_v46, %v1810_v60  ;;  %v1819_v54 = vadd.f32 %v1818_v59, %v1817_v63  ;;  %v9985_v63 = vld [vmem:[#allocation49_spill] sm:$0xff]  ;;  %v9997_v36 = vld [vmem:[#allocation58_spill] sm:$0xff] }
 0x1f9   : > { %v1826_v9 = vadd.f32 %v1825_v4, %v1824_v18  ;;  %v1833_v10 = vadd.f32 %v1832_v44, %v1831_v20  ;;  %v1840_v42 = vadd.f32 %v1839_v27, %v1838_v22  ;;  %v1792_v32 = vrot.slane %v1791_v17, 1  ;;  %v9987_v20 = vld [vmem:[#allocation31_spill] sm:$0xff]  ;;  %v9992_v22 = vld [vmem:[#allocation33_spill] sm:$0xff] }
 0x1fa   : > { %v1799_v58 = vrot.slane %v1798_v41, 1  ;;  %v1806_v1 = vrot.slane %v1805_v52, 1  ;;  %v1813_v38 = vrot.slane %v1812_v19, 1  ;;  %v1779_v37 = vadd.f32 %v1778_v13, %v1777_v5  ;;  %v9990_v13 = vld [vmem:[#allocation52_spill] sm:$0xff] }
 0x1fb   : > { %v1786_v61 = vadd.f32 %v1785_v43, %v1784_v15  ;;  %v1820_v11 = vrot.slane %v1819_v54, 1  ;;  %v1827_v24 = vrot.slane %v1826_v9, 1  ;;  %v7343_v48 = vadd.f32 %v1792_v32, %v1791_v17  ;;  %v9989_v15 = vld [vmem:[#allocation50_spill] sm:$0xff] }
 0x1fc   : > { %v7345_v51 = vadd.f32 %v1799_v58, %v1798_v41  ;;  %v1834_v31 = vrot.slane %v1833_v10, 1  ;;  %v1841_v49 = vrot.slane %v1840_v42, 1  ;;  %v1807_v2 = vadd.f32 %v1806_v1, %v1805_v52  ;;  %v9995_v52 = vld [vmem:[#allocation54_spill] sm:$0xff]  ;;  %v10021_v1 = vld [vmem:[#allocation48_spill] sm:$0xff] }
 0x1fd   : > { %v1814_v25 = vadd.f32 %v1813_v38, %v1812_v19  ;;  %v1821_v30 = vadd.f32 %v1820_v11, %v1819_v54  ;;  %v1828_v60 = vadd.f32 %v1827_v24, %v1826_v9  ;;  %v1891_v18 = vsel %vm9986_vm10, %v7215_v8, %v9985_v63  ;;  %v973_v41 = vld [vmem:[#allocation3] sm:$0xff]  ;;  %v976_v9 = vld [vmem:[#allocation3 + $0x18] sm:$0xff] }
 0x1fe   : > { %v1898_v5 = vsel %vm9988_vm7, %v7217_v55, %v9987_v20  ;;  %v1905_v43 = vsel %vm9991_vm8, %v9990_v13, %v9989_v15  ;;  %v1912_v6 = vsel %vm9994_vm14, %v9993_v53, %v9992_v22  ;;  %v1892_v19 = vsel %vm9996_vm0, %v9995_v52, %v1891_v18  ;;  %v975_v54 = vld [vmem:[#allocation3 + $0x20] sm:$0xff]  ;;  %v978_v13 = vld [vmem:[#allocation3 + $0x10] sm:$0xff] }
 0x1ff   : > { %v1899_v46 = vsel %vm9998_vm1, %v9997_v36, %v1898_v5  ;;  %v1906_v8 = vsel %vm9999_vm2, %v7247_v39, %v1905_v43  ;;  %v1913_v55 = vsel %vm10000_vm3, %v7249_v0, %v1912_v6  ;;  %v1893_v59 = vsel %vm10001_vm4, %v7255_v28, %v1892_v19  ;;  %v10022_v38 = vld [vmem:[#allocation53_spill] sm:$0xff] }
 0x200   : > { %v1900_v4 = vsel %vm10002_vm5, %v7257_v50, %v1899_v46  ;;  %v1907_v44 = vsel %vm10003_vm6, %v7259_v33, %v1906_v8  ;;  %v1914_v27 = vsel %vm10004_vm15, %v7261_v45, %v1913_v55  ;;  %v1894_v17 = vsel %vm10005_vm11, %v7283_v26, %v1893_v59  ;;  %v974_v50 = vld [vmem:[#allocation3 + $0x8] sm:$0xff]  ;;  %v10025_v24 = vld [vmem:[#allocation57_spill] sm:$0xff] }
 0x201   : > { %v1901_v39 = vsel %vm10006_vm12, %v7285_v7, %v1900_v4  ;;  %v1908_v0 = vsel %vm10007_vm13, %v7287_v34, %v1907_v44  ;;  %v1915_v28 = vsel %vm10008_vm9, %v7289_v57, %v1914_v27  ;;  %vm10009_vm10 = vcmask 1045509  }
 0x202   : > { %v1895_v33 = vsel %vm10009_vm10, %v7311_v21, %v1894_v17  ;;  %vm10010_vm7 = vmmov %vm10009_vm10  ;;  %vm10013_vm0 = vcmask 1046534   ;;  %vm10017_vm4 = vcmask 1047559   ;;  %vm10023_vm11 = vcmask 1041409  }
 0x203   : > { %v1902_v45 = vsel %vm10010_vm7, %v7313_v35, %v1901_v39  ;;  %vm10011_vm8 = vmmov %vm10010_vm7  ;;  %v1896_v34 = vsel %vm10013_vm0, %v7323_v47, %v1895_v33  ;;  %v1919_v11 = vsel %vm10023_vm11, %v10022_v38, %v10021_v1  ;;  %v10024_v47 = vld [vmem:[#allocation51_spill] sm:$0xff]  ;;  %vm10027_vm13 = vcmask 1042434  }
 0x204   : > { %v1909_v26 = vsel %vm10011_vm8, %v7315_v14, %v1908_v0  ;;  %vm10012_vm14 = vmmov %vm10010_vm7  ;;  %v1897_v35 = vsel %vm10017_vm4, %v1807_v2, %v1896_v34  ;;  %v1835_v18 = vadd.f32 %v1834_v31, %v1833_v10  ;;  %vm10029_vm10 = vcmask 1043459   ;;  %v10033_v10 = vld [vmem:[#allocation55_spill] sm:$0xff] }
 0x205   : > { %v1916_v7 = vsel %vm10012_vm14, %v7317_v62, %v1915_v28  ;;  %vm10014_vm1 = vmmov %vm10013_vm0  ;;  %v1939_v63 = vadd.f32 %v1897_v35, %v973_v41  ;;  %vm10031_vm8 = vcmask 1044484   ;;  %v10035_v31 = vld [vmem:[#allocation59_spill] sm:$0xff] }
 0x206   : > { %v1903_v57 = vsel %vm10014_vm1, %v7325_v56, %v1902_v45  ;;  %vm10015_vm2 = vmmov %vm10013_vm0 }
 0x207   : > { %v1910_v32 = vsel %vm10015_vm2, %v1779_v37, %v1909_v26  ;;  %vm10016_vm3 = vmmov %vm10013_vm0  ;;  %1945 = vst [vmem:[#allocation3] sm:$0xff] %v1939_v63  ;;  %vm10034_vm0 = vcmask 1045509  }
 0x208   : > { %v1917_v21 = vsel %vm10016_vm3, %v1786_v61, %v1916_v7  ;;  %vm10018_vm5 = vmmov %vm10017_vm4  ;;  %v1920_v61 = vsel %vm10027_vm13, %v7251_v40, %v1919_v11 }
 0x209   : > { %v1904_v58 = vsel %vm10018_vm5, %v1814_v25, %v1903_v57  ;;  %vm10019_vm6 = vmmov %vm10017_vm4  ;;  %v1921_v20 = vsel %vm10029_vm10, %v7279_v12, %v1920_v61 }
 0x20a   : > { %v1911_v14 = vsel %vm10019_vm6, %v1821_v30, %v1910_v32  ;;  %vm10020_vm15 = vmmov %vm10017_vm4  ;;  %v1940_v37 = vadd.f32 %v1904_v58, %v974_v50  ;;  %v1922_v15 = vsel %vm10031_vm8, %v7291_v3, %v1921_v20 }
 0x20b   : > { %v1918_v62 = vsel %vm10020_vm15, %v1828_v60, %v1917_v21  ;;  %vm10026_vm12 = vmmov %vm10023_vm11  ;;  %v1941_v25 = vadd.f32 %v1911_v14, %v975_v54  ;;  %v1842_v60 = vadd.f32 %v1841_v49, %v1840_v42  ;;  %v1923_v42 = vsel %vm10034_vm0, %v10033_v10, %v1922_v15 }
 0x20c   : > { %v1926_v56 = vsel %vm10026_vm12, %v10025_v24, %v10024_v47  ;;  %vm10028_vm9 = vmmov %vm10027_vm13  ;;  %v1942_v30 = vadd.f32 %v1918_v62, %v976_v9  ;;  %1946 = vst [vmem:[#allocation3 + $0x8] sm:$0xff] %v1940_v37 }
 0x20d   : > { %v1927_v2 = vsel %vm10028_vm9, %v7253_v16, %v1926_v56  ;;  %vm10030_vm7 = vmmov %vm10029_vm10  ;;  %1947 = vst [vmem:[#allocation3 + $0x20] sm:$0xff] %v1941_v25  ;;  %v977_v16 = vld [vmem:[#allocation3 + $0x28] sm:$0xff] }
 0x20e   : > { %v1928_v5 = vsel %vm10030_vm7, %v7281_v29, %v1927_v2  ;;  %vm10032_vm14 = vmmov %vm10031_vm8  ;;  %1948 = vst [vmem:[#allocation3 + $0x18] sm:$0xff] %v1942_v30  ;;  %v1924_v29 = vsel %vm10015_vm2, %v7343_v48, %v1923_v42 }
 0x20f   : > { %v1929_v40 = vsel %vm10032_vm14, %v7293_v23, %v1928_v5  ;;  %vm10036_vm1 = vmmov %vm10034_vm0  ;;  %v1925_v3 = vsel %vm10017_vm4, %v1835_v18, %v1924_v29 }
 0x210   : > { %v1930_v12 = vsel %vm10036_vm1, %v10035_v31, %v1929_v40  ;;  %vm10037_vm3 = vmmov %vm10015_vm2  ;;  %v1943_v43 = vadd.f32 %v1925_v3, %v977_v16 }
 0x211   : > { %v1931_v49 = vsel %vm10037_vm3, %v7345_v51, %v1930_v12  ;;  %vm10038_vm5 = vmmov %vm10017_vm4 }
 0x212   : > { %v1932_v23 = vsel %vm10038_vm5, %v1842_v60, %v1931_v49  ;;  %1949 = vst [vmem:[#allocation3 + $0x28] sm:$0xff] %v1943_v43 }
 0x213   : > { %v1944_v22 = vadd.f32 %v1932_v23, %v978_v13 }
 0x215   : > { %1950 = vst [vmem:[#allocation3 + $0x10] sm:$0xff] %v1944_v22 }
 0x216 PF: > { %p4214_p0 = scmp.ne.s32.totalorder %s4771_s24, 3 }
 0x218   : > { %1954 = sbr.rel (%p4214_p0) target bundleno = 1178 (0x49a), region = 68 }
 0x21d   : > { %v3684_v53 = vld [vmem:[#allocation10 + $0xf8] sm:$0xff]  ;;  %v3683_v52 = vld [vmem:[#allocation10 + $0xf0] sm:$0xff]  ;;  %v3682_v51 = vld [vmem:[#allocation10 + $0xe8] sm:$0xff]  ;;  %v2003_v62 = vlaneseq  ;;  %vm4802_vm11 = vmmov 0   ;;  %vm9238_vm13 = vcmask 1041409   ;;  %vm9239_vm9 = vcmask 1042434  }
 0x21e   : > { %v3668_v6 = vld [vmem:[#allocation10 + $0x78] sm:$0xff]  ;;  %4316 = vmatprep.subr.mxu0 %v3684_v53  ;;  %v3667_v48 = vld [vmem:[#allocation10 + $0x70] sm:$0xff]  ;;  %v3666_v8 = vld [vmem:[#allocation10 + $0x68] sm:$0xff]  ;;  %vm9240_vm10 = vcmask 1043459   ;;  %vm9242_vm7 = vcmask 1044484   ;;  %vm9241_vm8 = vcmask 1045509  }
 0x21f   : > { %v3716_v19 = vld [vmem:[#allocation10 + $0x1f8] sm:$0xff]  ;;  %4317 = vmatpush3.msra.mxu0 %v3668_v6  ;;  %v3715_v46 = vld [vmem:[#allocation10 + $0x1f0] sm:$0xff]  ;;  %v3681_v59 = vld [vmem:[#allocation10 + $0xe0] sm:$0xff]  ;;  %v7430_v2 = vshrl.u32 %v2003_v62, 7  ;;  %vm9243_vm14 = vcmask 1046534  }
 0x220   : > { %4351 = vmatprep.subr.mxu1 %v3716_v19  ;;  %v3700_v36 = vld [vmem:[#allocation10 + $0x178] sm:$0xff]  ;;  %4318 = vmatprep.subr.mxu0 %v3683_v52  ;;  %v3699_v55 = vld [vmem:[#allocation10 + $0x170] sm:$0xff]  ;;  %v3714_v4 = vld [vmem:[#allocation10 + $0x1e8] sm:$0xff] }
 0x221   : > { %4352 = vmatpush3.msra.mxu1 %v3700_v36  ;;  %4319 = vmatpush3.msra.mxu0 %v3667_v48  ;;  %v3698_v44 = vld [vmem:[#allocation10 + $0x168] sm:$0xff]  ;;  %v3665_v27 = vld [vmem:[#allocation10 + $0x60] sm:$0xff]  ;;  %v3680_v39 = vld [vmem:[#allocation10 + $0xd8] sm:$0xff]  ;;  %vm2006_vm6 = vcmp.lt.s32.totalorder %v7430_v2, 2 }
 0x222   : > { %4353 = vmatprep.subr.mxu1 %v3715_v46  ;;  %4320 = vmatprep.subr.mxu0 %v3682_v51  ;;  %v3713_v17 = vld [vmem:[#allocation10 + $0x1e0] sm:$0xff]  ;;  %v3664_v28 = vld [vmem:[#allocation10 + $0x58] sm:$0xff]  ;;  %v3679_v50 = vld [vmem:[#allocation10 + $0xd0] sm:$0xff] }
 0x223   : > { %4354 = vmatpush3.msra.mxu1 %v3699_v55  ;;  %4321 = vmatpush3.msra.mxu0 %v3666_v8  ;;  %v3697_v0 = vld [vmem:[#allocation10 + $0x160] sm:$0xff]  ;;  %v3712_v41 = vld [vmem:[#allocation10 + $0x1d8] sm:$0xff]  ;;  %v3663_v45 = vld [vmem:[#allocation10 + $0x50] sm:$0xff]  ;;  %v10039_v55 = vmov 0 }
 0x224   : > { %4355 = vmatprep.subr.mxu1 %v3714_v4  ;;  %4322 = vmatprep.subr.mxu0 %v3681_v59  ;;  %v3696_v33 = vld [vmem:[#allocation10 + $0x158] sm:$0xff]  ;;  %v3711_v26 = vld [vmem:[#allocation10 + $0x1d0] sm:$0xff]  ;;  %v3678_v7 = vld [vmem:[#allocation10 + $0xc8] sm:$0xff] }
 0x225   : > { %4356 = vmatpush3.msra.mxu1 %v3698_v44  ;;  %4323 = vmatpush3.msra.mxu0 %v3665_v27  ;;  %v3695_v54 = vld [vmem:[#allocation10 + $0x150] sm:$0xff]  ;;  %v3662_v9 = vld [vmem:[#allocation10 + $0x48] sm:$0xff]  ;;  %v3677_v57 = vld [vmem:[#allocation10 + $0xc0] sm:$0xff]  ;;  %v10042_v27 = vmov 0 }
 0x226   : > { %4357 = vmatprep.subr.mxu1 %v3713_v17  ;;  %4324 = vmatprep.subr.mxu0 %v3680_v39  ;;  %v3710_v34 = vld [vmem:[#allocation10 + $0x1c8] sm:$0xff]  ;;  %v3661_v21 = vld [vmem:[#allocation10 + $0x40] sm:$0xff]  ;;  %v3676_v58 = vld [vmem:[#allocation10 + $0xb8] sm:$0xff] }
 0x227   : > { %4358 = vmatpush3.msra.mxu1 %v3697_v0  ;;  %4325 = vmatpush3.msra.mxu0 %v3664_v28  ;;  %v3694_v32 = vld [vmem:[#allocation10 + $0x148] sm:$0xff]  ;;  %v3709_v35 = vld [vmem:[#allocation10 + $0x1c0] sm:$0xff]  ;;  %v3660_v1 = vld [vmem:[#allocation10 + $0x38] sm:$0xff] }
 0x228   : > { %4359 = vmatprep.subr.mxu1 %v3712_v41  ;;  %4326 = vmatprep.subr.mxu0 %v3679_v50  ;;  %v3693_v14 = vld [vmem:[#allocation10 + $0x140] sm:$0xff]  ;;  %v3708_v38 = vld [vmem:[#allocation10 + $0x1b8] sm:$0xff]  ;;  %v3675_v11 = vld [vmem:[#allocation10 + $0xb0] sm:$0xff] }
 0x229   : > { %4360 = vmatpush3.msra.mxu1 %v3696_v33  ;;  %4327 = vmatpush3.msra.mxu0 %v3663_v45  ;;  %v3692_v47 = vld [vmem:[#allocation10 + $0x138] sm:$0xff]  ;;  %v3659_v24 = vld [vmem:[#allocation10 + $0x30] sm:$0xff]  ;;  %v3674_v63 = vld [vmem:[#allocation10 + $0xa8] sm:$0xff] }
 0x22a   : > { %4361 = vmatprep.subr.mxu1 %v3711_v26  ;;  %4328 = vmatprep.subr.mxu0 %v3678_v7  ;;  %v3707_v56 = vld [vmem:[#allocation10 + $0x1b0] sm:$0xff]  ;;  %v3658_v37 = vld [vmem:[#allocation10 + $0x28] sm:$0xff]  ;;  %v3673_v25 = vld [vmem:[#allocation10 + $0xa0] sm:$0xff] }
 0x22b   : > { %4362 = vmatpush3.msra.mxu1 %v3695_v54  ;;  %4329 = vmatpush3.msra.mxu0 %v3662_v9  ;;  %v3691_v61 = vld [vmem:[#allocation10 + $0x130] sm:$0xff]  ;;  %v3657_v30 = vld [vmem:[#allocation10 + $0x20] sm:$0xff]  ;;  %v3706_v18 = vld [vmem:[#allocation10 + $0x1a8] sm:$0xff] }
 0x22c   : > { %4363 = vmatprep.subr.mxu1 %v3710_v34  ;;  %4330 = vmatprep.subr.mxu0 %v3677_v57  ;;  %v3672_v60 = vld [vmem:[#allocation10 + $0x98] sm:$0xff]  ;;  %v3690_v20 = vld [vmem:[#allocation10 + $0x128] sm:$0xff]  ;;  %v3705_v5 = vld [vmem:[#allocation10 + $0x1a0] sm:$0xff] }
 0x22d   : > { %4364 = vmatpush3.msra.mxu1 %v3694_v32  ;;  %4331 = vmatpush3.msra.mxu0 %v3661_v21  ;;  %v3689_v15 = vld [vmem:[#allocation10 + $0x120] sm:$0xff]  ;;  %v3656_v40 = vld [vmem:[#allocation10 + $0x18] sm:$0xff]  ;;  %v3671_v42 = vld [vmem:[#allocation10 + $0x90] sm:$0xff] }
 0x22e   : > { %4365 = vmatprep.subr.mxu1 %v3709_v35  ;;  %4332 = vmatprep.subr.mxu0 %v3676_v58  ;;  %v3704_v16 = vld [vmem:[#allocation10 + $0x198] sm:$0xff]  ;;  %v1961_v10 = vld [vmem:[%s5011_s23 + $0x30] sm:$0xff]  ;;  %v1958_v12 = vld [vmem:[%s5011_s23 + $0x18] sm:$0xff] }
 0x22f   : > { %4366 = vmatpush3.msra.mxu1 %v3693_v14  ;;  %4333 = vmatpush3.msra.mxu0 %v3660_v1  ;;  %v1955_v13 = vld [vmem:[%s5011_s23] sm:$0xff]  ;;  %v1964_v29 = vld [vmem:[%s5011_s23 + $0x48] sm:$0xff]  ;;  %v1970_v3 = vld [vmem:[%s5011_s23 + $0x78] sm:$0xff] }
 0x230   : > { %4367 = vmatprep.subr.mxu1 %v3708_v38  ;;  %4334 = vmatprep.subr.mxu0 %v3675_v11  ;;  %v3688_v31 = vld [vmem:[#allocation10 + $0x118] sm:$0xff]  ;;  %v3655_v23 = vld [vmem:[#allocation10 + $0x10] sm:$0xff]  ;;  %v1973_v22 = vld [vmem:[%s5011_s23 + $0x90] sm:$0xff] }
 0x231   : > { %4368 = vmatpush3.msra.mxu1 %v3692_v47  ;;  %4335 = vmatpush3.msra.mxu0 %v3659_v24  ;;  %v1967_v49 = vld [vmem:[%s5011_s23 + $0x60] sm:$0xff]  ;;  %v1976_v53 = vld [vmem:[%s5011_s23 + $0xa8] sm:$0xff]  ;;  %v3670_v52 = vld [vmem:[#allocation10 + $0x88] sm:$0xff] }
 0x232   : > { %4369 = vmatprep.subr.mxu1 %v3707_v56  ;;  %4336 = vmatprep.subr.mxu0 %v3674_v63  ;;  %v3703_v43 = vld [vmem:[#allocation10 + $0x190] sm:$0xff]  ;;  %v1985_v51 = vld [vmem:[%s5011_s23 + $0xf0] sm:$0xff]  ;;  %v1988_v36 = vld [vmem:[%s5011_s23 + $0x108] sm:$0xff] }
 0x233   : > { %4370 = vmatpush3.msra.mxu1 %v3691_v61  ;;  %4337 = vmatpush3.msra.mxu0 %v3658_v37  ;;  %v1979_v6 = vld [vmem:[%s5011_s23 + $0xc0] sm:$0xff]  ;;  %v1982_v19 = vld [vmem:[%s5011_s23 + $0xd8] sm:$0xff]  ;;  %vm7450_vm15 = vmpackc.low %vm2006_vm6, %vm2006_vm6 }
 0x234   : > { %4371 = vmatprep.subr.mxu1 %v3706_v18  ;;  %4338 = vmatprep.subr.mxu0 %v3673_v25  ;;  %v3687_v48 = vld [vmem:[#allocation10 + $0x110] sm:$0xff]  ;;  %v10040_v55 = vsel %vm7450_vm15, 4294967295, %v10039_v55  ;;  %v1997_v4 = vld [vmem:[%s5011_s23 + $0x150] sm:$0xff]  ;;  %v2000_v44 = vld [vmem:[%s5011_s23 + $0x168] sm:$0xff]  ;;  %v7463_v17 = vsel %vm7450_vm15, %v1955_v13, 0  ;;  %v7467_v39 = vsel %vm7450_vm15, %v1961_v10, 0 }
 0x235   : > { %4372 = vmatpush3.msra.mxu1 %v3690_v20  ;;  %4339 = vmatpush3.msra.mxu0 %v3657_v30  ;;  %v1991_v46 = vld [vmem:[%s5011_s23 + $0x120] sm:$0xff]  ;;  %v1994_v8 = vld [vmem:[%s5011_s23 + $0x138] sm:$0xff]  ;;  %10041 = vst [vmem:[#allocation93_spill] sm:$0xff] %v10040_v55  ;;  %vm7457_vm12 = vmpackc.low %vm4802_vm11, %vm4802_vm11  ;;  %v7471_v0 = vsel %vm7450_vm15, %v1967_v49, 0  ;;  %v7475_v28 = vsel %vm7450_vm15, %v1973_v22, 0  ;;  %v7495_v9 = vsel %vm7450_vm15, %v1979_v6, 0  ;;  %v2065_v38 = vunpack.c.h.bf16 %v7463_v17 }
 0x236   : > { %4373 = vmatprep.subr.mxu1 %v3705_v5  ;;  %4340 = vmatprep.subr.mxu0 %v3672_v60  ;;  %v10043_v27 = vsel %vm7457_vm12, 4294967295, %v10042_v27  ;;  %v3654_v41 = vld [vmem:[#allocation10 + $0x8] sm:$0xff]  ;;  %v7479_v33 = vsel %vm7457_vm12, %v1958_v12, 0  ;;  %v7483_v45 = vsel %vm7457_vm12, %v1964_v29, 0  ;;  %v7487_v26 = vsel %vm7457_vm12, %v1970_v3, 0  ;;  %v3669_v54 = vld [vmem:[#allocation10 + $0x80] sm:$0xff] }
 0x237   : > { %4374 = vmatpush3.msra.mxu1 %v3689_v15  ;;  %4341 = vmatpush3.msra.mxu0 %v3656_v40  ;;  %10044 = vst [vmem:[#allocation94_spill] sm:$0xff] %v10043_v27  ;;  %v3702_v50 = vld [vmem:[#allocation10 + $0x188] sm:$0xff]  ;;  %v7491_v7 = vsel %vm7457_vm12, %v1976_v53, 0  ;;  %v7499_v34 = vsel %vm7457_vm12, %v1982_v19, 0  ;;  %v7503_v57 = vsel %vm7450_vm15, %v1985_v51, 0  ;;  %v7507_v32 = vsel %vm7457_vm12, %v1988_v36, 0 }
 0x238   : > { %4375 = vmatprep.subr.mxu1 %v3704_v16  ;;  %4342 = vmatprep.subr.mxu0 %v3671_v42  ;;  %v3653_v21 = vld [vmem:[#allocation10] sm:$0xff]  ;;  %v7511_v35 = vsel %vm7450_vm15, %v1991_v46, 0  ;;  %v7515_v58 = vsel %vm7457_vm12, %v1994_v8, 0  ;;  %v7519_v14 = vsel %vm7450_vm15, %v1997_v4, 0  ;;  %v7523_v62 = vsel %vm7457_vm12, %v2000_v44, 0  ;;  %v3686_v1 = vld [vmem:[#allocation10 + $0x108] sm:$0xff] }
 0x239   : > { %4376 = vmatpush3.msra.mxu1 %v3688_v31  ;;  %4343 = vmatpush3.msra.mxu0 %v3655_v23  ;;  %10045 = vst [vmem:[#allocation95_spill] sm:$0xff] %v7511_v35  ;;  %10046 = vst [vmem:[#allocation96_spill] sm:$0xff] %v7515_v58  ;;  %v2071_v11 = vunpack.c.h.bf16 %v7479_v33  ;;  %v2077_v47 = vunpack.c.h.bf16 %v7467_v39  ;;  %v2083_v24 = vunpack.c.h.bf16 %v7483_v45  ;;  %v3748_v56 = vld [vmem:[#allocation10 + $0x2f8] sm:$0xff]  ;;  %v2089_v63 = vunpack.c.h.bf16 %v7471_v0  ;;  %v3701_v6 = vld [vmem:[#allocation10 + $0x180] sm:$0xff] }
 0x23a   : > { %4377 = vmatprep.subr.mxu1 %v3703_v43  ;;  %4344 = vmatprep.subr.mxu0 %v3670_v52  ;;  %10047 = vst [vmem:[#allocation97_spill] sm:$0xff] %v7519_v14  ;;  %10048 = vst [vmem:[#allocation98_spill] sm:$0xff] %v7523_v62  ;;  %v2095_v37 = vunpack.c.h.bf16 %v7487_v26  ;;  %v2101_v61 = vunpack.c.h.bf16 %v7475_v28  ;;  %v2107_v25 = vunpack.c.h.bf16 %v7491_v7  ;;  %v2113_v30 = vunpack.c.h.bf16 %v7495_v9  ;;  %v3685_v44 = vld [vmem:[#allocation10 + $0x100] sm:$0xff] }
 0x23b   : > { %4378 = vmatpush3.msra.mxu1 %v3687_v48  ;;  %4345 = vmatpush3.msra.mxu0 %v3654_v41  ;;  %v2119_v18 = vunpack.c.h.bf16 %v7499_v34  ;;  %v2125_v60 = vunpack.c.h.bf16 %v7503_v57  ;;  %v2131_v20 = vunpack.c.h.bf16 %v7507_v32  ;;  %v2137_v5 = vunpack.c.h.bf16 %v7511_v35 }
 0x23c   : > { %4379 = vmatprep.subr.mxu1 %v3702_v50  ;;  %4346 = vmatprep.subr.mxu0 %v3669_v54  ;;  %v2143_v15 = vunpack.c.h.bf16 %v7515_v58  ;;  %v2149_v40 = vunpack.c.h.bf16 %v7519_v14  ;;  %v2155_v16 = vunpack.c.h.bf16 %v7523_v62  ;;  %v2167_v13 = vadd.f32 %v2071_v11, %v2065_v38 }
 0x23d   : > { %4380 = vmatpush3.msra.mxu1 %v3686_v1  ;;  %4347 = vmatpush3.msra.mxu0 %v3653_v21  ;;  %v2209_v10 = vadd.f32 %v2083_v24, %v2077_v47  ;;  %v2251_v42 = vadd.f32 %v2095_v37, %v2089_v63  ;;  %v2293_v31 = vadd.f32 %v2107_v25, %v2101_v61  ;;  %vm2617_vm1 = vcmp.ne.bf16.partialorder %v7463_v17, 0 }
 0x23e   : > { %4386 = vmatprep.subr.mxu0 %v3748_v56  ;;  %v2335_v12 = vadd.f32 %v2119_v18, %v2113_v30  ;;  %v2377_v29 = vadd.f32 %v2131_v20, %v2125_v60  ;;  %v2419_v49 = vadd.f32 %v2143_v15, %v2137_v5  ;;  %v2461_v3 = vadd.f32 %v2155_v16, %v2149_v40 }
 0x23f   : > { %v2168_v23 = vrot.slane %v2167_v13, 4  ;;  %v2210_v43 = vrot.slane %v2209_v10, 4  ;;  %v2252_v22 = vrot.slane %v2251_v42, 4  ;;  %v2294_v53 = vrot.slane %v2293_v31, 4  ;;  %4381 = vmatprep.subr.mxu1 %v3701_v6 }
 0x240   : > { %v2336_v52 = vrot.slane %v2335_v12, 4  ;;  %v2378_v48 = vrot.slane %v2377_v29, 4  ;;  %v2420_v19 = vrot.slane %v2419_v49, 4  ;;  %v2462_v51 = vrot.slane %v2461_v3, 4  ;;  %4382 = vmatpush3.msra.mxu1 %v3685_v44 }
 0x241   : > { %v2169_v36 = vadd.f32 %v2168_v23, %v2167_v13  ;;  %v2211_v46 = vadd.f32 %v2210_v43, %v2209_v10  ;;  %v2253_v8 = vadd.f32 %v2252_v22, %v2251_v42  ;;  %v2295_v4 = vadd.f32 %v2294_v53, %v2293_v31 }
 0x242   : > { %v2337_v41 = vadd.f32 %v2336_v52, %v2335_v12  ;;  %v2379_v50 = vadd.f32 %v2378_v48, %v2377_v29  ;;  %v2421_v54 = vadd.f32 %v2420_v19, %v2419_v49  ;;  %v2463_v21 = vadd.f32 %v2462_v51, %v2461_v3 }
 0x243   : > { %v2170_v1 = vrot.slane %v2169_v36, 2  ;;  %v2212_v38 = vrot.slane %v2211_v46, 2  ;;  %v2254_v11 = vrot.slane %v2253_v8, 2  ;;  %v2296_v47 = vrot.slane %v2295_v4, 2 }
 0x244   : > { %v2338_v24 = vrot.slane %v2337_v41, 2  ;;  %v2380_v56 = vrot.slane %v2379_v50, 2  ;;  %v2422_v63 = vrot.slane %v2421_v54, 2  ;;  %v2464_v37 = vrot.slane %v2463_v21, 2 }
 0x245   : > { %v2171_v61 = vadd.f32 %v2170_v1, %v2169_v36  ;;  %v2213_v25 = vadd.f32 %v2212_v38, %v2211_v46  ;;  %v2255_v30 = vadd.f32 %v2254_v11, %v2253_v8  ;;  %v2297_v18 = vadd.f32 %v2296_v47, %v2295_v4  ;;  %v2059_v46 = vld [vmem:[#allocation2 + $0x10] sm:$0xff] }
 0x246   : > { %v2339_v60 = vadd.f32 %v2338_v24, %v2337_v41  ;;  %v2381_v20 = vadd.f32 %v2380_v56, %v2379_v50  ;;  %v2423_v5 = vadd.f32 %v2422_v63, %v2421_v54  ;;  %v2465_v15 = vadd.f32 %v2464_v37, %v2463_v21 }
 0x247   : > { %v2172_v40 = vrot.slane %v2171_v61, 1  ;;  %v2214_v16 = vrot.slane %v2213_v25, 1  ;;  %v2256_v13 = vrot.slane %v2255_v30, 1  ;;  %v2298_v10 = vrot.slane %v2297_v18, 1 }
 0x248   : > { %v2340_v42 = vrot.slane %v2339_v60, 1  ;;  %v2382_v31 = vrot.slane %v2381_v20, 1  ;;  %v2424_v12 = vrot.slane %v2423_v5, 1  ;;  %v2466_v29 = vrot.slane %v2465_v15, 1 }
 0x249   : > { %v2173_v49 = vadd.f32 %v2172_v40, %v2171_v61  ;;  %v2215_v3 = vadd.f32 %v2214_v16, %v2213_v25  ;;  %v2257_v23 = vadd.f32 %v2256_v13, %v2255_v30  ;;  %v2299_v43 = vadd.f32 %v2298_v10, %v2297_v18 }
 0x24a   : > { %v2341_v22 = vadd.f32 %v2340_v42, %v2339_v60  ;;  %v2383_v53 = vadd.f32 %v2382_v31, %v2381_v20  ;;  %v2425_v6 = vadd.f32 %v2424_v12, %v2423_v5  ;;  %v2467_v52 = vadd.f32 %v2466_v29, %v2465_v15 }
 0x24b   : > { %v2558_v48 = vsel %vm9238_vm13, %v2215_v3, %v2173_v49  ;;  %vm2620_vm2 = vcmp.ne.bf16.partialorder %v7479_v33, 0  ;;  %vm2629_vm5 = vcmp.ne.bf16.partialorder %v7471_v0, 0  ;;  %vm2638_vm13 = vcmp.ne.bf16.partialorder %v7491_v7, 0 }
 0x24c   : > { %v2559_v19 = vsel %vm9239_vm9, %v2257_v23, %v2558_v48  ;;  %vm2644_vm3 = vcmp.ne.bf16.partialorder %v7499_v34, 0  ;;  %vm2647_vm9 = vcmp.ne.bf16.partialorder %v7503_v57, 0  ;;  %vm2650_vm4 = vcmp.ne.bf16.partialorder %v7507_v32, 0 }
 0x24d   : > { %v2560_v51 = vsel %vm9240_vm10, %v2299_v43, %v2559_v19  ;;  %vm2653_vm6 = vcmp.ne.bf16.partialorder %v7511_v35, 0  ;;  %vm2656_vm10 = vcmp.ne.bf16.partialorder %v7515_v58, 0  ;;  %vm2659_vm11 = vcmp.ne.bf16.partialorder %v7519_v14, 0 }
 0x24e   : > { %v2561_v36 = vsel %vm9242_vm7, %v2341_v22, %v2560_v51  ;;  %vm2662_vm0 = vcmp.ne.bf16.partialorder %v7523_v62, 0  ;;  %v9248_v44 = vmov 0   ;;  %vm10050_vm7 = vcmp.ne.bf16.partialorder %v7467_v39, 0 }
 0x24f   : > { %v2562_v8 = vsel %vm9241_vm8, %v2383_v53, %v2561_v36  ;;  %v2665_v41 = vsel %vm2617_vm1, 65537, %v9248_v44  ;;  %v2668_v50 = vsel %vm2620_vm2, 65537, %v9248_v44  ;;  %vm10049_vm8 = vcmask 1047559  }
 0x250   : > { %v2563_v4 = vsel %vm9243_vm14, %v2425_v6, %v2562_v8  ;;  %v2671_v21 = vsel %vm10050_vm7, 65537, %v9248_v44  ;;  %vm10051_vm14 = vcmp.ne.bf16.partialorder %v7483_v45, 0  ;;  %v2677_v38 = vsel %vm2629_vm5, 65537, %v9248_v44 }
 0x251   : > { %v2564_v54 = vsel %vm10049_vm8, %v2467_v52, %v2563_v4  ;;  %v2674_v1 = vsel %vm10051_vm14, 65537, %v9248_v44  ;;  %vm10053_vm1 = vcmp.ne.bf16.partialorder %v7487_v26, 0  ;;  %vm10054_vm8 = vcmp.ne.bf16.partialorder %v7475_v28, 0 }
 0x252   : > { %v7579_v11 = vadd.f32 %v2564_v54, %v2059_v46  ;;  %v2680_v47 = vsel %vm10053_vm1, 65537, %v9248_v44  ;;  %v2683_v24 = vsel %vm10054_vm8, 65537, %v9248_v44  ;;  %v2686_v56 = vsel %vm2638_vm13, 65537, %v9248_v44 }
 0x253   : > { %vm10055_vm7 = vcmp.ne.bf16.partialorder %v7495_v9, 0  ;;  %v2692_v37 = vsel %vm2644_vm3, 65537, %v9248_v44  ;;  %v2695_v61 = vsel %vm2647_vm9, 65537, %v9248_v44  ;;  %v2698_v25 = vsel %vm2650_vm4, 65537, %v9248_v44 }
 0x254   : > { %10052 = vst [vmem:[#allocation99_spill] sm:$0xff] %v7579_v11  ;;  %v2689_v63 = vsel %vm10055_vm7, 65537, %v9248_v44  ;;  %2606 = vst [vmem:[#allocation2 + $0x10] sm:$0xff] %v7579_v11  ;;  %v2701_v30 = vsel %vm2653_vm6, 65537, %v9248_v44  ;;  %v2704_v18 = vsel %vm2656_vm10, 65537, %v9248_v44  ;;  %v7612_v60 = vsel %vm2659_vm11, 65537, %v9248_v44 }
 0x255   : > { %v7617_v20 = vsel %vm2662_vm0, 65537, %v9248_v44  ;;  %v2713_v5 = vunpack.c.l.b16 %v2665_v41  ;;  %v2714_v15 = vunpack.c.h.b16 %v2665_v41  ;;  %v2719_v40 = vunpack.c.l.b16 %v2668_v50 }
 0x256   : > { %v2720_v16 = vunpack.c.h.b16 %v2668_v50  ;;  %v2725_v13 = vunpack.c.l.b16 %v2671_v21  ;;  %v2726_v10 = vunpack.c.h.b16 %v2671_v21  ;;  %v2731_v42 = vunpack.c.l.b16 %v2674_v1 }
 0x257   : > { %v2732_v31 = vunpack.c.h.b16 %v2674_v1  ;;  %v2737_v12 = vunpack.c.l.b16 %v2677_v38  ;;  %v2738_v29 = vunpack.c.h.b16 %v2677_v38  ;;  %v2743_v49 = vunpack.c.l.b16 %v2680_v47 }
 0x258   : > { %v2744_v3 = vunpack.c.h.b16 %v2680_v47  ;;  %v2749_v23 = vunpack.c.l.b16 %v2683_v24  ;;  %v2750_v43 = vunpack.c.h.b16 %v2683_v24  ;;  %v2755_v22 = vunpack.c.l.b16 %v2686_v56 }
 0x259   : > { %v2756_v53 = vunpack.c.h.b16 %v2686_v56  ;;  %v2761_v6 = vunpack.c.l.b16 %v2689_v63  ;;  %v2762_v52 = vunpack.c.h.b16 %v2689_v63  ;;  %v2767_v48 = vunpack.c.l.b16 %v2692_v37 }
 0x25a   : > { %v2768_v19 = vunpack.c.h.b16 %v2692_v37  ;;  %v2773_v51 = vunpack.c.l.b16 %v2695_v61  ;;  %v2774_v36 = vunpack.c.h.b16 %v2695_v61  ;;  %v2779_v46 = vunpack.c.l.b16 %v2698_v25 }
 0x25b   : > { %v2780_v8 = vunpack.c.h.b16 %v2698_v25  ;;  %v2785_v4 = vunpack.c.l.b16 %v2701_v30  ;;  %v2786_v41 = vunpack.c.h.b16 %v2701_v30  ;;  %v2791_v50 = vunpack.c.l.b16 %v2704_v18 }
 0x25c   : > { %v2792_v54 = vunpack.c.h.b16 %v2704_v18  ;;  %v2797_v21 = vunpack.c.l.b16 %v7612_v60  ;;  %v2798_v1 = vunpack.c.h.b16 %v7612_v60  ;;  %v2803_v38 = vunpack.c.l.b16 %v7617_v20 }
 0x25d   : > { %v2804_v47 = vunpack.c.h.b16 %v7617_v20  ;;  %vm7623_vm13 = vcmp.ne.s32.totalorder %v2713_v5, 0  ;;  %vm7627_vm9 = vcmp.ne.s32.totalorder %v2714_v15, 0  ;;  %vm7631_vm10 = vcmp.ne.s32.totalorder %v2719_v40, 0 }
 0x25e   : > { %vm7635_vm14 = vcmp.ne.s32.totalorder %v2720_v16, 0  ;;  %vm7639_vm0 = vcmp.ne.s32.totalorder %v2725_v13, 0  ;;  %vm7643_vm2 = vcmp.ne.s32.totalorder %v2726_v10, 0  ;;  %vm7647_vm3 = vcmp.ne.s32.totalorder %v2731_v42, 0 }
 0x25f   : > { %vm7651_vm4 = vcmp.ne.s32.totalorder %v2732_v31, 0  ;;  %vm7655_vm5 = vcmp.ne.s32.totalorder %v2737_v12, 0  ;;  %vm7659_vm6 = vcmp.ne.s32.totalorder %v2738_v29, 0  ;;  %vm7663_vm11 = vcmp.ne.s32.totalorder %v2743_v49, 0 }
 0x260   : > { %v10076_v5 = vmov 0  ;;  %vm7667_vm1 = vcmp.ne.s32.totalorder %v2744_v3, 0  ;;  %v10078_v15 = vmov 0  ;;  %vm7671_vm8 = vcmp.ne.s32.totalorder %v2749_v23, 0 }
 0x261   : > { %v10077_v5 = vsel %vm7663_vm11, 4294967295, %v10076_v5  ;;  %v10079_v15 = vsel %vm7667_vm1, 4294967295, %v10078_v15  ;;  %v10080_v40 = vmov 0  ;;  %vm7675_vm7 = vcmp.ne.s32.totalorder %v2750_v43, 0 }
 0x262   : > { %v10081_v40 = vsel %vm7671_vm8, 4294967295, %v10080_v40  ;;  %v10082_v16 = vmov 0  ;;  %vm7679_vm12 = vcmp.ne.s32.totalorder %v2755_v22, 0  ;;  %v10084_v13 = vmov 0 }
 0x263   : > { %v10083_v16 = vsel %vm7675_vm7, 4294967295, %v10082_v16  ;;  %v10085_v13 = vsel %vm7679_vm12, 4294967295, %v10084_v13  ;;  %vm7683_vm15 = vcmp.ne.s32.totalorder %v2756_v53, 0  ;;  %v10086_v10 = vmov 0 }
 0x264   : > { %v10087_v10 = vsel %vm7683_vm15, 4294967295, %v10086_v10  ;;  %vm7687_vm11 = vcmp.ne.s32.totalorder %v2761_v6, 0  ;;  %v10088_v42 = vmov 0  ;;  %vm7691_vm1 = vcmp.ne.s32.totalorder %v2762_v52, 0 }
 0x265   : > { %v10089_v42 = vsel %vm7687_vm11, 4294967295, %v10088_v42  ;;  %v10090_v31 = vmov 0  ;;  %vm7695_vm8 = vcmp.ne.s32.totalorder %v2767_v48, 0  ;;  %v10092_v12 = vmov 0 }
 0x266   : > { %v10091_v31 = vsel %vm7691_vm1, 4294967295, %v10090_v31  ;;  %v10093_v12 = vsel %vm7695_vm8, 4294967295, %v10092_v12  ;;  %vm7699_vm7 = vcmp.ne.s32.totalorder %v2768_v19, 0  ;;  %v10094_v29 = vmov 0 }
 0x267   : > { %v10095_v29 = vsel %vm7699_vm7, 4294967295, %v10094_v29  ;;  %vm7703_vm12 = vcmp.ne.s32.totalorder %v2773_v51, 0  ;;  %v10096_v49 = vmov 0  ;;  %vm7707_vm15 = vcmp.ne.s32.totalorder %v2774_v36, 0 }
 0x268   : > { %v10097_v49 = vsel %vm7703_vm12, 4294967295, %v10096_v49  ;;  %v10098_v3 = vmov 0  ;;  %vm7711_vm11 = vcmp.ne.s32.totalorder %v2779_v46, 0  ;;  %v10100_v23 = vmov 0 }
 0x269   : > { %v10099_v3 = vsel %vm7707_vm15, 4294967295, %v10098_v3  ;;  %v10101_v23 = vsel %vm7711_vm11, 4294967295, %v10100_v23  ;;  %vm7715_vm1 = vcmp.ne.s32.totalorder %v2780_v8, 0  ;;  %v10102_v43 = vmov 0 }
 0x26a   : > { %v10103_v43 = vsel %vm7715_vm1, 4294967295, %v10102_v43  ;;  %vm7719_vm8 = vcmp.ne.s32.totalorder %v2785_v4, 0  ;;  %v10104_v22 = vmov 0  ;;  %vm7723_vm7 = vcmp.ne.s32.totalorder %v2786_v41, 0 }
 0x26b   : > { %v10105_v22 = vsel %vm7719_vm8, 4294967295, %v10104_v22  ;;  %v10106_v53 = vmov 0  ;;  %vm7727_vm12 = vcmp.ne.s32.totalorder %v2791_v50, 0  ;;  %vm7731_vm15 = vcmp.ne.s32.totalorder %v2792_v54, 0 }
 0x26c   : > { %v10107_v53 = vsel %vm7723_vm7, 4294967295, %v10106_v53  ;;  %vm7735_vm11 = vcmp.ne.s32.totalorder %v2797_v21, 0  ;;  %vm7739_vm1 = vcmp.ne.s32.totalorder %v2798_v1, 0  ;;  %vm7743_vm8 = vcmp.ne.s32.totalorder %v2803_v38, 0 }
 0x26d   : > { %vm7747_vm7 = vcmp.ne.s32.totalorder %v2804_v47, 0  ;;  %v9259_v46 = vmov 0.0  }
 0x26e   : > { %v4215_v8 = vsel %vm7623_vm13, 1.0, %v9259_v46  ;;  %v4216_v4 = vsel %vm7627_vm9, 1.0, %v9259_v46  ;;  %v4221_v41 = vsel %vm7631_vm10, 1.0, %v9259_v46  ;;  %v4222_v50 = vsel %vm7635_vm14, 1.0, %v9259_v46 }
 0x26f   : > { %v4227_v54 = vsel %vm7639_vm0, 1.0, %v9259_v46  ;;  %v4228_v21 = vsel %vm7643_vm2, 1.0, %v9259_v46  ;;  %v4233_v1 = vsel %vm7647_vm3, 1.0, %v9259_v46  ;;  %v4234_v38 = vsel %vm7651_vm4, 1.0, %v9259_v46 }
 0x270   : > { %v4239_v47 = vsel %vm7655_vm5, 1.0, %v9259_v46  ;;  %v4240_v24 = vsel %vm7659_vm6, 1.0, %v9259_v46  ;;  %vm10120_vm13 = vnez %v10077_v5  ;;  %vm10121_vm9 = vnez %v10079_v15 }
 0x271   : > { %v4245_v56 = vsel %vm10120_vm13, 1.0, %v9259_v46  ;;  %v4246_v63 = vsel %vm10121_vm9, 1.0, %v9259_v46  ;;  %vm10122_vm10 = vnez %v10081_v40  ;;  %vm10123_vm14 = vnez %v10083_v16 }
 0x272   : > { %v4251_v37 = vsel %vm10122_vm10, 1.0, %v9259_v46  ;;  %v4252_v61 = vsel %vm10123_vm14, 1.0, %v9259_v46  ;;  %vm10124_vm0 = vnez %v10085_v13  ;;  %vm10125_vm2 = vnez %v10087_v10 }
 0x273   : > { %v4257_v25 = vsel %vm10124_vm0, 1.0, %v9259_v46  ;;  %v4258_v30 = vsel %vm10125_vm2, 1.0, %v9259_v46  ;;  %vm10126_vm3 = vnez %v10089_v42  ;;  %vm10127_vm4 = vnez %v10091_v31 }
 0x274   : > { %v4263_v18 = vsel %vm10126_vm3, 1.0, %v9259_v46  ;;  %v4264_v60 = vsel %vm10127_vm4, 1.0, %v9259_v46  ;;  %vm10128_vm5 = vnez %v10093_v12  ;;  %vm10129_vm6 = vnez %v10095_v29 }
 0x275   : > { %v4269_v20 = vsel %vm10128_vm5, 1.0, %v9259_v46  ;;  %v4270_v5 = vsel %vm10129_vm6, 1.0, %v9259_v46  ;;  %vm10130_vm13 = vnez %v10097_v49  ;;  %vm10131_vm9 = vnez %v10099_v3 }
 0x276   : > { %v4275_v15 = vsel %vm10130_vm13, 1.0, %v9259_v46  ;;  %v4276_v40 = vsel %vm10131_vm9, 1.0, %v9259_v46  ;;  %vm10132_vm10 = vnez %v10101_v23  ;;  %vm10133_vm14 = vnez %v10103_v43 }
 0x277   : > { %v4281_v16 = vsel %vm10132_vm10, 1.0, %v9259_v46  ;;  %v4282_v13 = vsel %vm10133_vm14, 1.0, %v9259_v46  ;;  %vm10134_vm0 = vnez %v10105_v22  ;;  %vm10135_vm2 = vnez %v10107_v53 }
 0x278   : > { %v7826_v10 = vsel %vm10134_vm0, 1.0, %v9259_v46  ;;  %v7831_v42 = vsel %vm10135_vm2, 1.0, %v9259_v46  ;;  %v7836_v31 = vsel %vm7727_vm12, 1.0, %v9259_v46  ;;  %v7841_v12 = vsel %vm7731_vm15, 1.0, %v9259_v46 }
 0x279   : > { %v7846_v29 = vsel %vm7735_vm11, 1.0, %v9259_v46  ;;  %v7851_v49 = vsel %vm7739_vm1, 1.0, %v9259_v46  ;;  %v7856_v3 = vsel %vm7743_vm8, 1.0, %v9259_v46  ;;  %v7861_v23 = vsel %vm7747_vm7, 1.0, %v9259_v46 }
 0x27a   : > { %v3097_v43 = vadd.f32 %v4221_v41, %v4215_v8  ;;  %v3104_v22 = vadd.f32 %v4222_v50, %v4216_v4  ;;  %v3139_v53 = vadd.f32 %v4233_v1, %v4227_v54  ;;  %v3146_v6 = vadd.f32 %v4234_v38, %v4228_v21 }
 0x27b   : > { %v3181_v52 = vadd.f32 %v4245_v56, %v4239_v47  ;;  %v3188_v48 = vadd.f32 %v4246_v63, %v4240_v24  ;;  %v3223_v44 = vadd.f32 %v4257_v25, %v4251_v37  ;;  %v3230_v19 = vadd.f32 %v4258_v30, %v4252_v61 }
 0x27c   : > { %v3098_v59 = vrot.slane %v3097_v43, 4  ;;  %v3105_v27 = vrot.slane %v3104_v22, 4  ;;  %v3140_v55 = vrot.slane %v3139_v53, 4  ;;  %v3147_v11 = vrot.slane %v3146_v6, 4 }
 0x27d   : > { %v3182_v51 = vrot.slane %v3181_v52, 4  ;;  %v3189_v62 = vrot.slane %v3188_v48, 4  ;;  %v3224_v14 = vrot.slane %v3223_v44, 4  ;;  %v3231_v58 = vrot.slane %v3230_v19, 4 }
 0x27e   : > { %v7863_v35 = vadd.f32 %v3098_v59, %v3097_v43  ;;  %v3106_v36 = vadd.f32 %v3105_v27, %v3104_v22  ;;  %v7865_v46 = vadd.f32 %v3140_v55, %v3139_v53  ;;  %v3148_v8 = vadd.f32 %v3147_v11, %v3146_v6 }
 0x27f   : > { %v7867_v4 = vadd.f32 %v3182_v51, %v3181_v52  ;;  %v3190_v41 = vadd.f32 %v3189_v62, %v3188_v48  ;;  %v7869_v50 = vadd.f32 %v3224_v14, %v3223_v44  ;;  %v3232_v54 = vadd.f32 %v3231_v58, %v3230_v19 }
 0x280   : > { %v3100_v21 = vrot.slane %v7863_v35, 2  ;;  %v3107_v1 = vrot.slane %v3106_v36, 2  ;;  %v3142_v38 = vrot.slane %v7865_v46, 2  ;;  %v3149_v47 = vrot.slane %v3148_v8, 2 }
 0x281   : > { %v3184_v24 = vrot.slane %v7867_v4, 2  ;;  %v3191_v59 = vrot.slane %v3190_v41, 2  ;;  %v3226_v27 = vrot.slane %v7869_v50, 2  ;;  %v3233_v55 = vrot.slane %v3232_v54, 2 }
 0x282   : > { %v3108_v56 = vadd.f32 %v3107_v1, %v3106_v36  ;;  %v3150_v11 = vadd.f32 %v3149_v47, %v3148_v8  ;;  %v3265_v63 = vadd.f32 %v4269_v20, %v4263_v18  ;;  %v3272_v37 = vadd.f32 %v4270_v5, %v4264_v60 }
 0x283   : > { %v3192_v62 = vadd.f32 %v3191_v59, %v3190_v41  ;;  %v3234_v14 = vadd.f32 %v3233_v55, %v3232_v54  ;;  %v3307_v44 = vadd.f32 %v4281_v16, %v4275_v15  ;;  %v3314_v58 = vadd.f32 %v4282_v13, %v4276_v40 }
 0x284   : > { %v3109_v61 = vrot.slane %v3108_v56, 1  ;;  %v3151_v25 = vrot.slane %v3150_v11, 1  ;;  %v3266_v30 = vrot.slane %v3265_v63, 4  ;;  %v3273_v43 = vrot.slane %v3272_v37, 4 }
 0x285   : > { %v3193_v22 = vrot.slane %v3192_v62, 1  ;;  %v3235_v53 = vrot.slane %v3234_v14, 1  ;;  %v3308_v6 = vrot.slane %v3307_v44, 4  ;;  %v3315_v52 = vrot.slane %v3314_v58, 4 }
 0x286   : > { %v3110_v48 = vadd.f32 %v3109_v61, %v3108_v56  ;;  %v3152_v19 = vadd.f32 %v3151_v25, %v3150_v11  ;;  %v7875_v51 = vadd.f32 %v3266_v30, %v3265_v63  ;;  %v3274_v36 = vadd.f32 %v3273_v43, %v3272_v37  ;;  %v7890_v11 = vld [vmem:[#allocation7] sm:$0x3f] }
 0x287   : > { %v3194_v8 = vadd.f32 %v3193_v22, %v3192_v62  ;;  %v3236_v18 = vadd.f32 %v3235_v53, %v3234_v14  ;;  %v7877_v60 = vadd.f32 %v3308_v6, %v3307_v44  ;;  %v3316_v20 = vadd.f32 %v3315_v52, %v3314_v58 }
 0x288   : > { %v3268_v5 = vrot.slane %v7875_v51, 2  ;;  %v3275_v15 = vrot.slane %v3274_v36, 2  ;;  %v3349_v40 = vadd.f32 %v7836_v31, %v7826_v10  ;;  %v3356_v16 = vadd.f32 %v7841_v12, %v7831_v42  ;;  %v7893_v12 = vld [vmem:[#allocation9] sm:$0x3f] }
 0x289   : > { %v3310_v13 = vrot.slane %v7877_v60, 2  ;;  %v3317_v41 = vrot.slane %v3316_v20, 2  ;;  %v3391_v54 = vadd.f32 %v7856_v3, %v7846_v29  ;;  %v3398_v1 = vadd.f32 %v7861_v23, %v7851_v49 }
 0x28a   : > { %v3276_v47 = vadd.f32 %v3275_v15, %v3274_v36  ;;  %v3350_v59 = vrot.slane %v3349_v40, 4  ;;  %v3357_v55 = vrot.slane %v3356_v16, 4  ;;  %vm10136_vm15 = vcmask 1041409  }
 0x28b   : > { %v3488_v56 = vsel %vm10136_vm15, %v3152_v19, %v3110_v48  ;;  %v3318_v10 = vadd.f32 %v3317_v41, %v3316_v20  ;;  %v3392_v31 = vrot.slane %v3391_v54, 4  ;;  %v3399_v63 = vrot.slane %v3398_v1, 4  ;;  %vm10149_vm4 = vmmov %vm10136_vm15 }
 0x28c   : > { %vm10137_vm12 = vcmask 1042434   ;;  %v3277_v37 = vrot.slane %v3276_v47, 1  ;;  %v7895_v62 = vadd.f32 %v3350_v59, %v3349_v40  ;;  %v3358_v29 = vadd.f32 %v3357_v55, %v3356_v16  ;;  %vm10156_vm14 = vmmov %vm10149_vm4 }
 0x28d   : > { %v3489_v42 = vsel %vm10137_vm12, %v3194_v8, %v3488_v56  ;;  %vm10138_vm11 = vcmask 1043459   ;;  %v3319_v3 = vrot.slane %v3318_v10, 1  ;;  %v7898_v23 = vadd.f32 %v3392_v31, %v3391_v54  ;;  %vm10150_vm5 = vmmov %vm10137_vm12 }
 0x28e   : > { %v3490_v49 = vsel %vm10138_vm11, %v3236_v18, %v3489_v42  ;;  %v3400_v14 = vadd.f32 %v3399_v63, %v3398_v1  ;;  %v10139_v44 = vsub.s32 1, %v7430_v2  ;;  %v3278_v61 = vadd.f32 %v3277_v37, %v3276_v47  ;;  %v2612_v63 = vld [vmem:[#allocation3 + $0x8] sm:$0xff]  ;;  %v10146_v37 = vld [vmem:[#allocation98_spill] sm:$0xff]  ;;  %vm10151_vm6 = vmmov %vm10138_vm11 }
 0x28f   : > { %v3352_v25 = vrot.slane %v7895_v62, 2  ;;  %v3359_v30 = vrot.slane %v3358_v29, 2  ;;  %v3320_v53 = vadd.f32 %v3319_v3, %v3318_v10  ;;  %v3394_v6 = vrot.slane %v7898_v23, 2  ;;  %v10145_v42 = vld [vmem:[#allocation97_spill] sm:$0xff]  ;;  %vm10158_vm2 = vmmov %vm10150_vm5 }
 0x290   : > { %v7903_v58 = vrot.slane %v7890_v11, %v10139_v44  ;;  %v10140_v43 = vmov %v10139_v44  ;;  %v3401_v52 = vrot.slane %v3400_v14, 2  ;;  %v2064_v48 = vunpack.c.l.bf16 %v7463_v17  ;;  %vm10159_vm15 = vmmov %vm10151_vm6 }
 0x291   : > { %v7909_v22 = vrot.slane %v7893_v12, %v10140_v43  ;;  %v3360_v19 = vadd.f32 %v3359_v30, %v3358_v29  ;;  %vm10141_vm1 = vcmask 1044484   ;;  %v2070_v8 = vunpack.c.l.bf16 %v7479_v33 }
 0x292   : > { %v3491_v36 = vsel %vm10141_vm1, %v3278_v61, %v3490_v49  ;;  %v2076_v18 = vunpack.c.l.bf16 %v7467_v39  ;;  %v3402_v20 = vadd.f32 %v3401_v52, %v3400_v14  ;;  %vm10142_vm8 = vcmask 1045509   ;;  %vm10152_vm13 = vmmov %vm10141_vm1 }
 0x293   : > { %v3492_v15 = vsel %vm10142_vm8, %v3320_v53, %v3491_v36  ;;  %v2082_v40 = vunpack.c.l.bf16 %v7483_v45  ;;  %v2088_v16 = vunpack.c.l.bf16 %v7471_v0  ;;  %v3361_v41 = vrot.slane %v3360_v19, 1  ;;  %v10143_v45 = vld [vmem:[#allocation95_spill] sm:$0xff]  ;;  %v10144_v0 = vld [vmem:[#allocation96_spill] sm:$0xff]  ;;  %vm10153_vm9 = vmmov %vm10142_vm8 }
 0x294   : > { %v2094_v54 = vunpack.c.l.bf16 %v7487_v26  ;;  %v2100_v1 = vunpack.c.l.bf16 %v7475_v28  ;;  %v2106_v17 = vunpack.c.l.bf16 %v7491_v7  ;;  %v3403_v47 = vrot.slane %v3402_v20, 1  ;;  %vm10160_vm12 = vmmov %vm10141_vm1 }
 0x295   : > { %v2112_v59 = vunpack.c.l.bf16 %v7495_v9  ;;  %v2118_v33 = vunpack.c.l.bf16 %v7499_v34  ;;  %v2124_v39 = vunpack.c.l.bf16 %v7503_v57  ;;  %v3362_v55 = vadd.f32 %v3361_v41, %v3360_v19 }
 0x296   : > { %v2130_v56 = vunpack.c.l.bf16 %v7507_v32  ;;  %v2136_v10 = vunpack.c.l.bf16 %v10143_v45  ;;  %v2142_v31 = vunpack.c.l.bf16 %v10144_v0  ;;  %v3404_v26 = vadd.f32 %v3403_v47, %v3402_v20 }
 0x297   : > { %v2148_v28 = vunpack.c.l.bf16 %v10145_v42  ;;  %v2154_v7 = vunpack.c.l.bf16 %v10146_v37  ;;  %v2160_v29 = vadd.f32 %v2070_v8, %v2064_v48  ;;  %vm10147_vm7 = vcmask 1046534  }
 0x298   : > { %v3493_v9 = vsel %vm10147_vm7, %v3362_v55, %v3492_v15  ;;  %v2202_v49 = vadd.f32 %v2082_v40, %v2076_v18  ;;  %v2244_v34 = vadd.f32 %v2094_v54, %v2088_v16  ;;  %v2286_v3 = vadd.f32 %v2106_v17, %v2100_v1  ;;  %vm10154_vm10 = vmmov %vm10147_vm7 }
 0x299   : > { %vm10148_vm3 = vcmask 1047559   ;;  %v2161_v14 = vrot.slane %v2160_v29, 4  ;;  %v2328_v32 = vadd.f32 %v2118_v33, %v2112_v59  ;;  %v2370_v44 = vadd.f32 %v2130_v56, %v2124_v39 }
 0x29a   : > { %v3494_v57 = vsel %vm10148_vm3, %v3404_v26, %v3493_v9  ;;  %v2203_v30 = vrot.slane %v2202_v49, 4  ;;  %v2245_v43 = vrot.slane %v2244_v34, 4  ;;  %v2287_v53 = vrot.slane %v2286_v3, 4  ;;  %vm10157_vm0 = vmmov %vm10148_vm3 }
 0x29b   : > { %v3530_v61 = vadd.f32 %v3494_v57, %v2612_v63  ;;  %v2162_v52 = vadd.f32 %v2161_v14, %v2160_v29  ;;  %v2329_v19 = vrot.slane %v2328_v32, 4  ;;  %v2371_v36 = vrot.slane %v2370_v44, 4  ;;  %vm10165_vm3 = vmmov %vm10157_vm0 }
 0x29c   : > { %v2412_v20 = vadd.f32 %v2142_v31, %v2136_v10  ;;  %v2204_v8 = vadd.f32 %v2203_v30, %v2202_v49  ;;  %v2246_v15 = vadd.f32 %v2245_v43, %v2244_v34  ;;  %v2288_v18 = vadd.f32 %v2287_v53, %v2286_v3 }
 0x29d   : > { %3536 = vst [vmem:[#allocation3 + $0x8] sm:$0xff] %v3530_v61  ;;  %v3554_v48 = vmax.f32 %v3530_v61, 1.0  ;;  %v2163_v40 = vrot.slane %v2162_v52, 2  ;;  %v2330_v16 = vadd.f32 %v2329_v19, %v2328_v32  ;;  %v2372_v41 = vadd.f32 %v2371_v36, %v2370_v44 }
 0x29e   : > { %v2413_v54 = vrot.slane %v2412_v20, 4  ;;  %v2205_v1 = vrot.slane %v2204_v8, 2  ;;  %v2247_v17 = vrot.slane %v2246_v15, 2  ;;  %v2289_v47 = vrot.slane %v2288_v18, 2 }
 0x29f   : > { %4565 = vrcp.f32 %v3554_v48  ;;  %v2164_v59 = vadd.f32 %v2163_v40, %v2162_v52  ;;  %v2331_v33 = vrot.slane %v2330_v16, 2  ;;  %v2373_v39 = vrot.slane %v2372_v41, 2 }
 0x2a0   : > { %v2414_v55 = vadd.f32 %v2413_v54, %v2412_v20  ;;  %v2206_v56 = vadd.f32 %v2205_v1, %v2204_v8  ;;  %v2248_v45 = vadd.f32 %v2247_v17, %v2246_v15  ;;  %v2290_v10 = vadd.f32 %v2289_v47, %v2288_v18 }
 0x2a1   : > { %v2454_v0 = vadd.f32 %v2154_v7, %v2148_v28  ;;  %v2165_v31 = vrot.slane %v2164_v59, 1  ;;  %v2332_v63 = vadd.f32 %v2331_v33, %v2330_v16  ;;  %v2374_v26 = vadd.f32 %v2373_v39, %v2372_v41  ;;  %v10155_v39 = vld [vmem:[#allocation99_spill] sm:$0xff] }
 0x2a2   : > { %v2415_v42 = vrot.slane %v2414_v55, 2  ;;  %v2207_v37 = vrot.slane %v2206_v56, 1  ;;  %v2249_v29 = vrot.slane %v2248_v45, 1  ;;  %v2291_v9 = vrot.slane %v2290_v10, 1 }
 0x2a3   : > { %v2455_v49 = vrot.slane %v2454_v0, 4  ;;  %v2166_v34 = vadd.f32 %v2165_v31, %v2164_v59  ;;  %v2333_v3 = vrot.slane %v2332_v63, 1  ;;  %v2375_v57 = vrot.slane %v2374_v26, 1 }
 0x2a4   : > { %v2416_v14 = vadd.f32 %v2415_v42, %v2414_v55  ;;  %v2208_v32 = vadd.f32 %v2207_v37, %v2206_v56  ;;  %v2250_v44 = vadd.f32 %v2249_v29, %v2248_v45  ;;  %v2292_v61 = vadd.f32 %v2291_v9, %v2290_v10  ;;  %v2058_v56 = vld [vmem:[#allocation2 + $0x28] sm:$0xff]  ;;  %v1959_v42 = vld [vmem:[%s5011_s23 + $0x20] sm:$0xff]  ;;  %v1965_v9 = vld [vmem:[%s5011_s23 + $0x50] sm:$0xff] }
 0x2a5   : > { %v2456_v30 = vadd.f32 %v2455_v49, %v2454_v0  ;;  %v2334_v43 = vadd.f32 %v2333_v3, %v2332_v63  ;;  %v2376_v53 = vadd.f32 %v2375_v57, %v2374_v26  ;;  %v3101_v28 = vadd.f32 %v3100_v21, %v7863_v35 }
 0x2a6   : > { %v2417_v52 = vrot.slane %v2416_v14, 1  ;;  %v2545_v19 = vsel %vm10149_vm4, %v2208_v32, %v2166_v34  ;;  %v3143_v36 = vadd.f32 %v3142_v38, %v7865_v46  ;;  %v3185_v20 = vadd.f32 %v3184_v24, %v7867_v4  ;;  %v2611_v34 = vld [vmem:[#allocation3] sm:$0xff]  ;;  %v1968_v32 = vld [vmem:[%s5011_s23 + $0x68] sm:$0xff] }
 0x2a7   : > { %v2457_v7 = vrot.slane %v2456_v30, 2  ;;  %v2547_v8 = vsel %vm10150_vm5, %v2250_v44, %v2545_v19  ;;  %v3102_v15 = vrot.slane %v3101_v28, 1  ;;  %v3227_v18 = vadd.f32 %v3226_v27, %v7869_v50  ;;  %v1971_v44 = vld [vmem:[%s5011_s23 + $0x80] sm:$0xff] }
 0x2a8   : > { %v2418_v48 = vadd.f32 %v2417_v52, %v2416_v14  ;;  %v2549_v21 = vsel %vm10151_vm6, %v2292_v61, %v2547_v8  ;;  %v3144_v40 = vrot.slane %v3143_v36, 1  ;;  %v3186_v16 = vrot.slane %v3185_v20, 1  ;;  %v1974_v61 = vld [vmem:[%s5011_s23 + $0x98] sm:$0xff]  ;;  %v1989_v8 = vld [vmem:[%s5011_s23 + $0x110] sm:$0xff]  ;;  %vm10170_vm6 = vmmov %vm10158_vm2 }
 0x2a9   : > { %v2458_v35 = vadd.f32 %v2457_v7, %v2456_v30  ;;  %v2551_v41 = vsel %vm10152_vm13, %v2334_v43, %v2549_v21  ;;  %v3103_v46 = vadd.f32 %v3102_v15, %v3101_v28  ;;  %v3228_v38 = vrot.slane %v3227_v18, 1  ;;  %v1980_v43 = vld [vmem:[%s5011_s23 + $0xc8] sm:$0xff]  ;;  %v10161_v52 = vld [vmem:[#allocation93_spill] sm:$0xff] }
 0x2aa   : > { %v3269_v4 = vadd.f32 %v3268_v5, %v7875_v51  ;;  %v2553_v54 = vsel %vm10153_vm9, %v2376_v53, %v2551_v41  ;;  %v3145_v1 = vadd.f32 %v3144_v40, %v3143_v36  ;;  %v3187_v17 = vadd.f32 %v3186_v16, %v3185_v20  ;;  %v1983_v53 = vld [vmem:[%s5011_s23 + $0xe0] sm:$0xff]  ;;  %v1992_v15 = vld [vmem:[%s5011_s23 + $0x128] sm:$0xff]  ;;  %v1998_v40 = vld [vmem:[%s5011_s23 + $0x158] sm:$0xff] }
 0x2ab   : > { %v2459_v24 = vrot.slane %v2458_v35, 1  ;;  %v2555_v50 = vsel %vm10154_vm10, %v2418_v48, %v2553_v54  ;;  %v3229_v27 = vadd.f32 %v3228_v38, %v3227_v18  ;;  %v3311_v33 = vadd.f32 %v3310_v13, %v7877_v60  ;;  %v10163_v7 = vld [vmem:[#allocation94_spill] sm:$0xff]  ;;  %v1986_v48 = vld [vmem:[%s5011_s23 + $0xf8] sm:$0xff]  ;;  %v2001_v16 = vld [vmem:[%s5011_s23 + $0x170] sm:$0xff] }
 0x2ac   : > { %v4566_v47 = vpop.eup %4565  ;;  %v3270_v59 = vrot.slane %v3269_v4, 1  ;;  %v3353_v5 = vadd.f32 %v3352_v25, %v7895_v62  ;;  %v3395_v45 = vadd.f32 %v3394_v6, %v7898_v23  ;;  %v3481_v31 = vsel %vm10156_vm14, %v3145_v1, %v3103_v46  ;;  %v1956_v25 = vld [vmem:[%s5011_s23 + $0x8] sm:$0xff]  ;;  %v1995_v21 = vld [vmem:[%s5011_s23 + $0x140] sm:$0xff]  ;;  %vm10171_vm14 = vmmov %vm10159_vm15 }
 0x2ad   : > { %v3562_v55 = vmul.f32 %v4566_v47, %v10155_v39  ;;  %v2460_v51 = vadd.f32 %v2459_v24, %v2458_v35  ;;  %v3312_v0 = vrot.slane %v3311_v33, 1  ;;  %v3575_v60 = vsub.s32 0, %v7430_v2 }
 0x2ae   : > { %v3271_v10 = vadd.f32 %v3270_v59, %v3269_v4  ;;  %v3354_v26 = vrot.slane %v3353_v5, 1  ;;  %v3396_v62 = vrot.slane %v3395_v45, 1  ;;  %v3482_v6 = vsel %vm10158_vm2, %v3187_v17, %v3481_v31  ;;  %vm10172_vm2 = vmmov %vm10160_vm12 }
 0x2af   : > { %v3604_v13 = vmul.f32 %v7903_v58, %v3562_v55  ;;  %v2557_v63 = vsel %vm10157_vm0, %v2460_v51, %v2555_v50  ;;  %v3313_v23 = vadd.f32 %v3312_v0, %v3311_v33  ;;  %v7973_v29 = vrot.slane %v7890_v11, %v3575_v60  ;;  %v1962_v58 = vld [vmem:[%s5011_s23 + $0x38] sm:$0xff] }
 0x2b0   : > { %v7969_v37 = vadd.f32 %v2557_v63, %v2058_v56  ;;  %v3355_v3 = vadd.f32 %v3354_v26, %v3353_v5  ;;  %v3397_v57 = vadd.f32 %v3396_v62, %v3395_v45  ;;  %v3483_v14 = vsel %vm10159_vm15, %v3229_v27, %v3482_v6 }
 0x2b1   : > { %v3642_v49 = vadd.f32 %v7909_v22, %v3604_v13  ;;  %v3484_v11 = vsel %vm10160_vm12, %v3271_v10, %v3483_v14  ;;  %v7985_v30 = vrot.slane %v7893_v12, %v3575_v60  ;;  %v1977_v22 = vld [vmem:[%s5011_s23 + $0xb0] sm:$0xff]  ;;  %vm10162_vm11 = vnez %v10161_v52 }
 0x2b2   : > { %2605 = vst [vmem:[#allocation2 + $0x28] sm:$0xff] %v7969_v37  ;;  %v7992_v28 = vsel %vm10162_vm11, %v1956_v25, 0  ;;  %vm10164_vm1 = vnez %v10163_v7  ;;  %v3485_v20 = vsel %vm10142_vm8, %v3313_v23, %v3484_v11  ;;  %v8004_v12 = vsel %vm10162_vm11, %v1962_v58, 0 }
 0x2b3   : > { %v7996_v19 = vsel %vm10164_vm1, %v1959_v42, 0  ;;  %v3648_v36 = vmax.f32 %v3642_v49, 0.0  ;;  %v8008_v18 = vsel %vm10164_vm1, %v1965_v9, 0  ;;  %v3486_v35 = vsel %vm10147_vm7, %v3355_v3, %v3485_v20  ;;  %vm10173_vm7 = vmmov %vm10142_vm8 }
 0x2b4   : > { %v8016_v41 = vsel %vm10162_vm11, %v1968_v32, 0  ;;  %v8020_v46 = vsel %vm10164_vm1, %v1971_v44, 0  ;;  %v8024_v38 = vsel %vm10162_vm11, %v1974_v61, 0  ;;  %v3487_v4 = vsel %vm10165_vm3, %v3397_v57, %v3486_v35  ;;  %vm10175_vm8 = vmmov %vm10165_vm3 }
 0x2b5   : > { %3820 = vmatprep.mubr.f32.mxu0 %v3648_v36  ;;  %v8029_v24 = vsel %vm10164_vm1, %v1977_v22, 0  ;;  %v8033_v54 = vsel %vm10162_vm11, %v1980_v43, 0  ;;  %v8037_v1 = vsel %vm10164_vm1, %v1983_v53, 0  ;;  %v3529_v17 = vadd.f32 %v3487_v4, %v2611_v34 }
 0x2b6   : > { %v8041_v47 = vsel %vm10162_vm11, %v1986_v48, 0  ;;  %v8045_v50 = vsel %vm10164_vm1, %v1989_v8, 0  ;;  %v8049_v27 = vsel %vm10162_vm11, %v1992_v15, 0  ;;  %v8053_v59 = vsel %vm10164_vm1, %v1995_v21, 0 }
 0x2b7   : > { %10166 = vst [vmem:[#allocation95_spill] sm:$0xff] %v8049_v27  ;;  %10167 = vst [vmem:[#allocation96_spill] sm:$0xff] %v8053_v59  ;;  %v8057_v33 = vsel %vm10162_vm11, %v1998_v40, 0  ;;  %v8061_v39 = vsel %vm10164_vm1, %v2001_v16, 0  ;;  %v2067_v55 = vunpack.c.h.bf16 %v7992_v28  ;;  %v3553_v56 = vmax.f32 %v3529_v17, 1.0 }
 0x2b8   : > { %10168 = vst [vmem:[#allocation97_spill] sm:$0xff] %v8057_v33  ;;  %10169 = vst [vmem:[#allocation98_spill] sm:$0xff] %v8061_v39  ;;  %v2073_v51 = vunpack.c.h.bf16 %v7996_v19  ;;  %v2079_v5 = vunpack.c.h.bf16 %v8004_v12  ;;  %v2085_v45 = vunpack.c.h.bf16 %v8008_v18  ;;  %v2091_v10 = vunpack.c.h.bf16 %v8016_v41 }
 0x2b9   : > { %3535 = vst [vmem:[#allocation3] sm:$0xff] %v3529_v17  ;;  %v2097_v0 = vunpack.c.h.bf16 %v8020_v46  ;;  %v2103_v31 = vunpack.c.h.bf16 %v8024_v38  ;;  %v2109_v60 = vunpack.c.h.bf16 %v8029_v24  ;;  %4567 = vrcp.f32 %v3553_v56 }
 0x2ba   : > { %v2115_v13 = vunpack.c.h.bf16 %v8033_v54  ;;  %v2121_v63 = vunpack.c.h.bf16 %v8037_v1  ;;  %v2127_v26 = vunpack.c.h.bf16 %v8041_v47  ;;  %v2133_v62 = vunpack.c.h.bf16 %v8045_v50 }
 0x2bb   : > { %v2139_v25 = vunpack.c.h.bf16 %v8049_v27  ;;  %v2145_v42 = vunpack.c.h.bf16 %v8053_v59  ;;  %v2151_v23 = vunpack.c.h.bf16 %v8057_v33  ;;  %v2157_v6 = vunpack.c.h.bf16 %v8061_v39 }
 0x2bc   : > { %v2181_v58 = vadd.f32 %v2073_v51, %v2067_v55  ;;  %v2223_v9 = vadd.f32 %v2085_v45, %v2079_v5  ;;  %v2265_v49 = vadd.f32 %v2097_v0, %v2091_v10  ;;  %v2307_v34 = vadd.f32 %v2109_v60, %v2103_v31 }
 0x2bd   : > { %v2349_v3 = vadd.f32 %v2121_v63, %v2115_v13  ;;  %v2391_v57 = vadd.f32 %v2133_v62, %v2127_v26  ;;  %v2433_v14 = vadd.f32 %v2145_v42, %v2139_v25  ;;  %v2475_v11 = vadd.f32 %v2157_v6, %v2151_v23 }
 0x2be   : > { %v2182_v32 = vrot.slane %v2181_v58, 4  ;;  %v2224_v44 = vrot.slane %v2223_v9, 4  ;;  %v2266_v61 = vrot.slane %v2265_v49, 4  ;;  %v2308_v22 = vrot.slane %v2307_v34, 4 }
 0x2bf   : > { %v2350_v43 = vrot.slane %v2349_v3, 4  ;;  %v2392_v53 = vrot.slane %v2391_v57, 4  ;;  %v2434_v36 = vrot.slane %v2433_v14, 4  ;;  %v2476_v15 = vrot.slane %v2475_v11, 4 }
 0x2c0   : > { %v2183_v20 = vadd.f32 %v2182_v32, %v2181_v58  ;;  %v2225_v48 = vadd.f32 %v2224_v44, %v2223_v9  ;;  %v2267_v8 = vadd.f32 %v2266_v61, %v2265_v49  ;;  %v2309_v35 = vadd.f32 %v2308_v22, %v2307_v34 }
 0x2c1   : > { %v2351_v21 = vadd.f32 %v2350_v43, %v2349_v3  ;;  %v2393_v40 = vadd.f32 %v2392_v53, %v2391_v57  ;;  %v2435_v16 = vadd.f32 %v2434_v36, %v2433_v14  ;;  %v2477_v56 = vadd.f32 %v2476_v15, %v2475_v11 }
 0x2c2   : > { %v2184_v4 = vrot.slane %v2183_v20, 2  ;;  %v2226_v17 = vrot.slane %v2225_v48, 2  ;;  %v2268_v55 = vrot.slane %v2267_v8, 2  ;;  %v2310_v51 = vrot.slane %v2309_v35, 2 }
 0x2c3   : > { %v2352_v5 = vrot.slane %v2351_v21, 2  ;;  %v2394_v45 = vrot.slane %v2393_v40, 2  ;;  %v2436_v10 = vrot.slane %v2435_v16, 2  ;;  %v2478_v13 = vrot.slane %v2477_v56, 2 }
 0x2c4   : > { %v2185_v0 = vadd.f32 %v2184_v4, %v2183_v20  ;;  %v2227_v31 = vadd.f32 %v2226_v17, %v2225_v48  ;;  %v2269_v60 = vadd.f32 %v2268_v55, %v2267_v8  ;;  %v2311_v63 = vadd.f32 %v2310_v51, %v2309_v35  ;;  %v3747_v17 = vld [vmem:[#allocation10 + $0x2f0] sm:$0xff] }
 0x2c5   : > { %v2353_v26 = vadd.f32 %v2352_v5, %v2351_v21  ;;  %v2395_v62 = vadd.f32 %v2394_v45, %v2393_v40  ;;  %v2437_v25 = vadd.f32 %v2436_v10, %v2435_v16  ;;  %v2479_v58 = vadd.f32 %v2478_v13, %v2477_v56  ;;  %v3732_v40 = vld [vmem:[#allocation10 + $0x278] sm:$0xff]  ;;  %v3731_v56 = vld [vmem:[#allocation10 + $0x270] sm:$0xff] }
 0x2c6   : > { %v2186_v42 = vrot.slane %v2185_v0, 1  ;;  %v2228_v23 = vrot.slane %v2227_v31, 1  ;;  %v2270_v6 = vrot.slane %v2269_v60, 1  ;;  %v4568_v9 = vpop.eup %4567  ;;  %v2312_v49 = vrot.slane %v2311_v63, 1  ;;  %v2061_v16 = vld [vmem:[#allocation2] sm:$0xff] }
 0x2c7   : > { %v2354_v34 = vrot.slane %v2353_v26, 1  ;;  %v2396_v3 = vrot.slane %v2395_v62, 1  ;;  %v2438_v57 = vrot.slane %v2437_v25, 1  ;;  %v3560_v14 = vmul.f32 %v4568_v9, %v7969_v37 }
 0x2c8   : > { %v2187_v32 = vadd.f32 %v2186_v42, %v2185_v0  ;;  %v2229_v44 = vadd.f32 %v2228_v23, %v2227_v31  ;;  %v2271_v61 = vadd.f32 %v2270_v6, %v2269_v60  ;;  %v2313_v11 = vadd.f32 %v2312_v49, %v2311_v63  ;;  %v3746_v31 = vld [vmem:[#allocation10 + $0x2e8] sm:$0xff] }
 0x2c9   : > { %v2355_v22 = vadd.f32 %v2354_v34, %v2353_v26  ;;  %v2397_v43 = vadd.f32 %v2396_v3, %v2395_v62  ;;  %v2439_v53 = vadd.f32 %v2438_v57, %v2437_v25  ;;  %v3603_v36 = vmul.f32 %v7973_v29, %v3560_v14  ;;  %v3730_v62 = vld [vmem:[#allocation10 + $0x268] sm:$0xff]  ;;  %v3729_v57 = vld [vmem:[#allocation10 + $0x260] sm:$0xff] }
 0x2ca   : > { %v2480_v20 = vrot.slane %v2479_v58, 1  ;;  %v2572_v48 = vsel %vm10149_vm4, %v2229_v44, %v2187_v32  ;;  %vm2618_vm5 = vcmp.ne.bf16.partialorder %v7992_v28, 0  ;;  %vm2621_vm13 = vcmp.ne.bf16.partialorder %v7996_v19, 0 }
 0x2cb   : > { %v2573_v8 = vsel %vm10170_vm6, %v2271_v61, %v2572_v48  ;;  %vm2624_vm9 = vcmp.ne.bf16.partialorder %v8004_v12, 0  ;;  %vm2627_vm10 = vcmp.ne.bf16.partialorder %v8008_v18, 0  ;;  %v3641_v37 = vadd.f32 %v7985_v30, %v3603_v36 }
 0x2cc   : > { %v2481_v15 = vadd.f32 %v2480_v20, %v2479_v58  ;;  %v2574_v35 = vsel %vm10171_vm14, %v2313_v11, %v2573_v8  ;;  %vm2630_vm0 = vcmp.ne.bf16.partialorder %v8016_v41, 0  ;;  %vm2645_vm4 = vcmp.ne.bf16.partialorder %v8037_v1, 0  ;;  %v3745_v58 = vld [vmem:[#allocation10 + $0x2e0] sm:$0xff]  ;;  %v3744_v11 = vld [vmem:[#allocation10 + $0x2d8] sm:$0xff] }
 0x2cd   : > { %v2575_v29 = vsel %vm10172_vm2, %v2355_v22, %v2574_v35  ;;  %v3647_v21 = vmax.f32 %v3641_v37, 0.0  ;;  %vm10174_vm6 = vcmask 1046534   ;;  %vm2648_vm14 = vcmp.ne.bf16.partialorder %v8041_v47, 0  ;;  %v3728_v20 = vld [vmem:[#allocation10 + $0x258] sm:$0xff]  ;;  %v3743_v35 = vld [vmem:[#allocation10 + $0x2d0] sm:$0xff] }
 0x2ce   : > { %v2576_v4 = vsel %vm10173_vm7, %v2397_v43, %v2575_v29  ;;  %vm2651_vm2 = vcmp.ne.bf16.partialorder %v8045_v50, 0  ;;  %vm2654_vm15 = vcmp.ne.bf16.partialorder %v8049_v27, 0  ;;  %vm2657_vm12 = vcmp.ne.bf16.partialorder %v8053_v59, 0 }
 0x2cf   : > { %v2577_v30 = vsel %vm10174_vm6, %v2439_v53, %v2576_v4  ;;  %3821 = vmatmul.mubr.f32.vlgmr.msra.gmra.mxu0 %v3647_v21  ;;  %vm2660_vm7 = vcmp.ne.bf16.partialorder %v8057_v33, 0  ;;  %vm2663_vm3 = vcmp.ne.bf16.partialorder %v8061_v39, 0  ;;  %v10177_v5 = vmov 0   ;;  %v3727_v4 = vld [vmem:[#allocation10 + $0x250] sm:$0xff] }
 0x2d0   : > { %v2578_v55 = vsel %vm10175_vm8, %v2481_v15, %v2577_v30  ;;  %4387 = vmatpush3.msra.mxu0 %v3732_v40  ;;  %v8110_v45 = vsel %vm2618_vm5, 65537, %v10177_v5  ;;  %v8115_v10 = vsel %vm2621_vm13, 65537, %v10177_v5  ;;  %v8120_v0 = vsel %vm2624_vm9, 65537, %v10177_v5 }
 0x2d1   : > { %v8105_v51 = vadd.f32 %v2578_v55, %v2061_v16  ;;  %v8125_v60 = vsel %vm2627_vm10, 65537, %v10177_v5  ;;  %v8130_v13 = vsel %vm2630_vm0, 65537, %v10177_v5  ;;  %vm10178_vm5 = vcmp.ne.bf16.partialorder %v8020_v46, 0  ;;  %4388 = vmatprep.subr.mxu0 %v3747_v17 }
 0x2d2   : > { %v8135_v63 = vsel %vm10178_vm5, 65537, %v10177_v5  ;;  %vm10179_vm13 = vcmp.ne.bf16.partialorder %v8024_v38, 0  ;;  %vm10180_vm9 = vcmp.ne.bf16.partialorder %v8029_v24, 0  ;;  %vm10181_vm10 = vcmp.ne.bf16.partialorder %v8033_v54, 0  ;;  %4389 = vmatpush3.msra.mxu0 %v3731_v56 }
 0x2d3   : > { %10176 = vst [vmem:[#allocation99_spill] sm:$0xff] %v8105_v51  ;;  %v8140_v26 = vsel %vm10179_vm13, 65537, %v10177_v5  ;;  %2608 = vst [vmem:[#allocation2] sm:$0xff] %v8105_v51  ;;  %v8146_v25 = vsel %vm10180_vm9, 65537, %v10177_v5  ;;  %v8151_v42 = vsel %vm10181_vm10, 65537, %v10177_v5  ;;  %v8156_v23 = vsel %vm2645_vm4, 65537, %v10177_v5  ;;  %4390 = vmatprep.subr.mxu0 %v3746_v31 }
 0x2d4   : > { %v8161_v6 = vsel %vm2648_vm14, 65537, %v10177_v5  ;;  %v8166_v9 = vsel %vm2651_vm2, 65537, %v10177_v5  ;;  %v8171_v49 = vsel %vm2654_vm15, 65537, %v10177_v5  ;;  %v8176_v34 = vsel %vm2657_vm12, 65537, %v10177_v5  ;;  %4391 = vmatpush3.msra.mxu0 %v3730_v62 }
 0x2d5   : > { %v8181_v3 = vsel %vm2660_vm7, 65537, %v10177_v5  ;;  %v8186_v14 = vsel %vm2663_vm3, 65537, %v10177_v5  ;;  %v2715_v32 = vunpack.c.l.b16 %v8110_v45  ;;  %v2716_v44 = vunpack.c.h.b16 %v8110_v45  ;;  %4392 = vmatprep.subr.mxu0 %v3745_v58  ;;  %v3742_v45 = vld [vmem:[#allocation10 + $0x2c8] sm:$0xff] }
 0x2d6   : > { %v2721_v61 = vunpack.c.l.b16 %v8115_v10  ;;  %v2722_v22 = vunpack.c.h.b16 %v8115_v10  ;;  %v2727_v43 = vunpack.c.l.b16 %v8120_v0  ;;  %v2728_v53 = vunpack.c.h.b16 %v8120_v0  ;;  %4393 = vmatpush3.msra.mxu0 %v3729_v57 }
 0x2d7   : > { %v2733_v36 = vunpack.c.l.b16 %v8125_v60  ;;  %v2734_v48 = vunpack.c.h.b16 %v8125_v60  ;;  %v2739_v8 = vunpack.c.l.b16 %v8130_v13  ;;  %v2740_v37 = vunpack.c.h.b16 %v8130_v13  ;;  %4394 = vmatprep.subr.mxu0 %v3744_v11  ;;  %v3726_v13 = vld [vmem:[#allocation10 + $0x248] sm:$0xff]  ;;  %v3725_v11 = vld [vmem:[#allocation10 + $0x240] sm:$0xff] }
 0x2d8   : > { %v2745_v15 = vunpack.c.l.b16 %v8135_v63  ;;  %v2746_v29 = vunpack.c.h.b16 %v8135_v63  ;;  %v2751_v21 = vunpack.c.l.b16 %v8140_v26  ;;  %v2752_v40 = vunpack.c.h.b16 %v8140_v26  ;;  %4395 = vmatpush3.msra.mxu0 %v3728_v20 }
 0x2d9   : > { %v2757_v16 = vunpack.c.l.b16 %v8146_v25  ;;  %v2758_v30 = vunpack.c.h.b16 %v8146_v25  ;;  %v2763_v17 = vunpack.c.l.b16 %v8151_v42  ;;  %v2764_v55 = vunpack.c.h.b16 %v8151_v42  ;;  %4396 = vmatprep.subr.mxu0 %v3743_v35  ;;  %v3741_v42 = vld [vmem:[#allocation10 + $0x2c0] sm:$0xff] }
 0x2da   : > { %v2769_v56 = vunpack.c.l.b16 %v8156_v23  ;;  %v2770_v10 = vunpack.c.h.b16 %v8156_v23  ;;  %v2775_v0 = vunpack.c.l.b16 %v8161_v6  ;;  %v2776_v31 = vunpack.c.h.b16 %v8161_v6  ;;  %4397 = vmatpush3.msra.mxu0 %v3727_v4 }
 0x2db   : > { %v2781_v60 = vunpack.c.l.b16 %v8166_v9  ;;  %v2782_v63 = vunpack.c.h.b16 %v8166_v9  ;;  %v2787_v26 = vunpack.c.l.b16 %v8171_v49  ;;  %v2788_v62 = vunpack.c.h.b16 %v8171_v49  ;;  %4398 = vmatprep.subr.mxu0 %v3742_v45 }
 0x2dc   : > { %v2793_v25 = vunpack.c.l.b16 %v8176_v34  ;;  %v2794_v23 = vunpack.c.h.b16 %v8176_v34  ;;  %v2799_v58 = vunpack.c.l.b16 %v8181_v3  ;;  %v2800_v6 = vunpack.c.h.b16 %v8181_v3  ;;  %4399 = vmatpush3.msra.mxu0 %v3726_v13  ;;  %v3740_v3 = vld [vmem:[#allocation10 + $0x2b8] sm:$0xff] }
 0x2dd   : > { %v2805_v57 = vunpack.c.l.b16 %v8186_v14  ;;  %v2806_v9 = vunpack.c.h.b16 %v8186_v14  ;;  %vm8220_vm0 = vcmp.ne.s32.totalorder %v2715_v32, 0  ;;  %vm8224_vm15 = vcmp.ne.s32.totalorder %v2716_v44, 0  ;;  %4400 = vmatprep.subr.mxu0 %v3741_v42  ;;  %v3720_v34 = vld [vmem:[#allocation10 + $0x218] sm:$0xff]  ;;  %v3735_v44 = vld [vmem:[#allocation10 + $0x290] sm:$0xff] }
 0x2de   : > { %vm8228_vm12 = vcmp.ne.s32.totalorder %v2721_v61, 0  ;;  %vm8232_vm8 = vcmp.ne.s32.totalorder %v2722_v22, 0  ;;  %vm8236_vm3 = vcmp.ne.s32.totalorder %v2727_v43, 0  ;;  %vm8240_vm4 = vcmp.ne.s32.totalorder %v2728_v53, 0  ;;  %v3724_v61 = vld [vmem:[#allocation10 + $0x238] sm:$0xff]  ;;  %4401 = vmatpush3.msra.mxu0 %v3725_v11 }
 0x2df   : > { %vm8244_vm6 = vcmp.ne.s32.totalorder %v2733_v36, 0  ;;  %vm8248_vm14 = vcmp.ne.s32.totalorder %v2734_v48, 0  ;;  %vm8252_vm2 = vcmp.ne.s32.totalorder %v2739_v8, 0  ;;  %vm8256_vm7 = vcmp.ne.s32.totalorder %v2740_v37, 0  ;;  %v3739_v36 = vld [vmem:[#allocation10 + $0x2b0] sm:$0xff]  ;;  %4402 = vmatprep.subr.mxu0 %v3740_v3 }
 0x2e0   : > { %vm8260_vm5 = vcmp.ne.s32.totalorder %v2745_v15, 0  ;;  %v10202_v53 = vmov 0  ;;  %vm8264_vm13 = vcmp.ne.s32.totalorder %v2746_v29, 0  ;;  %v10204_v45 = vmov 0  ;;  %v3723_v15 = vld [vmem:[#allocation10 + $0x230] sm:$0xff]  ;;  %4403 = vmatpush3.msra.mxu0 %v3724_v61 }
 0x2e1   : > { %v10203_v53 = vsel %vm8260_vm5, 4294967295, %v10202_v53  ;;  %v10205_v45 = vsel %vm8264_vm13, 4294967295, %v10204_v45  ;;  %vm8268_vm9 = vcmp.ne.s32.totalorder %v2751_v21, 0  ;;  %v10206_v48 = vmov 0  ;;  %4404 = vmatprep.subr.mxu0 %v3739_v36  ;;  %v3736_v36 = vld [vmem:[#allocation10 + $0x298] sm:$0xff] }
 0x2e2   : > { %v10207_v48 = vsel %vm8268_vm9, 4294967295, %v10206_v48  ;;  %vm8272_vm10 = vcmp.ne.s32.totalorder %v2752_v40, 0  ;;  %v10208_v8 = vmov 0  ;;  %vm8276_vm1 = vcmp.ne.s32.totalorder %v2757_v16, 0  ;;  %v3738_v16 = vld [vmem:[#allocation10 + $0x2a8] sm:$0xff]  ;;  %4405 = vmatpush3.msra.mxu0 %v3723_v15 }
 0x2e3   : > { %v10209_v8 = vsel %vm8272_vm10, 4294967295, %v10208_v8  ;;  %v10210_v37 = vmov 0  ;;  %vm8280_vm11 = vcmp.ne.s32.totalorder %v2758_v30, 0  ;;  %v10212_v13 = vmov 0  ;;  %4406 = vmatprep.subr.mxu0 %v3738_v16 }
 0x2e4   : > { %v10211_v37 = vsel %vm8276_vm1, 4294967295, %v10210_v37  ;;  %v10213_v13 = vsel %vm8280_vm11, 4294967295, %v10212_v13  ;;  %vm8284_vm5 = vcmp.ne.s32.totalorder %v2763_v17, 0  ;;  %v10214_v29 = vmov 0 }
 0x2e5   : > { %v10215_v29 = vsel %vm8284_vm5, 4294967295, %v10214_v29  ;;  %vm8288_vm13 = vcmp.ne.s32.totalorder %v2764_v55, 0  ;;  %v10216_v21 = vmov 0  ;;  %vm8292_vm9 = vcmp.ne.s32.totalorder %v2769_v56, 0  ;;  %v3722_v56 = vld [vmem:[#allocation10 + $0x228] sm:$0xff] }
 0x2e6   : > { %v10217_v21 = vsel %vm8288_vm13, 4294967295, %v10216_v21  ;;  %v10218_v40 = vmov 0  ;;  %vm8296_vm1 = vcmp.ne.s32.totalorder %v2770_v10, 0  ;;  %v10220_v42 = vmov 0  ;;  %4407 = vmatpush3.msra.mxu0 %v3722_v56 }
 0x2e7   : > { %v10219_v40 = vsel %vm8292_vm9, 4294967295, %v10218_v40  ;;  %v10221_v42 = vsel %vm8296_vm1, 4294967295, %v10220_v42  ;;  %vm8300_vm10 = vcmp.ne.s32.totalorder %v2775_v0, 0  ;;  %v10222_v30 = vmov 0 }
 0x2e8   : > { %v10223_v30 = vsel %vm8300_vm10, 4294967295, %v10222_v30  ;;  %vm8304_vm11 = vcmp.ne.s32.totalorder %v2776_v31, 0  ;;  %v10224_v17 = vmov 0  ;;  %vm8308_vm5 = vcmp.ne.s32.totalorder %v2781_v60, 0  ;;  %v3737_v60 = vld [vmem:[#allocation10 + $0x2a0] sm:$0xff] }
 0x2e9   : > { %v10225_v17 = vsel %vm8304_vm11, 4294967295, %v10224_v17  ;;  %v10226_v55 = vmov 0  ;;  %vm8312_vm9 = vcmp.ne.s32.totalorder %v2782_v63, 0  ;;  %v10228_v11 = vmov 0  ;;  %4408 = vmatprep.subr.mxu0 %v3737_v60 }
 0x2ea   : > { %v10227_v55 = vsel %vm8308_vm5, 4294967295, %v10226_v55  ;;  %v10229_v11 = vsel %vm8312_vm9, 4294967295, %v10228_v11  ;;  %vm8316_vm13 = vcmp.ne.s32.totalorder %v2787_v26, 0  ;;  %v10230_v10 = vmov 0 }
 0x2eb   : > { %v10231_v10 = vsel %vm8316_vm13, 4294967295, %v10230_v10  ;;  %vm8320_vm1 = vcmp.ne.s32.totalorder %v2788_v62, 0  ;;  %vm8324_vm10 = vcmp.ne.s32.totalorder %v2793_v25, 0  ;;  %v10234_v31 = vmov 0  ;;  %v3721_v25 = vld [vmem:[#allocation10 + $0x220] sm:$0xff] }
 0x2ec   : > { %v10235_v31 = vsel %vm8324_vm10, 4294967295, %v10234_v31  ;;  %vm8328_vm5 = vcmp.ne.s32.totalorder %v2794_v23, 0  ;;  %vm8332_vm11 = vcmp.ne.s32.totalorder %v2799_v58, 0  ;;  %vm8336_vm9 = vcmp.ne.s32.totalorder %v2800_v6, 0  ;;  %4409 = vmatpush3.msra.mxu0 %v3721_v25 }
 0x2ed   : > { %vm8340_vm13 = vcmp.ne.s32.totalorder %v2805_v57, 0  ;;  %vm8344_vm10 = vcmp.ne.s32.totalorder %v2806_v9, 0  ;;  %v10246_v23 = vmov 0.0   ;;  %4410 = vmatprep.subr.mxu0 %v3736_v36 }
 0x2ee   : > { %v4217_v58 = vsel %vm8220_vm0, 1.0, %v10246_v23  ;;  %v4218_v6 = vsel %vm8224_vm15, 1.0, %v10246_v23  ;;  %v4223_v57 = vsel %vm8228_vm12, 1.0, %v10246_v23  ;;  %v4224_v9 = vsel %vm8232_vm8, 1.0, %v10246_v23  ;;  %4411 = vmatpush3.msra.mxu0 %v3720_v34  ;;  %v3717_v34 = vld [vmem:[#allocation10 + $0x200] sm:$0xff] }
 0x2ef   : > { %v4229_v15 = vsel %vm8236_vm3, 1.0, %v10246_v23  ;;  %v4230_v20 = vsel %vm8240_vm4, 1.0, %v10246_v23  ;;  %v4235_v49 = vsel %vm8244_vm6, 1.0, %v10246_v23  ;;  %v4236_v16 = vsel %vm8248_vm14, 1.0, %v10246_v23  ;;  %4412 = vmatprep.subr.mxu0 %v3735_v44 }
 0x2f0   : > { %v4241_v35 = vsel %vm8252_vm2, 1.0, %v10246_v23  ;;  %v4242_v14 = vsel %vm8256_vm7, 1.0, %v10246_v23  ;;  %vm10247_vm0 = vnez %v10203_v53  ;;  %vm10248_vm15 = vnez %v10205_v45  ;;  %v3719_v53 = vld [vmem:[#allocation10 + $0x210] sm:$0xff] }
 0x2f1   : > { %v4247_v32 = vsel %vm10247_vm0, 1.0, %v10246_v23  ;;  %v4248_v56 = vsel %vm10248_vm15, 1.0, %v10246_v23  ;;  %vm10249_vm12 = vnez %v10207_v48  ;;  %vm10250_vm8 = vnez %v10209_v8  ;;  %4413 = vmatpush3.msra.mxu0 %v3719_v53 }
 0x2f2   : > { %v4253_v4 = vsel %vm10249_vm12, 1.0, %v10246_v23  ;;  %v4254_v22 = vsel %vm10250_vm8, 1.0, %v10246_v23  ;;  %vm10251_vm3 = vnez %v10211_v37  ;;  %vm10252_vm4 = vnez %v10213_v13  ;;  %v3734_v37 = vld [vmem:[#allocation10 + $0x288] sm:$0xff] }
 0x2f3   : > { %v4259_v43 = vsel %vm10251_vm3, 1.0, %v10246_v23  ;;  %v4260_v60 = vsel %vm10252_vm4, 1.0, %v10246_v23  ;;  %vm10253_vm6 = vnez %v10215_v29  ;;  %vm10254_vm14 = vnez %v10217_v21  ;;  %4414 = vmatprep.subr.mxu0 %v3734_v37 }
 0x2f4   : > { %v4265_v45 = vsel %vm10253_vm6, 1.0, %v10246_v23  ;;  %v4266_v48 = vsel %vm10254_vm14, 1.0, %v10246_v23  ;;  %vm10255_vm2 = vnez %v10219_v40  ;;  %vm10256_vm7 = vnez %v10221_v42  ;;  %v3718_v40 = vld [vmem:[#allocation10 + $0x208] sm:$0xff] }
 0x2f5   : > { %v4271_v8 = vsel %vm10255_vm2, 1.0, %v10246_v23  ;;  %v4272_v25 = vsel %vm10256_vm7, 1.0, %v10246_v23  ;;  %vm10257_vm0 = vnez %v10223_v30  ;;  %vm10258_vm15 = vnez %v10225_v17  ;;  %4415 = vmatpush3.msra.mxu0 %v3718_v40 }
 0x2f6   : > { %v4277_v13 = vsel %vm10257_vm0, 1.0, %v10246_v23  ;;  %v4278_v29 = vsel %vm10258_vm15, 1.0, %v10246_v23  ;;  %vm10259_vm12 = vnez %v10227_v55  ;;  %vm10260_vm8 = vnez %v10229_v11  ;;  %v3733_v55 = vld [vmem:[#allocation10 + $0x280] sm:$0xff] }
 0x2f7   : > { %v4283_v21 = vsel %vm10259_vm12, 1.0, %v10246_v23  ;;  %v4284_v36 = vsel %vm10260_vm8, 1.0, %v10246_v23  ;;  %vm10261_vm3 = vnez %v10231_v10  ;;  %v8428_v30 = vsel %vm8320_vm1, 1.0, %v10246_v23  ;;  %4416 = vmatprep.subr.mxu0 %v3733_v55 }
 0x2f8   : > { %v8423_v42 = vsel %vm10261_vm3, 1.0, %v10246_v23  ;;  %vm10262_vm4 = vnez %v10235_v31  ;;  %v8438_v11 = vsel %vm8328_vm5, 1.0, %v10246_v23  ;;  %v8443_v10 = vsel %vm8332_vm11, 1.0, %v10246_v23  ;;  %4417 = vmatpush3.msra.mxu0 %v3717_v34 }
 0x2f9   : > { %v8433_v17 = vsel %vm10262_vm4, 1.0, %v10246_v23  ;;  %v8448_v0 = vsel %vm8336_vm9, 1.0, %v10246_v23  ;;  %v8453_v31 = vsel %vm8340_vm13, 1.0, %v10246_v23  ;;  %v8458_v3 = vsel %vm8344_vm10, 1.0, %v10246_v23 }
 0x2fa   : > { %v3111_v63 = vadd.f32 %v4223_v57, %v4217_v58  ;;  %v3118_v44 = vadd.f32 %v4224_v9, %v4218_v6  ;;  %v3153_v53 = vadd.f32 %v4235_v49, %v4229_v15  ;;  %v3160_v5 = vadd.f32 %v4236_v16, %v4230_v20 }
 0x2fb   : > { %v3195_v26 = vadd.f32 %v4247_v32, %v4241_v35  ;;  %v3202_v7 = vadd.f32 %v4248_v56, %v4242_v14  ;;  %v3237_v52 = vadd.f32 %v4259_v43, %v4253_v4  ;;  %v3244_v33 = vadd.f32 %v4260_v60, %v4254_v22 }
 0x2fc   : > { %v3112_v51 = vrot.slane %v3111_v63, 4  ;;  %v3119_v62 = vrot.slane %v3118_v44, 4  ;;  %v3154_v39 = vrot.slane %v3153_v53, 4  ;;  %v3161_v37 = vrot.slane %v3160_v5, 4 }
 0x2fd   : > { %v3196_v59 = vrot.slane %v3195_v26, 4  ;;  %v3203_v27 = vrot.slane %v3202_v7, 4  ;;  %v3238_v61 = vrot.slane %v3237_v52, 4  ;;  %v3245_v57 = vrot.slane %v3244_v33, 4 }
 0x2fe   : > { %v8460_v23 = vadd.f32 %v3112_v51, %v3111_v63  ;;  %v3120_v58 = vadd.f32 %v3119_v62, %v3118_v44  ;;  %v8462_v6 = vadd.f32 %v3154_v39, %v3153_v53  ;;  %v3162_v9 = vadd.f32 %v3161_v37, %v3160_v5 }
 0x2ff   : > { %v8464_v15 = vadd.f32 %v3196_v59, %v3195_v26  ;;  %v3204_v20 = vadd.f32 %v3203_v27, %v3202_v7  ;;  %v8466_v49 = vadd.f32 %v3238_v61, %v3237_v52  ;;  %v3246_v32 = vadd.f32 %v3245_v57, %v3244_v33 }
 0x300   : > { %v3114_v16 = vrot.slane %v8460_v23, 2  ;;  %v3121_v35 = vrot.slane %v3120_v58, 2  ;;  %v3156_v14 = vrot.slane %v8462_v6, 2  ;;  %v3163_v56 = vrot.slane %v3162_v9, 2 }
 0x301   : > { %v3198_v51 = vrot.slane %v8464_v15, 2  ;;  %v3205_v4 = vrot.slane %v3204_v20, 2  ;;  %v3240_v39 = vrot.slane %v8466_v49, 2  ;;  %v3247_v43 = vrot.slane %v3246_v32, 2 }
 0x302   : > { %v3122_v22 = vadd.f32 %v3121_v35, %v3120_v58  ;;  %v3279_v5 = vadd.f32 %v4271_v8, %v4265_v45  ;;  %v3286_v59 = vadd.f32 %v4272_v25, %v4266_v48  ;;  %v3164_v60 = vadd.f32 %v3163_v56, %v3162_v9 }
 0x303   : > { %v3206_v7 = vadd.f32 %v3205_v4, %v3204_v20  ;;  %v3321_v52 = vadd.f32 %v4283_v21, %v4277_v13  ;;  %v3328_v27 = vadd.f32 %v4284_v36, %v4278_v29  ;;  %v3248_v55 = vadd.f32 %v3247_v43, %v3246_v32 }
 0x304   : > { %v3123_v40 = vrot.slane %v3122_v22, 1  ;;  %v3280_v34 = vrot.slane %v3279_v5, 4  ;;  %v3287_v63 = vrot.slane %v3286_v59, 4  ;;  %v3165_v44 = vrot.slane %v3164_v60, 1 }
 0x305   : > { %v3207_v33 = vrot.slane %v3206_v7, 1  ;;  %v3322_v53 = vrot.slane %v3321_v52, 4  ;;  %v3329_v26 = vrot.slane %v3328_v27, 4  ;;  %v3249_v37 = vrot.slane %v3248_v55, 1 }
 0x306   : > { %v3124_v62 = vadd.f32 %v3123_v40, %v3122_v22  ;;  %v8472_v61 = vadd.f32 %v3280_v34, %v3279_v5  ;;  %v3288_v58 = vadd.f32 %v3287_v63, %v3286_v59  ;;  %v3166_v57 = vadd.f32 %v3165_v44, %v3164_v60  ;;  %v8497_v44 = vld [vmem:[#allocation7] sm:$0x3f] }
 0x307   : > { %v3208_v45 = vadd.f32 %v3207_v33, %v3206_v7  ;;  %v8474_v48 = vadd.f32 %v3322_v53, %v3321_v52  ;;  %v3330_v8 = vadd.f32 %v3329_v26, %v3328_v27  ;;  %v3250_v25 = vadd.f32 %v3249_v37, %v3248_v55 }
 0x308   : > { %v3282_v13 = vrot.slane %v8472_v61, 2  ;;  %v3289_v29 = vrot.slane %v3288_v58, 2  ;;  %v3363_v21 = vadd.f32 %v8433_v17, %v8423_v42  ;;  %v3370_v20 = vadd.f32 %v8438_v11, %v8428_v30 }
 0x309   : > { %v3324_v36 = vrot.slane %v8474_v48, 2  ;;  %v3331_v9 = vrot.slane %v3330_v8, 2  ;;  %v3405_v35 = vadd.f32 %v8453_v31, %v8443_v10  ;;  %v3412_v4 = vadd.f32 %v8458_v3, %v8448_v0 }
 0x30a   : > { %v3290_v32 = vadd.f32 %v3289_v29, %v3288_v58  ;;  %v3364_v56 = vrot.slane %v3363_v21, 4  ;;  %vm10263_vm11 = vcmask 1041409   ;;  %v3371_v5 = vrot.slane %v3370_v20, 4 }
 0x30b   : > { %v3502_v22 = vsel %vm10263_vm11, %v3166_v57, %v3124_v62  ;;  %v3332_v43 = vadd.f32 %v3331_v9, %v3330_v8  ;;  %v3406_v59 = vrot.slane %v3405_v35, 4  ;;  %vm10264_vm1 = vcmask 1042434   ;;  %v8503_v62 = vld [vmem:[#allocation9] sm:$0x3f]  ;;  %vm10274_vm14 = vmmov %vm10263_vm11 }
 0x30c   : > { %v3503_v42 = vsel %vm10264_vm1, %v3208_v45, %v3502_v22  ;;  %v3291_v17 = vrot.slane %v3290_v32, 1  ;;  %v8488_v60 = vadd.f32 %v3364_v56, %v3363_v21  ;;  %v3413_v7 = vrot.slane %v3412_v4, 4  ;;  %vm10275_vm2 = vmmov %vm10264_vm1 }
 0x30d   : > { %vm10265_vm5 = vcmask 1043459   ;;  %v3333_v11 = vrot.slane %v3332_v43, 1  ;;  %v3372_v10 = vadd.f32 %v3371_v5, %v3370_v20  ;;  %v8491_v31 = vadd.f32 %v3406_v59, %v3405_v35  ;;  %vm10281_vm8 = vmmov %vm10263_vm11 }
 0x30e   : > { %v3504_v30 = vsel %vm10265_vm5, %v3250_v25, %v3503_v42  ;;  %v3587_v52 = vsub.s32 3, %v7430_v2  ;;  %v3292_v0 = vadd.f32 %v3291_v17, %v3290_v32  ;;  %v3366_v3 = vrot.slane %v8488_v60, 2  ;;  %v2614_v17 = vld [vmem:[#allocation3 + $0x18] sm:$0xff]  ;;  %vm10276_vm7 = vmmov %vm10265_vm5 }
 0x30f   : > { %v3414_v27 = vadd.f32 %v3413_v7, %v3412_v4  ;;  %v2066_v40 = vunpack.c.l.bf16 %v7992_v28  ;;  %v3334_v55 = vadd.f32 %v3333_v11, %v3332_v43  ;;  %v3373_v34 = vrot.slane %v3372_v10, 2  ;;  %vm10283_vm4 = vmmov %vm10264_vm1 }
 0x310   : > { %v3408_v63 = vrot.slane %v8491_v31, 2  ;;  %v8500_v33 = vrot.slane %v8497_v44, %v3587_v52  ;;  %vm10266_vm13 = vcmask 1044484   ;;  %v8506_v37 = vrot.slane %v8503_v62, %v3587_v52  ;;  %vm10284_vm11 = vmmov %vm10265_vm5 }
 0x311   : > { %v3415_v53 = vrot.slane %v3414_v27, 2  ;;  %v3505_v26 = vsel %vm10266_vm13, %v3292_v0, %v3504_v30  ;;  %v2072_v58 = vunpack.c.l.bf16 %v7996_v19  ;;  %v3374_v28 = vadd.f32 %v3373_v34, %v3372_v10  ;;  %vm10277_vm0 = vmmov %vm10266_vm13 }
 0x312   : > { %vm10267_vm9 = vcmask 1045509   ;;  %v2078_v45 = vunpack.c.l.bf16 %v8004_v12  ;;  %v2084_v8 = vunpack.c.l.bf16 %v8008_v18  ;;  %v2090_v29 = vunpack.c.l.bf16 %v8016_v41  ;;  %v10268_v18 = vld [vmem:[#allocation95_spill] sm:$0xff]  ;;  %v10269_v41 = vld [vmem:[#allocation96_spill] sm:$0xff]  ;;  %vm10287_vm5 = vmmov %vm10277_vm0 }
 0x313   : > { %v3506_v57 = vsel %vm10267_vm9, %v3334_v55, %v3505_v26  ;;  %v3416_v25 = vadd.f32 %v3415_v53, %v3414_v27  ;;  %v2096_v21 = vunpack.c.l.bf16 %v8020_v46  ;;  %v2102_v9 = vunpack.c.l.bf16 %v8024_v38  ;;  %v10270_v46 = vld [vmem:[#allocation97_spill] sm:$0xff]  ;;  %v10271_v38 = vld [vmem:[#allocation98_spill] sm:$0xff]  ;;  %vm10278_vm15 = vmmov %vm10267_vm9 }
 0x314   : > { %v3375_v20 = vrot.slane %v3374_v28, 1  ;;  %v2108_v35 = vunpack.c.l.bf16 %v8029_v24  ;;  %v2114_v32 = vunpack.c.l.bf16 %v8033_v54  ;;  %v2120_v19 = vunpack.c.l.bf16 %v8037_v1 }
 0x315   : > { %v3417_v56 = vrot.slane %v3416_v25, 1  ;;  %v2126_v4 = vunpack.c.l.bf16 %v8041_v47  ;;  %v2132_v12 = vunpack.c.l.bf16 %v8045_v50  ;;  %v2138_v22 = vunpack.c.l.bf16 %v10268_v18 }
 0x316   : > { %v3376_v43 = vadd.f32 %v3375_v20, %v3374_v28  ;;  %v2144_v5 = vunpack.c.l.bf16 %v10269_v41  ;;  %v2150_v59 = vunpack.c.l.bf16 %v10270_v46  ;;  %v2156_v42 = vunpack.c.l.bf16 %v10271_v38 }
 0x317   : > { %v3418_v24 = vadd.f32 %v3417_v56, %v3416_v25  ;;  %v2174_v7 = vadd.f32 %v2072_v58, %v2066_v40  ;;  %v2216_v54 = vadd.f32 %v2084_v8, %v2078_v45  ;;  %v2258_v30 = vadd.f32 %v2096_v21, %v2090_v29 }
 0x318   : > { %vm10272_vm10 = vcmask 1046534   ;;  %v2300_v11 = vadd.f32 %v2108_v35, %v2102_v9  ;;  %v2342_v47 = vadd.f32 %v2120_v19, %v2114_v32  ;;  %v2384_v10 = vadd.f32 %v2132_v12, %v2126_v4 }
 0x319   : > { %v3507_v1 = vsel %vm10272_vm10, %v3376_v43, %v3506_v57  ;;  %vm10273_vm6 = vcmask 1047559   ;;  %v2175_v52 = vrot.slane %v2174_v7, 4  ;;  %v2217_v0 = vrot.slane %v2216_v54, 4  ;;  %vm10279_vm12 = vmmov %vm10272_vm10 }
 0x31a   : > { %v3508_v50 = vsel %vm10273_vm6, %v3418_v24, %v3507_v1  ;;  %v2259_v27 = vrot.slane %v2258_v30, 4  ;;  %v2301_v34 = vrot.slane %v2300_v11, 4  ;;  %v2343_v53 = vrot.slane %v2342_v47, 4  ;;  %vm10282_vm3 = vmmov %vm10273_vm6 }
 0x31b   : > { %v3532_v55 = vadd.f32 %v3508_v50, %v2614_v17  ;;  %v2385_v26 = vrot.slane %v2384_v10, 4  ;;  %v2176_v28 = vadd.f32 %v2175_v52, %v2174_v7  ;;  %v2218_v20 = vadd.f32 %v2217_v0, %v2216_v54  ;;  %vm10290_vm6 = vmmov %vm10282_vm3 }
 0x31c   : > { %v2260_v25 = vadd.f32 %v2259_v27, %v2258_v30  ;;  %v2426_v40 = vadd.f32 %v2144_v5, %v2138_v22  ;;  %v2302_v45 = vadd.f32 %v2301_v34, %v2300_v11  ;;  %v2344_v57 = vadd.f32 %v2343_v53, %v2342_v47 }
 0x31d   : > { %3538 = vst [vmem:[#allocation3 + $0x18] sm:$0xff] %v3532_v55  ;;  %v3556_v58 = vmax.f32 %v3532_v55, 1.0  ;;  %v2386_v8 = vadd.f32 %v2385_v26, %v2384_v10  ;;  %v2177_v29 = vrot.slane %v2176_v28, 2  ;;  %v2219_v21 = vrot.slane %v2218_v20, 2 }
 0x31e   : > { %v2261_v9 = vrot.slane %v2260_v25, 2  ;;  %v2427_v35 = vrot.slane %v2426_v40, 4  ;;  %v2303_v32 = vrot.slane %v2302_v45, 2  ;;  %v2345_v19 = vrot.slane %v2344_v57, 2 }
 0x31f   : > { %4569 = vrcp.f32 %v3556_v58  ;;  %v2387_v56 = vrot.slane %v2386_v8, 2  ;;  %v2178_v4 = vadd.f32 %v2177_v29, %v2176_v28  ;;  %v2220_v12 = vadd.f32 %v2219_v21, %v2218_v20 }
 0x320   : > { %v2262_v18 = vadd.f32 %v2261_v9, %v2260_v25  ;;  %v2428_v43 = vadd.f32 %v2427_v35, %v2426_v40  ;;  %v2304_v41 = vadd.f32 %v2303_v32, %v2302_v45  ;;  %v2346_v46 = vadd.f32 %v2345_v19, %v2344_v57 }
 0x321   : > { %v2388_v22 = vadd.f32 %v2387_v56, %v2386_v8  ;;  %v2468_v5 = vadd.f32 %v2156_v42, %v2150_v59  ;;  %v2179_v38 = vrot.slane %v2178_v4, 1  ;;  %v2221_v17 = vrot.slane %v2220_v12, 1 }
 0x322   : > { %v2263_v24 = vrot.slane %v2262_v18, 1  ;;  %v2429_v7 = vrot.slane %v2428_v43, 2  ;;  %v2305_v54 = vrot.slane %v2304_v41, 1  ;;  %v2347_v30 = vrot.slane %v2346_v46, 1 }
 0x323   : > { %v2389_v1 = vrot.slane %v2388_v22, 1  ;;  %v2469_v11 = vrot.slane %v2468_v5, 4  ;;  %v2180_v47 = vadd.f32 %v2179_v38, %v2178_v4  ;;  %v2222_v10 = vadd.f32 %v2221_v17, %v2220_v12  ;;  %v1960_v17 = vld [vmem:[%s5011_s23 + $0x28] sm:$0xff] }
 0x324   : > { %v2264_v50 = vadd.f32 %v2263_v24, %v2262_v18  ;;  %v2430_v52 = vadd.f32 %v2429_v7, %v2428_v43  ;;  %v2306_v0 = vadd.f32 %v2305_v54, %v2304_v41  ;;  %v2348_v27 = vadd.f32 %v2347_v30, %v2346_v46  ;;  %v2060_v18 = vld [vmem:[#allocation2 + $0x8] sm:$0xff]  ;;  %v1963_v24 = vld [vmem:[%s5011_s23 + $0x40] sm:$0xff]  ;;  %v1966_v7 = vld [vmem:[%s5011_s23 + $0x58] sm:$0xff] }
 0x325   : > { %v2390_v55 = vadd.f32 %v2389_v1, %v2388_v22  ;;  %v2470_v34 = vadd.f32 %v2469_v11, %v2468_v5  ;;  %v2565_v26 = vsel %vm10274_vm14, %v2222_v10, %v2180_v47  ;;  %v3115_v59 = vadd.f32 %v3114_v16, %v8460_v23  ;;  %v1957_v22 = vld [vmem:[%s5011_s23 + $0x10] sm:$0xff]  ;;  %v1972_v47 = vld [vmem:[%s5011_s23 + $0x88] sm:$0xff]  ;;  %vm10297_vm14 = vmmov %vm10281_vm8 }
 0x326   : > { %v2431_v53 = vrot.slane %v2430_v52, 1  ;;  %v3157_v42 = vadd.f32 %v3156_v14, %v8462_v6  ;;  %v2566_v20 = vsel %vm10275_vm2, %v2264_v50, %v2565_v26  ;;  %v3199_v25 = vadd.f32 %v3198_v51, %v8464_v15  ;;  %v1969_v11 = vld [vmem:[%s5011_s23 + $0x70] sm:$0xff] }
 0x327   : > { %v2471_v28 = vrot.slane %v2470_v34, 2  ;;  %v3241_v40 = vadd.f32 %v3240_v39, %v8466_v49  ;;  %v2567_v45 = vsel %vm10276_vm7, %v2306_v0, %v2566_v20  ;;  %v3116_v57 = vrot.slane %v3115_v59, 1  ;;  %v2613_v50 = vld [vmem:[#allocation3 + $0x20] sm:$0xff]  ;;  %v10288_v20 = vld [vmem:[#allocation94_spill] sm:$0xff] }
 0x328   : > { %v2432_v58 = vadd.f32 %v2431_v53, %v2430_v52  ;;  %v3158_v23 = vrot.slane %v3157_v42, 1  ;;  %v2568_v8 = vsel %vm10277_vm0, %v2348_v27, %v2567_v45  ;;  %v3200_v6 = vrot.slane %v3199_v25, 1  ;;  %v1975_v27 = vld [vmem:[%s5011_s23 + $0xa0] sm:$0xff]  ;;  %vm10298_vm0 = vmmov %vm10283_vm4 }
 0x329   : > { %v2472_v16 = vadd.f32 %v2471_v28, %v2470_v34  ;;  %v3242_v14 = vrot.slane %v3241_v40, 1  ;;  %v2569_v29 = vsel %vm10278_vm15, %v2390_v55, %v2568_v8  ;;  %v3117_v21 = vadd.f32 %v3116_v57, %v3115_v59  ;;  %v1978_v55 = vld [vmem:[%s5011_s23 + $0xb8] sm:$0xff]  ;;  %v1981_v34 = vld [vmem:[%s5011_s23 + $0xd0] sm:$0xff]  ;;  %v1984_v59 = vld [vmem:[%s5011_s23 + $0xe8] sm:$0xff] }
 0x32a   : > { %v3159_v9 = vadd.f32 %v3158_v23, %v3157_v42  ;;  %v3283_v15 = vadd.f32 %v3282_v13, %v8472_v61  ;;  %v2570_v49 = vsel %vm10279_vm12, %v2432_v58, %v2569_v29  ;;  %v3201_v39 = vadd.f32 %v3200_v6, %v3199_v25  ;;  %v10280_v13 = vld [vmem:[#allocation99_spill] sm:$0xff]  ;;  %v10285_v53 = vld [vmem:[#allocation93_spill] sm:$0xff] }
 0x32b   : > { %v2473_v51 = vrot.slane %v2472_v16, 1  ;;  %v3243_v35 = vadd.f32 %v3242_v14, %v3241_v40  ;;  %v3325_v56 = vadd.f32 %v3324_v36, %v8474_v48  ;;  %v3367_v4 = vadd.f32 %v3366_v3, %v8488_v60  ;;  %v1987_v42 = vld [vmem:[%s5011_s23 + $0x100] sm:$0xff]  ;;  %v1990_v28 = vld [vmem:[%s5011_s23 + $0x118] sm:$0xff]  ;;  %v1993_v23 = vld [vmem:[%s5011_s23 + $0x130] sm:$0xff] }
 0x32c   : > { %v4570_v32 = vpop.eup %4569  ;;  %v3284_v19 = vrot.slane %v3283_v15, 1  ;;  %v3409_v61 = vadd.f32 %v3408_v63, %v8491_v31  ;;  %v3495_v41 = vsel %vm10281_vm8, %v3159_v9, %v3117_v21  ;;  %v3583_v46 = vsub.s32 2, %v7430_v2  ;;  %v1999_v8 = vld [vmem:[%s5011_s23 + $0x160] sm:$0xff]  ;;  %v2002_v21 = vld [vmem:[%s5011_s23 + $0x178] sm:$0xff] }
 0x32d   : > { %v3566_v12 = vmul.f32 %v4570_v32, %v10280_v13  ;;  %v2474_v43 = vadd.f32 %v2473_v51, %v2472_v16  ;;  %v3326_v36 = vrot.slane %v3325_v56, 1  ;;  %v3368_v60 = vrot.slane %v3367_v4, 1  ;;  %v1996_v16 = vld [vmem:[%s5011_s23 + $0x148] sm:$0xff] }
 0x32e   : > { %v3285_v48 = vadd.f32 %v3284_v19, %v3283_v15  ;;  %v3410_v3 = vrot.slane %v3409_v61, 1  ;;  %v3496_v63 = vsel %vm10283_vm4, %v3201_v39, %v3495_v41  ;;  %v8564_v38 = vrot.slane %v8497_v44, %v3583_v46 }
 0x32f   : > { %v3606_v5 = vmul.f32 %v8500_v33, %v3566_v12  ;;  %v2571_v31 = vsel %vm10282_vm3, %v2474_v43, %v2570_v49  ;;  %v3327_v30 = vadd.f32 %v3326_v36, %v3325_v56  ;;  %v3369_v1 = vadd.f32 %v3368_v60, %v3367_v4  ;;  %vm10299_vm3 = vmmov %vm10284_vm11 }
 0x330   : > { %v8569_v54 = vadd.f32 %v2571_v31, %v2060_v18  ;;  %v3411_v33 = vadd.f32 %v3410_v3, %v3409_v61  ;;  %v3497_v52 = vsel %vm10284_vm11, %v3243_v35, %v3496_v63  ;;  %v8576_v0 = vrot.slane %v8503_v62, %v3583_v46 }
 0x331   : > { %v3644_v10 = vadd.f32 %v8506_v37, %v3606_v5  ;;  %vm10286_vm1 = vnez %v10285_v53  ;;  %v3498_v37 = vsel %vm10287_vm5, %v3285_v48, %v3497_v52  ;;  %vm10289_vm13 = vnez %v10288_v20 }
 0x332   : > { %v8583_v26 = vsel %vm10286_vm1, %v1957_v22, 0  ;;  %2607 = vst [vmem:[#allocation2 + $0x8] sm:$0xff] %v8569_v54  ;;  %v8592_v25 = vsel %vm10289_vm13, %v1960_v17, 0  ;;  %v8596_v40 = vsel %vm10286_vm1, %v1963_v24, 0  ;;  %v8600_v58 = vsel %vm10289_vm13, %v1966_v7, 0 }
 0x333   : > { %v3650_v45 = vmax.f32 %v3644_v10, 0.0  ;;  %v3499_v57 = vsel %vm10267_vm9, %v3327_v30, %v3498_v37  ;;  %v8608_v6 = vsel %vm10286_vm1, %v1969_v11, 0  ;;  %v8612_v14 = vsel %vm10289_vm13, %v1972_v47, 0 }
 0x334   : > { %v3500_v29 = vsel %vm10272_vm10, %v3369_v1, %v3499_v57  ;;  %v8618_v9 = vsel %vm10286_vm1, %v1975_v27, 0  ;;  %v8622_v15 = vsel %vm10289_vm13, %v1978_v55, 0  ;;  %v8626_v51 = vsel %vm10286_vm1, %v1981_v34, 0  ;;  %vm10301_vm10 = vmmov %vm10267_vm9 }
 0x335   : > { %3890 = vmatprep.mubr.f32.mxu1 %v3650_v45  ;;  %v3501_v49 = vsel %vm10290_vm6, %v3411_v33, %v3500_v29  ;;  %v8631_v39 = vsel %vm10289_vm13, %v1984_v59, 0  ;;  %v8635_v35 = vsel %vm10286_vm1, %v1987_v42, 0  ;;  %v8639_v32 = vsel %vm10289_vm13, %v1990_v28, 0 }
 0x336   : > { %10291 = vst [vmem:[#allocation95_spill] sm:$0xff] %v8635_v35  ;;  %10292 = vst [vmem:[#allocation96_spill] sm:$0xff] %v8639_v32  ;;  %v3531_v19 = vadd.f32 %v3501_v49, %v2613_v50  ;;  %v8643_v56 = vsel %vm10286_vm1, %v1993_v23, 0  ;;  %v8647_v4 = vsel %vm10289_vm13, %v1996_v16, 0  ;;  %v8651_v61 = vsel %vm10286_vm1, %v1999_v8, 0 }
 0x337   : > { %10293 = vst [vmem:[#allocation97_spill] sm:$0xff] %v8643_v56  ;;  %10294 = vst [vmem:[#allocation98_spill] sm:$0xff] %v8647_v4  ;;  %v8655_v13 = vsel %vm10289_vm13, %v2002_v21, 0  ;;  %v2069_v12 = vunpack.c.h.bf16 %v8583_v26  ;;  %v2075_v18 = vunpack.c.h.bf16 %v8592_v25  ;;  %v2081_v43 = vunpack.c.h.bf16 %v8596_v40 }
 0x338   : > { %10295 = vst [vmem:[#allocation99_spill] sm:$0xff] %v8651_v61  ;;  %10296 = vst [vmem:[#allocation93_spill] sm:$0xff] %v8655_v13  ;;  %v3555_v41 = vmax.f32 %v3531_v19, 1.0  ;;  %v2087_v46 = vunpack.c.h.bf16 %v8600_v58  ;;  %v2093_v48 = vunpack.c.h.bf16 %v8608_v6  ;;  %v2099_v36 = vunpack.c.h.bf16 %v8612_v14 }
 0x339   : > { %3537 = vst [vmem:[#allocation3 + $0x20] sm:$0xff] %v3531_v19  ;;  %v2105_v60 = vunpack.c.h.bf16 %v8618_v9  ;;  %v2111_v3 = vunpack.c.h.bf16 %v8622_v15  ;;  %v2117_v22 = vunpack.c.h.bf16 %v8626_v51  ;;  %v2123_v5 = vunpack.c.h.bf16 %v8631_v39  ;;  %vm10300_vm1 = vmmov %vm10287_vm5 }
 0x33a   : > { %4571 = vrcp.f32 %v3555_v41  ;;  %v2129_v31 = vunpack.c.h.bf16 %v8635_v35  ;;  %v2135_v63 = vunpack.c.h.bf16 %v8639_v32  ;;  %v2141_v17 = vunpack.c.h.bf16 %v8643_v56 }
 0x33b   : > { %v2147_v24 = vunpack.c.h.bf16 %v8647_v4  ;;  %v2153_v7 = vunpack.c.h.bf16 %v8651_v61  ;;  %v2159_v30 = vunpack.c.h.bf16 %v8655_v13  ;;  %v2195_v1 = vadd.f32 %v2075_v18, %v2069_v12 }
 0x33c   : > { %v2237_v33 = vadd.f32 %v2087_v46, %v2081_v43  ;;  %v2279_v11 = vadd.f32 %v2099_v36, %v2093_v48  ;;  %v2321_v47 = vadd.f32 %v2111_v3, %v2105_v60  ;;  %v2363_v10 = vadd.f32 %v2123_v5, %v2117_v22 }
 0x33d   : > { %v2196_v50 = vrot.slane %v2195_v1, 4  ;;  %v2405_v52 = vadd.f32 %v2135_v63, %v2129_v31  ;;  %v2447_v27 = vadd.f32 %v2147_v24, %v2141_v17  ;;  %v2489_v55 = vadd.f32 %v2159_v30, %v2153_v7 }
 0x33e   : > { %v2238_v34 = vrot.slane %v2237_v33, 4  ;;  %v2280_v53 = vrot.slane %v2279_v11, 4  ;;  %v2322_v37 = vrot.slane %v2321_v47, 4  ;;  %v2364_v59 = vrot.slane %v2363_v10, 4 }
 0x33f   : > { %v2197_v42 = vadd.f32 %v2196_v50, %v2195_v1  ;;  %v2406_v28 = vrot.slane %v2405_v52, 4  ;;  %v2448_v20 = vrot.slane %v2447_v27, 4  ;;  %v2490_v45 = vrot.slane %v2489_v55, 4 }
 0x340   : > { %v2239_v57 = vadd.f32 %v2238_v34, %v2237_v33  ;;  %v2281_v23 = vadd.f32 %v2280_v53, %v2279_v11  ;;  %v2323_v16 = vadd.f32 %v2322_v37, %v2321_v47  ;;  %v2365_v8 = vadd.f32 %v2364_v59, %v2363_v10 }
 0x341   : > { %v2198_v29 = vrot.slane %v2197_v42, 2  ;;  %v2407_v21 = vadd.f32 %v2406_v28, %v2405_v52  ;;  %v2449_v49 = vadd.f32 %v2448_v20, %v2447_v27  ;;  %v2491_v19 = vadd.f32 %v2490_v45, %v2489_v55 }
 0x342   : > { %v2240_v12 = vrot.slane %v2239_v57, 2  ;;  %v2282_v18 = vrot.slane %v2281_v23, 2  ;;  %v2324_v43 = vrot.slane %v2323_v16, 2  ;;  %v2366_v41 = vrot.slane %v2365_v8, 2 }
 0x343   : > { %v2199_v46 = vadd.f32 %v2198_v29, %v2197_v42  ;;  %v2408_v48 = vrot.slane %v2407_v21, 2  ;;  %v2450_v36 = vrot.slane %v2449_v49, 2  ;;  %v2492_v60 = vrot.slane %v2491_v19, 2  ;;  %v2063_v29 = vld [vmem:[#allocation2 + $0x20] sm:$0xff] }
 0x344   : > { %v2241_v3 = vadd.f32 %v2240_v12, %v2239_v57  ;;  %v2283_v22 = vadd.f32 %v2282_v18, %v2281_v23  ;;  %v2325_v5 = vadd.f32 %v2324_v43, %v2323_v16  ;;  %v2367_v31 = vadd.f32 %v2366_v41, %v2365_v8 }
 0x345   : > { %v2200_v63 = vrot.slane %v2199_v46, 1  ;;  %v2409_v17 = vadd.f32 %v2408_v48, %v2407_v21  ;;  %v2451_v24 = vadd.f32 %v2450_v36, %v2449_v49  ;;  %v2493_v7 = vadd.f32 %v2492_v60, %v2491_v19 }
 0x346   : > { %v2242_v30 = vrot.slane %v2241_v3, 1  ;;  %v2284_v1 = vrot.slane %v2283_v22, 1  ;;  %v2326_v33 = vrot.slane %v2325_v5, 1  ;;  %v2368_v11 = vrot.slane %v2367_v31, 1 }
 0x347   : > { %v4572_v47 = vpop.eup %4571  ;;  %v2201_v10 = vadd.f32 %v2200_v63, %v2199_v46  ;;  %v2410_v50 = vrot.slane %v2409_v17, 1  ;;  %v2452_v52 = vrot.slane %v2451_v24, 1  ;;  %v2494_v27 = vrot.slane %v2493_v7, 1 }
 0x348   : > { %v3564_v55 = vmul.f32 %v4572_v47, %v8569_v54  ;;  %v2243_v34 = vadd.f32 %v2242_v30, %v2241_v3  ;;  %v2285_v53 = vadd.f32 %v2284_v1, %v2283_v22  ;;  %v2327_v37 = vadd.f32 %v2326_v33, %v2325_v5 }
 0x349   : > { %v2369_v59 = vadd.f32 %v2368_v11, %v2367_v31  ;;  %v2411_v42 = vadd.f32 %v2410_v50, %v2409_v17  ;;  %v2453_v28 = vadd.f32 %v2452_v52, %v2451_v24  ;;  %v2495_v20 = vadd.f32 %v2494_v27, %v2493_v7 }
 0x34a   : > { %v3605_v45 = vmul.f32 %v8564_v38, %v3564_v55  ;;  %v2586_v57 = vsel %vm10297_vm14, %v2243_v34, %v2201_v10  ;;  %vm2619_vm2 = vcmp.ne.bf16.partialorder %v8583_v26, 0  ;;  %vm2622_vm7 = vcmp.ne.bf16.partialorder %v8592_v25, 0 }
 0x34b   : > { %v2587_v23 = vsel %vm10298_vm0, %v2285_v53, %v2586_v57  ;;  %vm2625_vm15 = vcmp.ne.bf16.partialorder %v8596_v40, 0  ;;  %vm2628_vm12 = vcmp.ne.bf16.partialorder %v8600_v58, 0  ;;  %vm2631_vm8 = vcmp.ne.bf16.partialorder %v8608_v6, 0 }
 0x34c   : > { %v3643_v54 = vadd.f32 %v8576_v0, %v3605_v45  ;;  %v2588_v16 = vsel %vm10299_vm3, %v2327_v37, %v2587_v23  ;;  %vm2634_vm4 = vcmp.ne.bf16.partialorder %v8612_v14, 0  ;;  %vm2637_vm11 = vcmp.ne.bf16.partialorder %v8618_v9, 0 }
 0x34d   : > { %v2589_v38 = vsel %vm10300_vm1, %v2369_v59, %v2588_v16  ;;  %vm2649_vm6 = vcmp.ne.bf16.partialorder %v8635_v35, 0  ;;  %vm2652_vm14 = vcmp.ne.bf16.partialorder %v8639_v32, 0  ;;  %vm10302_vm0 = vcmask 1046534  }
 0x34e   : > { %v3649_v8 = vmax.f32 %v3643_v54, 0.0  ;;  %v2590_v21 = vsel %vm10301_vm10, %v2411_v42, %v2589_v38  ;;  %vm2655_vm3 = vcmp.ne.bf16.partialorder %v8643_v56, 0  ;;  %vm2658_vm1 = vcmp.ne.bf16.partialorder %v8647_v4, 0 }
 0x34f   : > { %v2591_v0 = vsel %vm10302_vm0, %v2453_v28, %v2590_v21  ;;  %vm2661_vm5 = vcmp.ne.bf16.partialorder %v8651_v61, 0  ;;  %vm10303_vm13 = vcmask 1047559   ;;  %vm2664_vm9 = vcmp.ne.bf16.partialorder %v8655_v13, 0 }
 0x350   : > { %3891 = vmatmul.mubr.f32.vlgmr.msra.gmra.mxu1 %v3649_v8  ;;  %v2592_v49 = vsel %vm10303_vm13, %v2495_v20, %v2591_v0  ;;  %v10304_v19 = vmov 0  }
 0x351   : > { %v2667_v12 = vsel %vm2619_vm2, 65537, %v10304_v19  ;;  %v2670_v18 = vsel %vm2622_vm7, 65537, %v10304_v19  ;;  %v8705_v43 = vadd.f32 %v2592_v49, %v2063_v29  ;;  %v2673_v41 = vsel %vm2625_vm15, 65537, %v10304_v19 }
 0x352   : > { %v2676_v46 = vsel %vm2628_vm12, 65537, %v10304_v19  ;;  %v2679_v48 = vsel %vm2631_vm8, 65537, %v10304_v19  ;;  %v2682_v36 = vsel %vm2634_vm4, 65537, %v10304_v19  ;;  %v2685_v60 = vsel %vm2637_vm11, 65537, %v10304_v19 }
 0x353   : > { %10305 = vst [vmem:[#allocation94_spill] sm:$0xff] %v8705_v43  ;;  %vm10306_vm2 = vcmp.ne.bf16.partialorder %v8622_v15, 0  ;;  %vm10307_vm7 = vcmp.ne.bf16.partialorder %v8626_v51, 0  ;;  %2610 = vst [vmem:[#allocation2 + $0x20] sm:$0xff] %v8705_v43  ;;  %vm10308_vm15 = vcmp.ne.bf16.partialorder %v8631_v39, 0  ;;  %v2697_v31 = vsel %vm2649_vm6, 65537, %v10304_v19 }
 0x354   : > { %v2688_v3 = vsel %vm10306_vm2, 65537, %v10304_v19  ;;  %v2691_v22 = vsel %vm10307_vm7, 65537, %v10304_v19  ;;  %v2694_v5 = vsel %vm10308_vm15, 65537, %v10304_v19  ;;  %v2700_v63 = vsel %vm2652_vm14, 65537, %v10304_v19 }
 0x355   : > { %v2703_v17 = vsel %vm2655_vm3, 65537, %v10304_v19  ;;  %v2706_v24 = vsel %vm2658_vm1, 65537, %v10304_v19  ;;  %v8747_v7 = vsel %vm2661_vm5, 65537, %v10304_v19  ;;  %v8752_v30 = vsel %vm2664_vm9, 65537, %v10304_v19 }
 0x356   : > { %v2717_v1 = vunpack.c.l.b16 %v2667_v12  ;;  %v2718_v33 = vunpack.c.h.b16 %v2667_v12  ;;  %v2723_v11 = vunpack.c.l.b16 %v2670_v18  ;;  %v2724_v47 = vunpack.c.h.b16 %v2670_v18 }
 0x357   : > { %v2729_v10 = vunpack.c.l.b16 %v2673_v41  ;;  %v2730_v50 = vunpack.c.h.b16 %v2673_v41  ;;  %v2735_v52 = vunpack.c.l.b16 %v2676_v46  ;;  %v2736_v27 = vunpack.c.h.b16 %v2676_v46 }
 0x358   : > { %v2741_v55 = vunpack.c.l.b16 %v2679_v48  ;;  %v2742_v34 = vunpack.c.h.b16 %v2679_v48  ;;  %v2747_v53 = vunpack.c.l.b16 %v2682_v36  ;;  %v2748_v37 = vunpack.c.h.b16 %v2682_v36 }
 0x359   : > { %v2753_v59 = vunpack.c.l.b16 %v2685_v60  ;;  %v2754_v42 = vunpack.c.h.b16 %v2685_v60  ;;  %v2759_v28 = vunpack.c.l.b16 %v2688_v3  ;;  %v2760_v20 = vunpack.c.h.b16 %v2688_v3 }
 0x35a   : > { %v2765_v45 = vunpack.c.l.b16 %v2691_v22  ;;  %v2766_v57 = vunpack.c.h.b16 %v2691_v22  ;;  %v2771_v23 = vunpack.c.l.b16 %v2694_v5  ;;  %v2772_v54 = vunpack.c.h.b16 %v2694_v5 }
 0x35b   : > { %v2777_v16 = vunpack.c.l.b16 %v2697_v31  ;;  %v2778_v38 = vunpack.c.h.b16 %v2697_v31  ;;  %v2783_v8 = vunpack.c.l.b16 %v2700_v63  ;;  %v2784_v29 = vunpack.c.h.b16 %v2700_v63 }
 0x35c   : > { %v2789_v21 = vunpack.c.l.b16 %v2703_v17  ;;  %v2790_v0 = vunpack.c.h.b16 %v2703_v17  ;;  %v2795_v49 = vunpack.c.l.b16 %v2706_v24  ;;  %v2796_v19 = vunpack.c.h.b16 %v2706_v24 }
 0x35d   : > { %v2801_v12 = vunpack.c.l.b16 %v8747_v7  ;;  %v2802_v18 = vunpack.c.h.b16 %v8747_v7  ;;  %v2807_v41 = vunpack.c.l.b16 %v8752_v30  ;;  %v2808_v46 = vunpack.c.h.b16 %v8752_v30 }
 0x35e   : > { %vm8758_vm12 = vcmp.ne.s32.totalorder %v2717_v1, 0  ;;  %vm8762_vm8 = vcmp.ne.s32.totalorder %v2718_v33, 0  ;;  %vm8766_vm4 = vcmp.ne.s32.totalorder %v2723_v11, 0  ;;  %vm8770_vm11 = vcmp.ne.s32.totalorder %v2724_v47, 0 }
 0x35f   : > { %vm8774_vm5 = vcmp.ne.s32.totalorder %v2729_v10, 0  ;;  %vm8778_vm13 = vcmp.ne.s32.totalorder %v2730_v50, 0  ;;  %vm8782_vm9 = vcmp.ne.s32.totalorder %v2735_v52, 0  ;;  %vm8786_vm10 = vcmp.ne.s32.totalorder %v2736_v27, 0 }
 0x360   : > { %vm8790_vm6 = vcmp.ne.s32.totalorder %v2741_v55, 0  ;;  %vm8794_vm14 = vcmp.ne.s32.totalorder %v2742_v34, 0  ;;  %vm8798_vm0 = vcmp.ne.s32.totalorder %v2747_v53, 0  ;;  %v10329_v7 = vmov 0 }
 0x361   : > { %v10330_v7 = vsel %vm8798_vm0, 4294967295, %v10329_v7  ;;  %vm8802_vm3 = vcmp.ne.s32.totalorder %v2748_v37, 0  ;;  %v10331_v30 = vmov 0  ;;  %vm8806_vm1 = vcmp.ne.s32.totalorder %v2753_v59, 0 }
 0x362   : > { %v10332_v30 = vsel %vm8802_vm3, 4294967295, %v10331_v30  ;;  %v10333_v1 = vmov 0  ;;  %vm8810_vm2 = vcmp.ne.s32.totalorder %v2754_v42, 0  ;;  %v10335_v33 = vmov 0 }
 0x363   : > { %v10334_v1 = vsel %vm8806_vm1, 4294967295, %v10333_v1  ;;  %v10336_v33 = vsel %vm8810_vm2, 4294967295, %v10335_v33  ;;  %vm8814_vm7 = vcmp.ne.s32.totalorder %v2759_v28, 0  ;;  %v10337_v11 = vmov 0 }
 0x364   : > { %v10338_v11 = vsel %vm8814_vm7, 4294967295, %v10337_v11  ;;  %vm8818_vm15 = vcmp.ne.s32.totalorder %v2760_v20, 0  ;;  %v10339_v47 = vmov 0  ;;  %vm8822_vm0 = vcmp.ne.s32.totalorder %v2765_v45, 0 }
 0x365   : > { %v10340_v47 = vsel %vm8818_vm15, 4294967295, %v10339_v47  ;;  %v10341_v10 = vmov 0  ;;  %vm8826_vm3 = vcmp.ne.s32.totalorder %v2766_v57, 0  ;;  %v10343_v50 = vmov 0 }
 0x366   : > { %v10342_v10 = vsel %vm8822_vm0, 4294967295, %v10341_v10  ;;  %v10344_v50 = vsel %vm8826_vm3, 4294967295, %v10343_v50  ;;  %vm8830_vm1 = vcmp.ne.s32.totalorder %v2771_v23, 0  ;;  %v10345_v52 = vmov 0 }
 0x367   : > { %v10346_v52 = vsel %vm8830_vm1, 4294967295, %v10345_v52  ;;  %vm8834_vm2 = vcmp.ne.s32.totalorder %v2772_v54, 0  ;;  %v10347_v27 = vmov 0  ;;  %vm8838_vm7 = vcmp.ne.s32.totalorder %v2777_v16, 0 }
 0x368   : > { %v10348_v27 = vsel %vm8834_vm2, 4294967295, %v10347_v27  ;;  %v10349_v55 = vmov 0  ;;  %vm8842_vm15 = vcmp.ne.s32.totalorder %v2778_v38, 0  ;;  %v10351_v34 = vmov 0 }
 0x369   : > { %v10350_v55 = vsel %vm8838_vm7, 4294967295, %v10349_v55  ;;  %v10352_v34 = vsel %vm8842_vm15, 4294967295, %v10351_v34  ;;  %vm8846_vm0 = vcmp.ne.s32.totalorder %v2783_v8, 0  ;;  %v10353_v53 = vmov 0 }
 0x36a   : > { %v10354_v53 = vsel %vm8846_vm0, 4294967295, %v10353_v53  ;;  %vm8850_vm3 = vcmp.ne.s32.totalorder %v2784_v29, 0  ;;  %v10355_v37 = vmov 0  ;;  %vm8854_vm1 = vcmp.ne.s32.totalorder %v2789_v21, 0 }
 0x36b   : > { %v10356_v37 = vsel %vm8850_vm3, 4294967295, %v10355_v37  ;;  %v10357_v59 = vmov 0  ;;  %vm8858_vm2 = vcmp.ne.s32.totalorder %v2790_v0, 0  ;;  %v10359_v42 = vmov 0 }
 0x36c   : > { %v10358_v59 = vsel %vm8854_vm1, 4294967295, %v10357_v59  ;;  %v10360_v42 = vsel %vm8858_vm2, 4294967295, %v10359_v42  ;;  %vm8862_vm7 = vcmp.ne.s32.totalorder %v2795_v49, 0  ;;  %vm8866_vm15 = vcmp.ne.s32.totalorder %v2796_v19, 0 }
 0x36d   : > { %vm8870_vm0 = vcmp.ne.s32.totalorder %v2801_v12, 0  ;;  %vm8874_vm3 = vcmp.ne.s32.totalorder %v2802_v18, 0  ;;  %vm8878_vm1 = vcmp.ne.s32.totalorder %v2807_v41, 0  ;;  %vm8882_vm2 = vcmp.ne.s32.totalorder %v2808_v46, 0 }
 0x36e   : > { %v10373_v16 = vmov 0.0  }
 0x36f   : > { %v4219_v38 = vsel %vm8758_vm12, 1.0, %v10373_v16  ;;  %v4220_v8 = vsel %vm8762_vm8, 1.0, %v10373_v16  ;;  %v4225_v29 = vsel %vm8766_vm4, 1.0, %v10373_v16  ;;  %v4226_v21 = vsel %vm8770_vm11, 1.0, %v10373_v16 }
 0x370   : > { %v4231_v0 = vsel %vm8774_vm5, 1.0, %v10373_v16  ;;  %v4232_v49 = vsel %vm8778_vm13, 1.0, %v10373_v16  ;;  %v4237_v19 = vsel %vm8782_vm9, 1.0, %v10373_v16  ;;  %v4238_v12 = vsel %vm8786_vm10, 1.0, %v10373_v16 }
 0x371   : > { %v4243_v18 = vsel %vm8790_vm6, 1.0, %v10373_v16  ;;  %v4244_v41 = vsel %vm8794_vm14, 1.0, %v10373_v16  ;;  %vm10374_vm12 = vnez %v10330_v7  ;;  %vm10375_vm8 = vnez %v10332_v30 }
 0x372   : > { %v4249_v46 = vsel %vm10374_vm12, 1.0, %v10373_v16  ;;  %v4250_v48 = vsel %vm10375_vm8, 1.0, %v10373_v16  ;;  %vm10376_vm4 = vnez %v10334_v1  ;;  %vm10377_vm11 = vnez %v10336_v33 }
 0x373   : > { %v4255_v36 = vsel %vm10376_vm4, 1.0, %v10373_v16  ;;  %v4256_v60 = vsel %vm10377_vm11, 1.0, %v10373_v16  ;;  %vm10378_vm5 = vnez %v10338_v11  ;;  %vm10379_vm13 = vnez %v10340_v47 }
 0x374   : > { %v4261_v3 = vsel %vm10378_vm5, 1.0, %v10373_v16  ;;  %v4262_v22 = vsel %vm10379_vm13, 1.0, %v10373_v16  ;;  %vm10380_vm9 = vnez %v10342_v10  ;;  %vm10381_vm10 = vnez %v10344_v50 }
 0x375   : > { %v4267_v5 = vsel %vm10380_vm9, 1.0, %v10373_v16  ;;  %v4268_v31 = vsel %vm10381_vm10, 1.0, %v10373_v16  ;;  %vm10382_vm6 = vnez %v10346_v52  ;;  %vm10383_vm14 = vnez %v10348_v27 }
 0x376   : > { %v4273_v63 = vsel %vm10382_vm6, 1.0, %v10373_v16  ;;  %v4274_v17 = vsel %vm10383_vm14, 1.0, %v10373_v16  ;;  %vm10384_vm12 = vnez %v10350_v55  ;;  %vm10385_vm8 = vnez %v10352_v34 }
 0x377   : > { %v4279_v24 = vsel %vm10384_vm12, 1.0, %v10373_v16  ;;  %v4280_v7 = vsel %vm10385_vm8, 1.0, %v10373_v16  ;;  %vm10386_vm4 = vnez %v10354_v53  ;;  %vm10387_vm11 = vnez %v10356_v37 }
 0x378   : > { %v4285_v30 = vsel %vm10386_vm4, 1.0, %v10373_v16  ;;  %v4286_v1 = vsel %vm10387_vm11, 1.0, %v10373_v16  ;;  %vm10388_vm5 = vnez %v10358_v59  ;;  %vm10389_vm13 = vnez %v10360_v42 }
 0x379   : > { %v8961_v33 = vsel %vm10388_vm5, 1.0, %v10373_v16  ;;  %v8966_v11 = vsel %vm10389_vm13, 1.0, %v10373_v16  ;;  %v8971_v47 = vsel %vm8862_vm7, 1.0, %v10373_v16  ;;  %v8976_v10 = vsel %vm8866_vm15, 1.0, %v10373_v16 }
 0x37a   : > { %v8981_v50 = vsel %vm8870_vm0, 1.0, %v10373_v16  ;;  %v8986_v52 = vsel %vm8874_vm3, 1.0, %v10373_v16  ;;  %v8991_v27 = vsel %vm8878_vm1, 1.0, %v10373_v16  ;;  %v8996_v55 = vsel %vm8882_vm2, 1.0, %v10373_v16 }
 0x37b   : > { %v3125_v34 = vadd.f32 %v4225_v29, %v4219_v38  ;;  %v3132_v53 = vadd.f32 %v4226_v21, %v4220_v8  ;;  %v3167_v37 = vadd.f32 %v4237_v19, %v4231_v0  ;;  %v3174_v59 = vadd.f32 %v4238_v12, %v4232_v49 }
 0x37c   : > { %v3209_v42 = vadd.f32 %v4249_v46, %v4243_v18  ;;  %v3216_v20 = vadd.f32 %v4250_v48, %v4244_v41  ;;  %v3251_v45 = vadd.f32 %v4261_v3, %v4255_v36  ;;  %v3258_v57 = vadd.f32 %v4262_v22, %v4256_v60 }
 0x37d   : > { %v3126_v28 = vrot.slane %v3125_v34, 4  ;;  %v3133_v43 = vrot.slane %v3132_v53, 4  ;;  %v3168_v13 = vrot.slane %v3167_v37, 4  ;;  %v3175_v61 = vrot.slane %v3174_v59, 4 }
 0x37e   : > { %v3210_v23 = vrot.slane %v3209_v42, 4  ;;  %v3217_v56 = vrot.slane %v3216_v20, 4  ;;  %v3252_v32 = vrot.slane %v3251_v45, 4  ;;  %v3259_v54 = vrot.slane %v3258_v57, 4 }
 0x37f   : > { %v8998_v4 = vadd.f32 %v3126_v28, %v3125_v34  ;;  %v3134_v16 = vadd.f32 %v3133_v43, %v3132_v53  ;;  %v9000_v35 = vadd.f32 %v3168_v13, %v3167_v37  ;;  %v3176_v38 = vadd.f32 %v3175_v61, %v3174_v59 }
 0x380   : > { %v9002_v8 = vadd.f32 %v3210_v23, %v3209_v42  ;;  %v3218_v21 = vadd.f32 %v3217_v56, %v3216_v20  ;;  %v9005_v0 = vadd.f32 %v3252_v32, %v3251_v45  ;;  %v3260_v49 = vadd.f32 %v3259_v54, %v3258_v57 }
 0x381   : > { %v3128_v29 = vrot.slane %v8998_v4, 2  ;;  %v3135_v19 = vrot.slane %v3134_v16, 2  ;;  %v3170_v12 = vrot.slane %v9000_v35, 2  ;;  %v3177_v18 = vrot.slane %v3176_v38, 2 }
 0x382   : > { %v3212_v41 = vrot.slane %v9002_v8, 2  ;;  %v3219_v46 = vrot.slane %v3218_v21, 2  ;;  %v3254_v43 = vrot.slane %v9005_v0, 2  ;;  %v3261_v13 = vrot.slane %v3260_v49, 2 }
 0x383   : > { %v3293_v48 = vadd.f32 %v4273_v63, %v4267_v5  ;;  %v3136_v61 = vadd.f32 %v3135_v19, %v3134_v16  ;;  %v3178_v36 = vadd.f32 %v3177_v18, %v3176_v38  ;;  %v3300_v60 = vadd.f32 %v4274_v17, %v4268_v31 }
 0x384   : > { %v3335_v3 = vadd.f32 %v4285_v30, %v4279_v24  ;;  %v3220_v22 = vadd.f32 %v3219_v46, %v3218_v21  ;;  %v3262_v56 = vadd.f32 %v3261_v13, %v3260_v49  ;;  %v3342_v34 = vadd.f32 %v4286_v1, %v4280_v7 }
 0x385   : > { %v3294_v32 = vrot.slane %v3293_v48, 4  ;;  %v3137_v53 = vrot.slane %v3136_v61, 1  ;;  %v3179_v37 = vrot.slane %v3178_v36, 1  ;;  %v3301_v59 = vrot.slane %v3300_v60, 4 }
 0x386   : > { %v3336_v42 = vrot.slane %v3335_v3, 4  ;;  %v3221_v28 = vrot.slane %v3220_v22, 1  ;;  %v3263_v20 = vrot.slane %v3262_v56, 1  ;;  %v3343_v57 = vrot.slane %v3342_v34, 4 }
 0x387   : > { %v9010_v45 = vadd.f32 %v3294_v32, %v3293_v48  ;;  %v3138_v23 = vadd.f32 %v3137_v53, %v3136_v61  ;;  %v3180_v54 = vadd.f32 %v3179_v37, %v3178_v36  ;;  %v3302_v5 = vadd.f32 %v3301_v59, %v3300_v60 }
 0x388   : > { %v9012_v63 = vadd.f32 %v3336_v42, %v3335_v3  ;;  %v3222_v31 = vadd.f32 %v3221_v28, %v3220_v22  ;;  %v3264_v17 = vadd.f32 %v3263_v20, %v3262_v56  ;;  %v3344_v30 = vadd.f32 %v3343_v57, %v3342_v34 }
 0x389   : > { %v3296_v24 = vrot.slane %v9010_v45, 2  ;;  %v3303_v7 = vrot.slane %v3302_v5, 2  ;;  %v3377_v16 = vadd.f32 %v8971_v47, %v8961_v33  ;;  %v3384_v38 = vadd.f32 %v8976_v10, %v8966_v11 }
 0x38a   : > { %v3338_v1 = vrot.slane %v9012_v63, 2  ;;  %v3345_v21 = vrot.slane %v3344_v30, 2  ;;  %v3419_v49 = vadd.f32 %v8991_v27, %v8981_v50  ;;  %v3426_v19 = vadd.f32 %v8996_v55, %v8986_v52 }
 0x38b   : > { %vm10390_vm0 = vcmask 1041409   ;;  %v3304_v46 = vadd.f32 %v3303_v7, %v3302_v5  ;;  %v3378_v13 = vrot.slane %v3377_v16, 4  ;;  %v3385_v48 = vrot.slane %v3384_v38, 4 }
 0x38c   : > { %v3516_v18 = vsel %vm10390_vm0, %v3180_v54, %v3138_v23  ;;  %vm10391_vm3 = vcmask 1042434   ;;  %v3346_v36 = vadd.f32 %v3345_v21, %v3344_v30  ;;  %v3420_v60 = vrot.slane %v3419_v49, 4  ;;  %vm10403_vm10 = vmmov %vm10390_vm0 }
 0x38d   : > { %v3517_v61 = vsel %vm10391_vm3, %v3222_v31, %v3516_v18  ;;  %v3427_v33 = vrot.slane %v3426_v19, 4  ;;  %vm10392_vm1 = vcmask 1043459   ;;  %v3305_v11 = vrot.slane %v3304_v46, 1  ;;  %vm10404_vm6 = vmmov %vm10391_vm3 }
 0x38e   : > { %v3518_v47 = vsel %vm10392_vm1, %v3264_v17, %v3517_v61  ;;  %v9027_v10 = vadd.f32 %v3378_v13, %v3377_v16  ;;  %v3386_v3 = vadd.f32 %v3385_v48, %v3384_v38  ;;  %v3595_v50 = vsub.s32 5, %v7430_v2  ;;  %v2616_v48 = vld [vmem:[#allocation3 + $0x10] sm:$0xff]  ;;  %v10399_v61 = vld [vmem:[#allocation99_spill] sm:$0xff]  ;;  %vm10405_vm14 = vmmov %vm10392_vm1 }
 0x38f   : > { %v3347_v27 = vrot.slane %v3346_v36, 1  ;;  %v9030_v52 = vadd.f32 %v3420_v60, %v3419_v49  ;;  %v3428_v55 = vadd.f32 %v3427_v33, %v3426_v19  ;;  %v2068_v22 = vunpack.c.l.bf16 %v8583_v26  ;;  %v10396_v19 = vld [vmem:[#allocation96_spill] sm:$0xff]  ;;  %vm10410_vm11 = vmmov %vm10390_vm0 }
 0x390   : > { %v3306_v56 = vadd.f32 %v3305_v11, %v3304_v46  ;;  %v3380_v32 = vrot.slane %v9027_v10, 2  ;;  %v3387_v34 = vrot.slane %v3386_v3, 2  ;;  %v9035_v53 = vrot.slane %v8497_v44, %v3595_v50  ;;  %vm10412_vm13 = vmmov %vm10391_vm3 }
 0x391   : > { %v3348_v37 = vadd.f32 %v3347_v27, %v3346_v36  ;;  %v3422_v59 = vrot.slane %v9030_v52, 2  ;;  %v3429_v42 = vrot.slane %v3428_v55, 2  ;;  %v9039_v28 = vrot.slane %v8503_v62, %v3595_v50  ;;  %v10400_v36 = vld [vmem:[#allocation93_spill] sm:$0xff]  ;;  %vm10413_vm0 = vmmov %vm10392_vm1 }
 0x392   : > { %v3388_v20 = vadd.f32 %v3387_v34, %v3386_v3  ;;  %vm10393_vm2 = vcmask 1044484   ;;  %v2074_v23 = vunpack.c.l.bf16 %v8592_v25  ;;  %v2080_v26 = vunpack.c.l.bf16 %v8596_v40  ;;  %v10395_v40 = vld [vmem:[#allocation95_spill] sm:$0xff] }
 0x393   : > { %v3519_v57 = vsel %vm10393_vm2, %v3306_v56, %v3518_v47  ;;  %v3430_v54 = vadd.f32 %v3429_v42, %v3428_v55  ;;  %vm10394_vm7 = vcmask 1045509   ;;  %v2086_v44 = vunpack.c.l.bf16 %v8600_v58  ;;  %v10397_v58 = vld [vmem:[#allocation97_spill] sm:$0xff]  ;;  %vm10406_vm12 = vmmov %vm10393_vm2 }
 0x394   : > { %v3520_v5 = vsel %vm10394_vm7, %v3348_v37, %v3519_v57  ;;  %v2092_v31 = vunpack.c.l.bf16 %v8608_v6  ;;  %v3389_v17 = vrot.slane %v3388_v20, 1  ;;  %v2098_v30 = vunpack.c.l.bf16 %v8612_v14  ;;  %v10398_v6 = vld [vmem:[#allocation98_spill] sm:$0xff]  ;;  %vm10407_vm8 = vmmov %vm10394_vm7 }
 0x395   : > { %v2104_v62 = vunpack.c.l.bf16 %v8618_v9  ;;  %v2110_v7 = vunpack.c.l.bf16 %v8622_v15  ;;  %v3431_v16 = vrot.slane %v3430_v54, 1  ;;  %v2116_v38 = vunpack.c.l.bf16 %v8626_v51  ;;  %vm10414_vm3 = vmmov %vm10393_vm2 }
 0x396   : > { %v2122_v25 = vunpack.c.l.bf16 %v8631_v39  ;;  %v2128_v21 = vunpack.c.l.bf16 %v10395_v40  ;;  %v3390_v49 = vadd.f32 %v3389_v17, %v3388_v20  ;;  %v2134_v18 = vunpack.c.l.bf16 %v10396_v19  ;;  %vm10415_vm1 = vmmov %vm10394_vm7 }
 0x397   : > { %v2140_v46 = vunpack.c.l.bf16 %v10397_v58  ;;  %v2146_v13 = vunpack.c.l.bf16 %v10398_v6  ;;  %v3432_v14 = vadd.f32 %v3431_v16, %v3430_v54  ;;  %v2152_v9 = vunpack.c.l.bf16 %v10399_v61 }
 0x398   : > { %v2158_v15 = vunpack.c.l.bf16 %v10400_v36  ;;  %v2188_v60 = vadd.f32 %v2074_v23, %v2068_v22  ;;  %vm10401_vm15 = vcmask 1046534   ;;  %v2230_v33 = vadd.f32 %v2086_v44, %v2080_v26 }
 0x399   : > { %v3521_v51 = vsel %vm10401_vm15, %v3390_v49, %v3520_v5  ;;  %v2272_v39 = vadd.f32 %v2098_v30, %v2092_v31  ;;  %v2314_v47 = vadd.f32 %v2110_v7, %v2104_v62  ;;  %vm10402_vm9 = vcmask 1047559   ;;  %vm10408_vm4 = vmmov %vm10401_vm15 }
 0x39a   : > { %v3522_v11 = vsel %vm10402_vm9, %v3432_v14, %v3521_v51  ;;  %v2189_v3 = vrot.slane %v2188_v60, 4  ;;  %v2356_v50 = vadd.f32 %v2122_v25, %v2116_v38  ;;  %v2398_v27 = vadd.f32 %v2134_v18, %v2128_v21  ;;  %vm10411_vm5 = vmmov %vm10402_vm9 }
 0x39b   : > { %v3534_v55 = vadd.f32 %v3522_v11, %v2616_v48  ;;  %v2231_v56 = vrot.slane %v2230_v33, 4  ;;  %v2273_v34 = vrot.slane %v2272_v39, 4  ;;  %v2315_v37 = vrot.slane %v2314_v47, 4  ;;  %vm10416_vm2 = vmmov %vm10408_vm4 }
 0x39c   : > { %v2190_v42 = vadd.f32 %v2189_v3, %v2188_v60  ;;  %v2357_v20 = vrot.slane %v2356_v50, 4  ;;  %v2399_v57 = vrot.slane %v2398_v27, 4  ;;  %v2440_v54 = vadd.f32 %v2146_v13, %v2140_v46  ;;  %vm10417_vm7 = vmmov %vm10411_vm5 }
 0x39d   : > { %3540 = vst [vmem:[#allocation3 + $0x10] sm:$0xff] %v3534_v55  ;;  %v3558_v22 = vmax.f32 %v3534_v55, 1.0  ;;  %v2232_v23 = vadd.f32 %v2231_v56, %v2230_v33  ;;  %v2274_v5 = vadd.f32 %v2273_v34, %v2272_v39  ;;  %v2316_v26 = vadd.f32 %v2315_v37, %v2314_v47 }
 0x39e   : > { %v2191_v44 = vrot.slane %v2190_v42, 2  ;;  %v2358_v31 = vadd.f32 %v2357_v20, %v2356_v50  ;;  %v2400_v17 = vadd.f32 %v2399_v57, %v2398_v27  ;;  %v2441_v30 = vrot.slane %v2440_v54, 4 }
 0x39f   : > { %4573 = vrcp.f32 %v3558_v22  ;;  %v2233_v62 = vrot.slane %v2232_v23, 2  ;;  %v2275_v7 = vrot.slane %v2274_v5, 2  ;;  %v2317_v16 = vrot.slane %v2316_v26, 2 }
 0x3a0   : > { %v2192_v38 = vadd.f32 %v2191_v44, %v2190_v42  ;;  %v2359_v25 = vrot.slane %v2358_v31, 2  ;;  %v2401_v40 = vrot.slane %v2400_v17, 2  ;;  %v2442_v21 = vadd.f32 %v2441_v30, %v2440_v54 }
 0x3a1   : > { %v2234_v49 = vadd.f32 %v2233_v62, %v2232_v23  ;;  %v2276_v19 = vadd.f32 %v2275_v7, %v2274_v5  ;;  %v2318_v18 = vadd.f32 %v2317_v16, %v2316_v26  ;;  %v2482_v58 = vadd.f32 %v2158_v15, %v2152_v9 }
 0x3a2   : > { %v2193_v46 = vrot.slane %v2192_v38, 1  ;;  %v2360_v6 = vadd.f32 %v2359_v25, %v2358_v31  ;;  %v2402_v13 = vadd.f32 %v2401_v40, %v2400_v17  ;;  %v2443_v48 = vrot.slane %v2442_v21, 2  ;;  %v2062_v40 = vld [vmem:[#allocation2 + $0x18] sm:$0xff] }
 0x3a3   : > { %v2235_v14 = vrot.slane %v2234_v49, 1  ;;  %v2277_v61 = vrot.slane %v2276_v19, 1  ;;  %v2319_v36 = vrot.slane %v2318_v18, 1  ;;  %v2483_v60 = vrot.slane %v2482_v58, 4 }
 0x3a4   : > { %v2194_v51 = vadd.f32 %v2193_v46, %v2192_v38  ;;  %v2361_v33 = vrot.slane %v2360_v6, 1  ;;  %v2403_v39 = vrot.slane %v2402_v13, 1  ;;  %v2444_v47 = vadd.f32 %v2443_v48, %v2442_v21  ;;  %v10409_v38 = vld [vmem:[#allocation94_spill] sm:$0xff] }
 0x3a5   : > { %v2236_v11 = vadd.f32 %v2235_v14, %v2234_v49  ;;  %v2278_v3 = vadd.f32 %v2277_v61, %v2276_v19  ;;  %v2320_v50 = vadd.f32 %v2319_v36, %v2318_v18  ;;  %v2484_v27 = vadd.f32 %v2483_v60, %v2482_v58  ;;  %v2615_v36 = vld [vmem:[#allocation3 + $0x28] sm:$0xff] }
 0x3a6   : > { %v2362_v55 = vadd.f32 %v2361_v33, %v2360_v6  ;;  %v2404_v56 = vadd.f32 %v2403_v39, %v2402_v13  ;;  %v2445_v34 = vrot.slane %v2444_v47, 1  ;;  %v3129_v9 = vadd.f32 %v3128_v29, %v8998_v4 }
 0x3a7   : > { %v2485_v15 = vrot.slane %v2484_v27, 2  ;;  %v2579_v37 = vsel %vm10403_vm10, %v2236_v11, %v2194_v51  ;;  %v3171_v42 = vadd.f32 %v3170_v12, %v9000_v35  ;;  %v3213_v20 = vadd.f32 %v3212_v41, %v9002_v8 }
 0x3a8   : > { %v2446_v57 = vadd.f32 %v2445_v34, %v2444_v47  ;;  %v2580_v54 = vsel %vm10404_vm6, %v2278_v3, %v2579_v37  ;;  %v3130_v22 = vrot.slane %v3129_v9, 1  ;;  %v3255_v23 = vadd.f32 %v3254_v43, %v9005_v0  ;;  %v4579_v47 = vld [vmem:[#allocation7] sm:$0x3f] }
 0x3a9   : > { %v2486_v4 = vadd.f32 %v2485_v15, %v2484_v27  ;;  %v2581_v29 = vsel %vm10405_vm14, %v2320_v50, %v2580_v54  ;;  %v3172_v5 = vrot.slane %v3171_v42, 1  ;;  %v3214_v26 = vrot.slane %v3213_v20, 1  ;;  %v4580_v27 = vld [vmem:[#allocation9] sm:$0x3f]  ;;  %v4348_v15 = vpop.f32.mrf.mxu0 }
 0x3aa   : > { %v2582_v44 = vsel %vm10406_vm12, %v2362_v55, %v2581_v29  ;;  %v3131_v35 = vadd.f32 %v3130_v22, %v3129_v9  ;;  %v3256_v12 = vrot.slane %v3255_v23, 1  ;;  %v3297_v8 = vadd.f32 %v3296_v24, %v9010_v45 }
 0x3ab   : > { %v2487_v41 = vrot.slane %v2486_v4, 1  ;;  %v2583_v31 = vsel %vm10407_vm8, %v2404_v56, %v2582_v44  ;;  %v3173_v17 = vadd.f32 %v3172_v5, %v3171_v42  ;;  %v3215_v30 = vadd.f32 %v3214_v26, %v3213_v20  ;;  %v4349_v37 = vpop.f32.mrf.mxu0 }
 0x3ac   : > { %v4574_v62 = vpop.eup %4573  ;;  %v2584_v0 = vsel %vm10408_vm4, %v2446_v57, %v2583_v31  ;;  %v3257_v43 = vadd.f32 %v3256_v12, %v3255_v23  ;;  %v3298_v7 = vrot.slane %v3297_v8, 1  ;;  %v3339_v16 = vadd.f32 %v3338_v1, %v9012_v63  ;;  %v4311_v57 = vld [vmem:[%s9168_s4] ss:$0 sm:$0xff] }
 0x3ad   : > { %v3570_v25 = vmul.f32 %v4574_v62, %v10409_v38  ;;  %v2488_v21 = vadd.f32 %v2487_v41, %v2486_v4  ;;  %v3381_v45 = vadd.f32 %v3380_v32, %v9027_v10  ;;  %v3423_v24 = vadd.f32 %v3422_v59, %v9030_v52 }
 0x3ae   : > { %v3299_v49 = vadd.f32 %v3298_v7, %v3297_v8  ;;  %v3340_v19 = vrot.slane %v3339_v16, 1  ;;  %v3509_v18 = vsel %vm10410_vm11, %v3173_v17, %v3131_v35  ;;  %v4350_v20 = vadd.f32 %v4349_v37, %v4348_v15 }
 0x3af   : > { %v3608_v58 = vmul.f32 %v9035_v53, %v3570_v25  ;;  %v2585_v63 = vsel %vm10411_vm5, %v2488_v21, %v2584_v0  ;;  %v3382_v1 = vrot.slane %v3381_v45, 1  ;;  %v3424_v46 = vrot.slane %v3423_v24, 1 }
 0x3b0   : > { %v2603_v6 = vadd.f32 %v2585_v63, %v2062_v40  ;;  %v3341_v13 = vadd.f32 %v3340_v19, %v3339_v16  ;;  %v3510_v48 = vsel %vm10412_vm13, %v3215_v30, %v3509_v18  ;;  %v3823_v54 = vadd.f32 %v4350_v20, %v4311_v57 }
 0x3b1   : > { %v3646_v10 = vadd.f32 %v9039_v28, %v3608_v58  ;;  %v3383_v32 = vadd.f32 %v3382_v1, %v3381_v45  ;;  %v3425_v14 = vadd.f32 %v3424_v46, %v3423_v24  ;;  %v3511_v52 = vsel %vm10413_vm0, %v3257_v43, %v3510_v48 }
 0x3b2   : > { %2609 = vst [vmem:[#allocation2 + $0x18] sm:$0xff] %v2603_v6  ;;  %v3512_v59 = vsel %vm10414_vm3, %v3299_v49, %v3511_v52  ;;  %v3591_v28 = vsub.s32 4, %v7430_v2 }
 0x3b3   : > { %v3652_v61 = vmax.f32 %v3646_v10, 0.0  ;;  %v3513_v53 = vsel %vm10415_vm1, %v3341_v13, %v3512_v59 }
 0x3b4   : > { %v3514_v60 = vsel %vm10416_vm2, %v3383_v32, %v3513_v53  ;;  %v3592_v11 = vrot.slane %v4579_v47, %v3591_v28  ;;  %v3630_v55 = vrot.slane %v4580_v27, %v3591_v28 }
 0x3b5   : > { %3960 = vmatprep.mubr.f32.mxu0 %v3652_v61  ;;  %v3515_v51 = vsel %vm10417_vm7, %v3425_v14, %v3514_v60 }
 0x3b6   : > { %v3533_v33 = vadd.f32 %v3515_v51, %v2615_v36 }
 0x3b8   : > { %3539 = vst [vmem:[#allocation3 + $0x28] sm:$0xff] %v3533_v33  ;;  %v3557_v39 = vmax.f32 %v3533_v33, 1.0 }
 0x3ba   : > { %4575 = vrcp.f32 %v3557_v39 }
 0x3c7   : > { %v4576_v3 = vpop.eup %4575 }
 0x3c8   : > { %v3568_v50 = vmul.f32 %v4576_v3, %v2603_v6 }
 0x3ca   : > { %v3607_v56 = vmul.f32 %v3592_v11, %v3568_v50 }
 0x3cc   : > { %v3645_v34 = vadd.f32 %v3630_v55, %v3607_v56 }
 0x3ce   : > { %v3651_v9 = vmax.f32 %v3645_v34, 0.0 }
 0x3d0   : > { %3961 = vmatmul.mubr.f32.vlgmr.msra.gmra.mxu0 %v3651_v9 }
 0x410   : > { %v4383_v42 = vpop.f32.mrf.mxu1 }
 0x412   : > { %v4384_v2 = vpop.f32.mrf.mxu1 }
 0x413   : > { %v4385_v22 = vadd.f32 %v4384_v2, %v4383_v42 }
 0x415   : > { %v3893_v29 = vadd.f32 %v4385_v22, %v3823_v54 }
 0x490   : > { %v4418_v23 = vpop.f32.mrf.mxu0 }
 0x492   : > { %v4419_v4 = vpop.f32.mrf.mxu0 }
 0x493   : > { %v4420_v5 = vadd.f32 %v4419_v4, %v4418_v23 }
 0x495   : > { %v3963_v26 = vadd.f32 %v4420_v5, %v3893_v29 }
 0x497   : > { %v3966_v44 = vmax.f32 %v3963_v26, 0.0 }
 0x499   : > { %3967 = vst [vmem:[%s337_s27] sm:$0xff] %v3966_v44 }
 0x49a PF: > { %s10418_s6 = sld [smem:[#allocation27_spill]]  ;;  %s4313_s11 = sshll.u32 %s4775_s25, 7 }
 0x49b   : > { %s10419_s29 = sld [smem:[#allocation103_spill]]  ;;  %s3982_s15 = sshll.u32 %s337_s27, 4  ;;  %s3983_s15 = int_to_ptr.vmem [resolvable:$true] %s3982_s15 }
 0x49c   : > { %s3969_s9 = scalar_lea.sflag [#allocation6], %s335_s3  ;;  %s4659_s1 = scalar_lea.vmem %s3983_s15, 128 }
 0x49d   : > { %p4660_p7 = scmp.ne.s32.totalorder %s3983_s15, %s4659_s1  ;;  %s4805_s8 = smov [#allocation12]  }
 0x49e   : > { %s4663_s7 = sshll.u32 %s4805_s8, 4  ;;  %s4664_s7 = int_to_ptr.vmem [resolvable:$false] %s4663_s7 }
 0x49f   : > { %s4665_s12 = scalar_lea.vmem %s4664_s7, 256  ;;  %p4666_p10 = scmp.lt.s32.totalorder %s3983_s15, %s4664_s7 }
 0x4a0   : > { %p10420_p3 = scmp.ne.s32.totalorder %s10418_s6, 0  ;;  %p4667_p2 = scmp.lt.s32.totalorder %s4665_s12, %s4659_s1 }
 0x4a1   : > { %s3980_s30 = scalar_lea.hbm %s10419_s29, %s4313_s11 }
 0x4a2   : > { %p4661_p5 = pnand %p4660_p7, %p10420_p3  ;;  %p4668_p8 = por %p4667_p2, %p4666_p10 }
 0x4a4   : > { %p4662_p1 = pneg %p4661_p5 }
 0x4a6   : > { %p4669_p9 = pnand %p4668_p8, %p4662_p1 }
 0x4a8   : > { %4672 = shalt.err (!%p4669_p9)
}
 0x4a9   : > { %s4673_s25 = scalar_lea.hbm %s3980_s30, 128  ;;  %s4677_s14 = scalar_lea.hbm %s10419_s29, 256 }
 0x4aa   : > { %p4674_p11 = scmp.ne.s32.totalorder %s3980_s30, %s4673_s25  ;;  %p4678_p6 = scmp.lt.s32.totalorder %s3980_s30, %s10419_s29 }
 0x4ab   : > { %p4679_p12 = scmp.lt.s32.totalorder %s4677_s14, %s4673_s25 }
 0x4ac   : > { %p4675_p13 = pnand %p4674_p11, %p10420_p3 }
 0x4ad   : > { %p4680_p0 = por %p4679_p12, %p4678_p6 }
 0x4ae   : > { %p4676_p4 = pneg %p4675_p13 }
 0x4b0   : > { %p4681_p7 = pnand %p4680_p0, %p4676_p4 }
 0x4b2   : > { %4684 = shalt.err (!%p4681_p7)
}
 0x4b3   : > { %4438 = dma.vmem_to_hbm [thread:$0]  (%p10420_p3), %s3983_s15, 128, %s3980_s30, %s3969_s9  }
 0x4b4 PF: > { %s10421_s18 = sld [smem:[#allocation24_spill]] }
 0x4b5   : > { %s10422_s5 = sld [smem:[#allocation19_spill]] }
 0x4b6   : > { %s10423_s20 = sld [smem:[#allocation30_spill]] }
 0x4ba   : > { %p4460_p5 = scmp.ge.s32.totalorder %s10421_s18, 2 }
 0x4bb   : > { %s3994_s23 = sand.u32 1, %s10422_s5  }
 0x4bc   : > { %p10424_p1 = scmp.ne.s32.totalorder %s10423_s20, 0  ;;  %s3995_s3 = scalar_lea.sflag [#allocation6], %s3994_s23 }
 0x4be   : > { %p4451_p10 = pnand %p4460_p5, %p10424_p1 }
 0x4c0   : > { %p4452_p2 = pneg %p4451_p10 }
 0x4c2   : > { %4742 = dma.done.wait (%p4452_p2), %s3995_s3, 128  }
 0x4c3   : > { %4744 = vsyncadd (%p4452_p2), %s3995_s3, 4294967168  ;;  %s23_s28 = sadd.s32 1, %s10421_s18   ;;  %s10425_s26 = sld [smem:[#allocation20_spill]] }
 0x4c4   : > { %p20_p8 = scmp.ge.s32.totalorder %s23_s28, 10   ;;  %s10426_s20 = sld [smem:[#allocation28_spill]] }
 0x4c5   : > { %s10427_s27 = sld [smem:[#allocation21_spill]]  ;;  %s10433_s18 = smov %s4751_s19 }
 0x4c6   : > { %s10428_s23 = sld [smem:[#allocation29_spill]]  ;;  %s10435_s21 = smov %s4763_s22 }
 0x4c7   : > { %s10429_s24 = sld [smem:[#allocation22_spill]] }
 0x4c8   : > { %s10430_s25 = sld [smem:[#allocation23_spill]] }
 0x4c9   : > { %s10431_s6 = sld [smem:[#allocation25_spill]]  ;;  %s10434_s19 = smov %s10425_s26 }
 0x4ca   : > { %s10432_s11 = sld [smem:[#allocation26_spill]] }
 0x4cb   : > { %s10436_s22 = smov %s10427_s27 }
 0x4cc   :  { %22 = sbr.rel (!%p20_p8) target bundleno = 16 (0x10), region = 114 }
 0x4cf   : > { %s10437_s26 = smov %s10431_s6 }
 0x4d0   : > { %s10438_s27 = smov %s10432_s11 }
 0x4d1   :  { %4000 = vsyncpa [#allocation5], 1 }
 0x4d2   :  { %4002 = vsyncpa [#allocation5 + $0x1], 1 }
 0x4d3   :  { %4003 = vsyncpa [#allocation8], 1 }
 0x4d4   :  { %4004 = vsyncpa [#allocation11], 1 }
 0x4d5   :  { %4005 = vsyncpa [#allocation6], 1 }
 0x4d6   :  { %4007 = vsyncpa [#allocation6 + $0x1], 1 }

</bundles_post_ra>
